<compile_context>
chip_gen: v5e
topology: v5e:2x2
jax: 0.10.0
libtpu: 0.0.40
codegen_flags: <defaults>
</compile_context>

<pallas_src>
import functools
import math

import jax
import jax.numpy as jnp
from jax import lax
from jax.experimental import pallas as pl
from jax.experimental.pallas import tpu as pltpu


# ---------------------------------------------------------------------------
# Generation-aware tiling / VMEM budgets
# ---------------------------------------------------------------------------
def _vmem_capacity_bytes():
    try:
        info = pltpu.get_tpu_info()
        for name in ("vmem_capacity_bytes", "vmem_size_bytes", "vmem_bytes"):
            v = getattr(info, name, None)
            if v:
                return int(v)
    except Exception:
        pass
    return 64 << 20  # conservative fallback (v7x per-TensorCore VMEM)


class _Caps:
    def __init__(self):
        cap = _vmem_capacity_bytes()
        if cap >= (128 << 20):          # v5e / v6e (128 MiB VMEM)
            self.max_rows = 512
            self.max_cols = 512
            self.budget = 80 << 20
            self.clamp = 100 << 20
        else:                           # v7x (64 MiB per TensorCore)
            self.max_rows = 256
            self.max_cols = 256
            self.budget = 40 << 20
            self.clamp = 48 << 20


@functools.lru_cache(maxsize=1)
def _caps():
    return _Caps()


def _round_rows(n, cap):
    """Row tile: full extent if it fits, else the largest multiple of 8 <= cap."""
    if n <= cap:
        return n
    return max(8, (cap // 8) * 8)


def _pick_gemm_tiles(rows, k, n, itemsize, *, n_weights=1, n_out_like_inputs=0,
                     norm_scratch=False):
    caps = _caps()
    tm = _round_rows(rows, caps.max_rows)
    tn = n if n <= caps.max_cols else caps.max_cols

    def step_bytes(tm_, tn_):
        b = itemsize * (tm_ * k                                   # activation tile
                        + n_weights * k * tn_                     # weight tile(s)
                        + (1 + n_out_like_inputs) * tm_ * tn_     # out + row/col extras
                        + 2 * k + 2 * tn_)                        # small vectors
        b *= 2                                                    # double-buffering
        if norm_scratch:
            b += 4 * tm_ * k                                      # f32 xn cache
        return b

    # Shrink tn first but keep the output lane-dense (>= 128 lanes), then tm
    # (not below 128 while tn can still give), then last resorts.
    while step_bytes(tm, tn) > caps.budget:
        if tn > 256:
            tn //= 2
        elif tm > 128:
            tm = max(128, (tm // 2 // 8) * 8)
        elif tn > 128:
            tn //= 2
        elif tm > 8:
            tm = max(8, (tm // 2 // 8) * 8)
        else:
            break
    return tm, tn, step_bytes(tm, tn)


def _pick_attn_tiles(bh, s, dh, itemsize):
    caps = _caps()
    tq = _round_rows(s, caps.max_rows)
    tk = _round_rows(s, caps.max_rows)
    hb = 1

    def step_bytes(hb_, tq_, tk_):
        b = itemsize * hb_ * (2 * tq_ * dh + 2 * tk_ * dh)        # q, out, k, v
        b *= 2                                                    # double-buffering
        b += 4 * hb_ * tq_ * tk_                                  # f32 scores
        b += 4 * hb_ * tq_ * dh                                   # f32 accumulator
        return b

    while step_bytes(1, tq, tk) > caps.budget:
        if tk > 128:
            tk = max(128, (tk // 2 // 8) * 8)
        elif tq > 128:
            tq = max(128, (tq // 2 // 8) * 8)
        elif tk > 8:
            tk = max(8, tk // 2)
        elif tq > 8:
            tq = max(8, tq // 2)
        else:
            break

    # Batch as many (batch, head) pairs per grid step as the budget allows.
    while hb * 2 <= bh and hb < 16 and step_bytes(hb * 2, tq, tk) <= caps.budget:
        hb *= 2
    return hb, tq, tk, step_bytes(hb, tq, tk)


def _compiler_params(step_bytes, semantics):
    caps = _caps()
    vmem_limit = int(min(max(step_bytes + (8 << 20), 32 << 20), caps.clamp))
    return pltpu.CompilerParams(dimension_semantics=semantics,
                                vmem_limit_bytes=vmem_limit)


# ---------------------------------------------------------------------------
# In-kernel helper: swap interleaved (even, odd) lane pairs.
# ---------------------------------------------------------------------------
def _pair_swap(x):
    """y[..., 2j] = x[..., 2j+1]; y[..., 2j+1] = x[..., 2j]."""
    n = x.shape[-1]
    ax = x.ndim - 1
    if n % 128 == 0:
        left = pltpu.roll(x, shift=n - 1, axis=ax)     # left[i]  = x[i+1]
        right = pltpu.roll(x, shift=1, axis=ax)        # right[i] = x[i-1]
        col = lax.broadcasted_iota(jnp.int32, x.shape, ax)
        return jnp.where((col & 1) == 0, left, right)
    # Robust fallback for non-128-aligned lane widths: pair-swap permutation
    # matmul with a constant matrix built from iota (cheap at small widths).
    r = lax.broadcasted_iota(jnp.int32, (n, n), 0)
    c = lax.broadcasted_iota(jnp.int32, (n, n), 1)
    perm = ((r ^ 1) == c).astype(jnp.float32)
    return jnp.dot(x.astype(jnp.float32), perm, preferred_element_type=jnp.float32)


# ---------------------------------------------------------------------------
# Kernel 1: fused RMSNorm + QKV projection + bias + interleaved RoPE epilogue.
#   out = rope( (rmsnorm(x)*g) @ Wqkv + bqkv )
# The rotary tables carry: Q cols -> scale*cos / scale*(+/-sin);
# K cols -> cos / (+/-sin); V cols -> 1 / 0 (identity).
# ---------------------------------------------------------------------------
def _rmsnorm_qkv_rope_kernel(x_ref, g_ref, w_ref, b_ref, cos_ref, sin_ref,
                             o_ref, xn_ref, *, eps):
    # Normalize the (ts, D) row tile once per row tile and cache it in VMEM.
    @pl.when(pl.program_id(2) == 0)
    def _():
        x = x_ref[0].astype(jnp.float32)
        ms = jnp.mean(x * x, axis=-1, keepdims=True)
        xn_ref[...] = (x * lax.rsqrt(ms + eps)) * g_ref[...].astype(jnp.float32)

    xn = xn_ref[...].astype(w_ref.dtype)
    acc = jnp.dot(xn, w_ref[...], preferred_element_type=jnp.float32)
    acc = acc + b_ref[...].astype(jnp.float32)

    # Interleaved rotary: y = acc*cos + partner(acc)*sin_signed
    partner = _pair_swap(acc)
    out = acc * cos_ref[...].astype(jnp.float32) \
        + partner * sin_ref[...].astype(jnp.float32)
    o_ref[0] = out.astype(o_ref.dtype)


def fused_rmsnorm_qkv_rope(x, gamma, wqkv, bqkv, cos_t, sin_t, *, eps):
    B, S, D = x.shape
    N = wqkv.shape[1]                                  # 3 * D
    ts, tn, step_bytes = _pick_gemm_tiles(
        S, D, N, x.dtype.itemsize, n_weights=1, n_out_like_inputs=2,
        norm_scratch=True)
    grid = (B, pl.cdiv(S, ts), pl.cdiv(N, tn))
    return pl.pallas_call(
        functools.partial(_rmsnorm_qkv_rope_kernel, eps=eps),
        out_shape=jax.ShapeDtypeStruct((B, S, N), x.dtype),
        grid_spec=pltpu.PrefetchScalarGridSpec(
            num_scalar_prefetch=0,
            grid=grid,
            in_specs=[
                pl.BlockSpec((1, ts, D), lambda b, i, j: (b, i, 0)),
                pl.BlockSpec((1, D), lambda b, i, j: (0, 0)),
                pl.BlockSpec((D, tn), lambda b, i, j: (0, j)),
                pl.BlockSpec((1, tn), lambda b, i, j: (0, j)),
                pl.BlockSpec((ts, tn), lambda b, i, j: (i, j)),
                pl.BlockSpec((ts, tn), lambda b, i, j: (i, j)),
            ],
            out_specs=pl.BlockSpec((1, ts, tn), lambda b, i, j: (b, i, j)),
            scratch_shapes=[pltpu.VMEM((ts, D), jnp.float32)],
        ),
        compiler_params=_compiler_params(
            step_bytes, ("parallel", "parallel", "arbitrary")),
    )(x, gamma.reshape(1, D), wqkv, bqkv.reshape(1, N), cos_t, sin_t)


# ---------------------------------------------------------------------------
# Kernel 2: attention core, KV-tiled, NO softmax (matches the reference):
#   out[b,h] = (q[b,h] @ k[b,h]^T) @ v[b,h]     (scale pre-folded into q)
# ---------------------------------------------------------------------------
def _attention_kernel(q_ref, k_ref, v_ref, o_ref, acc_ref, *, s_total):
    kv = pl.program_id(2)

    @pl.when(kv == 0)
    def _():
        acc_ref[...] = jnp.zeros_like(acc_ref)

    q = q_ref[...]                                     # (hb, tq, Dh) native dtype
    k = k_ref[...]                                     # (hb, tk, Dh)
    v = v_ref[...]
    s = jnp.einsum("bqd,bkd->bqk", q, k, preferred_element_type=jnp.float32)
    tk = s.shape[-1]
    if s_total % tk != 0:
        kv_ids = kv * tk + lax.broadcasted_iota(jnp.int32, s.shape, 2)
        s = jnp.where(kv_ids < s_total, s, 0.0)
    acc_ref[...] += jnp.einsum("bqk,bkd->bqd", s.astype(v.dtype), v,
                               preferred_element_type=jnp.float32)

    @pl.when(kv == pl.num_programs(2) - 1)
    def _():
        o_ref[...] = acc_ref[...].astype(o_ref.dtype)


def attention_core(q, k, v):
    bh, s, dh = q.shape
    hb, tq, tk, step_bytes = _pick_attn_tiles(bh, s, dh, q.dtype.itemsize)
    grid = (pl.cdiv(bh, hb), pl.cdiv(s, tq), pl.cdiv(s, tk))
    return pl.pallas_call(
        functools.partial(_attention_kernel, s_total=s),
        out_shape=jax.ShapeDtypeStruct((bh, s, dh), q.dtype),
        grid_spec=pltpu.PrefetchScalarGridSpec(
            num_scalar_prefetch=0,
            grid=grid,
            in_specs=[
                pl.BlockSpec((hb, tq, dh), lambda g, i, j: (g, i, 0)),
                pl.BlockSpec((hb, tk, dh), lambda g, i, j: (g, j, 0)),
                pl.BlockSpec((hb, tk, dh), lambda g, i, j: (g, j, 0)),
            ],
            out_specs=pl.BlockSpec((hb, tq, dh), lambda g, i, j: (g, i, 0)),
            scratch_shapes=[pltpu.VMEM((hb, tq, dh), jnp.float32)],
        ),
        compiler_params=_compiler_params(
            step_bytes, ("parallel", "parallel", "arbitrary")),
    )(q, k, v)


# ---------------------------------------------------------------------------
# Kernel 3: Linear + bias + residual        out = res + y @ W + b
# ---------------------------------------------------------------------------
def _linear_bias_residual_kernel(y_ref, w_ref, b_ref, r_ref, o_ref):
    acc = jnp.dot(y_ref[...].astype(w_ref.dtype), w_ref[...],
                  preferred_element_type=jnp.float32)
    acc = acc + b_ref[...].astype(jnp.float32) + r_ref[...].astype(jnp.float32)
    o_ref[...] = acc.astype(o_ref.dtype)


def linear_bias_residual(y2, w, b, res2):
    rows, k = y2.shape
    n = w.shape[1]
    tm, tn, step_bytes = _pick_gemm_tiles(rows, k, n, y2.dtype.itemsize,
                                          n_weights=1, n_out_like_inputs=1)
    grid = (pl.cdiv(rows, tm), pl.cdiv(n, tn))
    # TODO(synk): alias the residual input to the output via input_output_aliases
    # when the residual is a guaranteed-dead intermediate.
    return pl.pallas_call(
        _linear_bias_residual_kernel,
        out_shape=jax.ShapeDtypeStruct((rows, n), y2.dtype),
        grid_spec=pltpu.PrefetchScalarGridSpec(
            num_scalar_prefetch=0,
            grid=grid,
            in_specs=[
                pl.BlockSpec((tm, k), lambda i, j: (i, 0)),
                pl.BlockSpec((k, tn), lambda i, j: (0, j)),
                pl.BlockSpec((1, tn), lambda i, j: (0, j)),
                pl.BlockSpec((tm, tn), lambda i, j: (i, j)),
            ],
            out_specs=pl.BlockSpec((tm, tn), lambda i, j: (i, j)),
        ),
        compiler_params=_compiler_params(step_bytes, ("parallel", "parallel")),
    )(y2, w, b.reshape(1, n), res2)


# ---------------------------------------------------------------------------
# Kernel 4: fused RMSNorm + SwiGLU up-projection
#   out = silu((rmsnorm(x)*g) @ W1) * ((rmsnorm(x)*g) @ W3)
# ---------------------------------------------------------------------------
def _rmsnorm_swiglu_kernel(x_ref, g_ref, w1_ref, w3_ref, o_ref, xn_ref, *, eps):
    @pl.when(pl.program_id(1) == 0)
    def _():
        x = x_ref[...].astype(jnp.float32)
        ms = jnp.mean(x * x, axis=-1, keepdims=True)
        xn_ref[...] = (x * lax.rsqrt(ms + eps)) * g_ref[...].astype(jnp.float32)

    xn = xn_ref[...].astype(w1_ref.dtype)
    up = jnp.dot(xn, w1_ref[...], preferred_element_type=jnp.float32)
    gate = jnp.dot(xn, w3_ref[...], preferred_element_type=jnp.float32)
    silu = up * pl.reciprocal(1.0 + jnp.exp(-up), approx=True)   # EUP exp + rcp
    o_ref[...] = (silu * gate).astype(o_ref.dtype)


def fused_rmsnorm_swiglu(x2, gamma, w1, w3, *, eps):
    rows, k = x2.shape
    n = w1.shape[1]
    tm, tn, step_bytes = _pick_gemm_tiles(rows, k, n, x2.dtype.itemsize,
                                          n_weights=2, norm_scratch=True)
    grid = (pl.cdiv(rows, tm), pl.cdiv(n, tn))
    return pl.pallas_call(
        functools.partial(_rmsnorm_swiglu_kernel, eps=eps),
        out_shape=jax.ShapeDtypeStruct((rows, n), x2.dtype),
        grid_spec=pltpu.PrefetchScalarGridSpec(
            num_scalar_prefetch=0,
            grid=grid,
            in_specs=[
                pl.BlockSpec((tm, k), lambda i, j: (i, 0)),
                pl.BlockSpec((1, k), lambda i, j: (0, 0)),
                pl.BlockSpec((k, tn), lambda i, j: (0, j)),
                pl.BlockSpec((k, tn), lambda i, j: (0, j)),
            ],
            out_specs=pl.BlockSpec((tm, tn), lambda i, j: (i, j)),
            scratch_shapes=[pltpu.VMEM((tm, k), jnp.float32)],
        ),
        compiler_params=_compiler_params(step_bytes, ("parallel", "arbitrary")),
    )(x2, gamma.reshape(1, k), w1, w3)


# ---------------------------------------------------------------------------
# One-time parameter packing (outside the per-forward jit): packed QKV weights
# and the rotary tables (with the attention scale folded into the Q columns).
# ---------------------------------------------------------------------------
def prepare_params(params, freqs_cos, freqs_sin, *, n_heads, dim, dtype):
    dh = dim // n_heads
    scale = 1.0 / math.sqrt(dh)
    s = freqs_cos.shape[0]

    cos_h = jnp.repeat(freqs_cos, 2, axis=-1)                     # (S, Dh)
    sin_h = jnp.stack([-freqs_sin, freqs_sin], axis=-1).reshape(s, dh)
    cos_d = jnp.tile(cos_h, (1, n_heads))                         # (S, D)
    sin_d = jnp.tile(sin_h, (1, n_heads))
    rope_cos = jnp.concatenate(
        [scale * cos_d, cos_d, jnp.ones((s, dim), jnp.float32)], axis=1).astype(dtype)
    rope_sin = jnp.concatenate(
        [scale * sin_d, sin_d, jnp.zeros((s, dim), jnp.float32)], axis=1).astype(dtype)

    wqkv = jnp.concatenate([params["wq"], params["wk"], params["wv"]], axis=1)
    bqkv = jnp.concatenate([params["bq"], params["bk"], params["bv"]], axis=0)

    return {
        "attn_norm_w": params["attn_norm_w"].astype(dtype),
        "ffn_norm_w": params["ffn_norm_w"].astype(dtype),
        "wqkv": wqkv.astype(dtype), "bqkv": bqkv.astype(dtype),
        "rope_cos": rope_cos, "rope_sin": rope_sin,
        "wo": params["wo"].astype(dtype), "bo": params["bo"].astype(dtype),
        "w1": params["w1"].astype(dtype), "w3": params["w3"].astype(dtype),
        "w2": params["w2"].astype(dtype),
        "b2_zero": jnp.zeros((params["w2"].shape[1],), dtype),
    }


# ---------------------------------------------------------------------------
# Full TransformerBlock forward (weights stored as (in, out); y = x @ W + b)
# ---------------------------------------------------------------------------
def transformer_block_forward(x, prepared, *, n_heads, eps):
    B, S, D = x.shape
    dh = D // n_heads
    rows = B * S

    # attention_norm + QKV projection + RoPE fused in one pallas_call
    qkv = fused_rmsnorm_qkv_rope(
        x, prepared["attn_norm_w"], prepared["wqkv"], prepared["bqkv"],
        prepared["rope_cos"], prepared["rope_sin"], eps=eps)

    # (B, S, 3, H, Dh) -> (3, B, H, S, Dh): one relayout covering q, k and v.
    # TODO(synk): emit the QKV projection directly in head-major layout to
    # remove this transpose and the post-attention one.
    qkv = qkv.reshape(B, S, 3, n_heads, dh).transpose(2, 0, 3, 1, 4)
    q = qkv[0].reshape(B * n_heads, S, dh)
    k = qkv[1].reshape(B * n_heads, S, dh)
    v = qkv[2].reshape(B * n_heads, S, dh)

    attn = attention_core(q, k, v)
    attn = attn.reshape(B, n_heads, S, dh).transpose(0, 2, 1, 3).reshape(rows, D)

    # output projection + first residual
    x2 = x.reshape(rows, D)
    h2 = linear_bias_residual(attn, prepared["wo"], prepared["bo"], x2)

    # ffn_norm + w1/w3 + SwiGLU gate fused
    ff = fused_rmsnorm_swiglu(h2, prepared["ffn_norm_w"], prepared["w1"],
                              prepared["w3"], eps=eps)

    # down projection + second residual (w2 has no bias)
    out2 = linear_bias_residual(ff, prepared["w2"], prepared["b2_zero"], h2)
    return out2.reshape(B, S, D)


# ---------------------------------------------------------------------------
# Pure-JAX reference (mirrors the PyTorch module, incl. complex-valued RoPE)
# ---------------------------------------------------------------------------
def transformer_block_ref(x, params, freqs_cis, *, n_heads, eps):
    B, S, D = x.shape
    dh = D // n_heads

    def rmsnorm(v, w):
        vf = v.astype(jnp.float32)
        n = vf * jax.lax.rsqrt(jnp.mean(vf * vf, axis=-1, keepdims=True) + eps)
        return n.astype(v.dtype) * w

    def rope(v):
        vc = jax.lax.complex(v[..., 0::2], v[..., 1::2])
        vc = vc * freqs_cis[None, :, None, :]
        return jnp.stack([jnp.real(vc), jnp.imag(vc)],
                         axis=-1).reshape(v.shape).astype(v.dtype)

    xa = rmsnorm(x, params["attn_norm_w"])
    q = xa @ params["wq"] + params["bq"]
    k = xa @ params["wk"] + params["bk"]
    v = xa @ params["wv"] + params["bv"]
    q = q.reshape(B, S, n_heads, dh)
    k = k.reshape(B, S, n_heads, dh)
    v = v.reshape(B, S, n_heads, dh)
    q, k = rope(q), rope(k)
    q = q.transpose(0, 2, 1, 3)
    k = k.transpose(0, 2, 1, 3)
    v = v.transpose(0, 2, 1, 3)
    scores = jnp.einsum("bhqd,bhkd->bhqk", q, k) / math.sqrt(dh)   # no softmax
    attn = jnp.einsum("bhqk,bhkd->bhqd", scores, v)
    attn = attn.transpose(0, 2, 1, 3).reshape(B, S, D)
    h = x + (attn @ params["wo"] + params["bo"])
    hn = rmsnorm(h, params["ffn_norm_w"])
    ff = (jax.nn.silu(hn @ params["w1"]) * (hn @ params["w3"])) @ params["w2"]
    return h + ff


def _swiglu_hidden(dim):
    hidden = int(2 * (dim * 4) / 3)
    multiple_of = int(dim / 2)
    return multiple_of * ((hidden + multiple_of - 1) // multiple_of)


if __name__ == "__main__":
    batch, seq, dim, n_heads = 2, 8, 128, 4
    eps = 1e-6
    head_dim = dim // n_heads
    hidden = _swiglu_hidden(dim)        # 384 for dim=128

    key = jax.random.PRNGKey(0)
    keys = jax.random.split(key, 16)
    wscale = 0.05

    def nrm(i, shape):
        return wscale * jax.random.normal(keys[i], shape, jnp.float32)

    params = {
        "attn_norm_w": 1.0 + 0.1 * jax.random.normal(keys[0], (dim,), jnp.float32),
        "ffn_norm_w": 1.0 + 0.1 * jax.random.normal(keys[1], (dim,), jnp.float32),
        "wq": nrm(2, (dim, dim)), "bq": nrm(3, (dim,)),
        "wk": nrm(4, (dim, dim)), "bk": nrm(5, (dim,)),
        "wv": nrm(6, (dim, dim)), "bv": nrm(7, (dim,)),
        "wo": nrm(8, (dim, dim)), "bo": nrm(9, (dim,)),
        "w1": nrm(10, (dim, hidden)),
        "w3": nrm(11, (dim, hidden)),
        "w2": nrm(12, (hidden, dim)),
    }
    x = jax.random.normal(keys[13], (batch, seq, dim), jnp.float32)

    # rotary frequencies (llama convention): freqs_cis[s, j] = exp(i * s * theta_j)
    freqs = 1.0 / (10000.0 ** (jnp.arange(0, head_dim, 2, dtype=jnp.float32) / head_dim))
    angles = jnp.outer(jnp.arange(seq, dtype=jnp.float32), freqs)   # (S, Dh//2)
    cos, sin = jnp.cos(angles), jnp.sin(angles)
    freqs_cis = jax.lax.complex(cos, sin)

    prepared = prepare_params(params, cos, sin, n_heads=n_heads, dim=dim,
                              dtype=x.dtype)

    fwd = jax.jit(functools.partial(transformer_block_forward,
                                    n_heads=n_heads, eps=eps))
    out = fwd(x, prepared)
    jax.block_until_ready(out)

    ref = transformer_block_ref(x, params, freqs_cis, n_heads=n_heads, eps=eps)
    assert out.shape == x.shape
    max_err = float(jnp.max(jnp.abs(out - ref)))
    assert jnp.allclose(out, ref, atol=2e-2, rtol=2e-2), f"max abs err {max_err}"
    print("KERNEL_OK")
</pallas_src>

<mosaic_0001>
module attributes {stable_mosaic.version = 11 : i64} {
  func.func @_rmsnorm_qkv_rope_kernel(%arg0: i32, %arg1: i32, %arg2: i32, %arg3: memref<1x8x128xf32, #tpu.memory_space<vmem>>, %arg4: memref<1x128xf32, #tpu.memory_space<vmem>>, %arg5: memref<128x256xf32, #tpu.memory_space<vmem>>, %arg6: memref<1x256xf32, #tpu.memory_space<vmem>>, %arg7: memref<8x256xf32, #tpu.memory_space<vmem>>, %arg8: memref<8x256xf32, #tpu.memory_space<vmem>>, %arg9: memref<1x8x256xf32, #tpu.memory_space<vmem>>, %arg10: memref<8x128xf32, #tpu.memory_space<vmem>>) attributes {dimension_semantics = [#tpu.dimension_semantics<parallel>, #tpu.dimension_semantics<parallel>, #tpu.dimension_semantics<arbitrary>], iteration_bounds = array<i64: 2, 1, 2>, scalar_prefetch = 0 : i64, scratch_operands = 1 : i64, tpu.core_type = #tpu.core_type<tc>, window_params = [{transform_indices = @transform_0, window_bounds = array<i64: 1, 8, 128>}, {pipeline_mode = #tpu.pipeline_mode<synchronous>, transform_indices = @transform_1, window_bounds = array<i64: 1, 128>}, {transform_indices = @transform_2, window_bounds = array<i64: 128, 256>}, {transform_indices = @transform_3, window_bounds = array<i64: 1, 256>}, {transform_indices = @transform_4, window_bounds = array<i64: 8, 256>}, {transform_indices = @transform_5, window_bounds = array<i64: 8, 256>}, {transform_indices = @transform_6, window_bounds = array<i64: 1, 8, 256>}]} {
    %c0_i32 = arith.constant 0 : i32
    %0 = arith.cmpi eq, %arg2, %c0_i32 : i32
    %1 = arith.extui %0 : i1 to i32
    %c0_i32_0 = arith.constant 0 : i32
    %2 = arith.cmpi ne, %1, %c0_i32_0 : i32
    scf.if %2 {
      %c0_15 = arith.constant 0 : index
      %c0_16 = arith.constant 0 : index
      %c0_17 = arith.constant 0 : index
      %25 = vector.load %arg3[%c0_15, %c0_16, %c0_17] : memref<1x8x128xf32, #tpu.memory_space<vmem>>, vector<1x8x128xf32>
      %26 = vector.shape_cast %25 : vector<1x8x128xf32> to vector<8x128xf32>
      %27 = arith.mulf %26, %26 : vector<8x128xf32>
      %cst_18 = arith.constant dense<0.000000e+00> : vector<8xf32>
      %28 = vector.multi_reduction <add>, %27, %cst_18 [1] : vector<8x128xf32> to vector<8xf32>
      %29 = vector.shape_cast %28 : vector<8xf32> to vector<8x1xf32>
      %cst_19 = arith.constant 1.280000e+02 : f32
      %30 = vector.broadcast %cst_19 : f32 to vector<8x1xf32>
      %31 = arith.divf %29, %30 : vector<8x1xf32>
      %cst_20 = arith.constant 9.99999997E-7 : f32
      %32 = vector.broadcast %cst_20 : f32 to vector<8x1xf32>
      %33 = arith.addf %31, %32 : vector<8x1xf32>
      %34 = math.rsqrt %33 : vector<8x1xf32>
      %35 = vector.broadcast %34 : vector<8x1xf32> to vector<8x128xf32>
      %36 = arith.mulf %26, %35 : vector<8x128xf32>
      %c0_21 = arith.constant 0 : index
      %c0_22 = arith.constant 0 : index
      %37 = vector.load %arg4[%c0_21, %c0_22] : memref<1x128xf32, #tpu.memory_space<vmem>>, vector<1x128xf32>
      %38 = vector.broadcast %37 : vector<1x128xf32> to vector<8x128xf32>
      %39 = arith.mulf %36, %38 : vector<8x128xf32>
      %c0_23 = arith.constant 0 : index
      %c0_24 = arith.constant 0 : index
      %40 = vector.load %arg10[%c0_23, %c0_24] : memref<8x128xf32, #tpu.memory_space<vmem>>, vector<8x128xf32>
      tpu.vector_store %arg10[%c0_23, %c0_24], %39 {strides = array<i32>} : memref<8x128xf32, #tpu.memory_space<vmem>>, vector<8x128xf32>,
    } else {
    }
    %c0 = arith.constant 0 : index
    %c0_1 = arith.constant 0 : index
    %3 = vector.load %arg10[%c0, %c0_1] : memref<8x128xf32, #tpu.memory_space<vmem>>, vector<8x128xf32>
    %c0_2 = arith.constant 0 : index
    %c0_3 = arith.constant 0 : index
    %4 = vector.load %arg5[%c0_2, %c0_3] : memref<128x256xf32, #tpu.memory_space<vmem>>, vector<128x256xf32>
    %cst = arith.constant dense<0.000000e+00> : vector<8x256xf32>
    %5 = tpu.matmul %3, %4, %cst {dimension_numbers = #tpu.dot_dimension_numbers<[1], [0], [0], [1], [0, 0, 1, 1], [], []>} : vector<8x128xf32>, vector<128x256xf32>, vector<8x256xf32> -> vector<8x256xf32>
    %c0_4 = arith.constant 0 : index
    %c0_5 = arith.constant 0 : index
    %6 = vector.load %arg6[%c0_4, %c0_5] : memref<1x256xf32, #tpu.memory_space<vmem>>, vector<1x256xf32>
    %7 = vector.broadcast %6 : vector<1x256xf32> to vector<8x256xf32>
    %8 = arith.addf %5, %7 : vector<8x256xf32>
    %c255_i32 = arith.constant 255 : i32
    %9 = tpu.dynamic_rotate %8 by %c255_i32 dim 1 : vector<8x256xf32>, i32 -> vector<8x256xf32>
    %c1_i32 = arith.constant 1 : i32
    %10 = tpu.dynamic_rotate %8 by %c1_i32 dim 1 : vector<8x256xf32>, i32 -> vector<8x256xf32>
    %11 = tpu.iota {dimensions = array<i32: 1>} : vector<8x256xi32>
    %c1_i32_6 = arith.constant 1 : i32
    %12 = vector.broadcast %c1_i32_6 : i32 to vector<8x256xi32>
    %13 = arith.andi %11, %12 : vector<8x256xi32>
    %c0_i32_7 = arith.constant 0 : i32
    %14 = vector.broadcast %c0_i32_7 : i32 to vector<8x256xi32>
    %15 = arith.cmpi eq, %13, %14 : vector<8x256xi32>
    %16 = arith.select %15, %9, %10 : vector<8x256xi1>, vector<8x256xf32>
    %c0_8 = arith.constant 0 : index
    %c0_9 = arith.constant 0 : index
    %17 = vector.load %arg7[%c0_8, %c0_9] : memref<8x256xf32, #tpu.memory_space<vmem>>, vector<8x256xf32>
    %18 = arith.mulf %8, %17 : vector<8x256xf32>
    %c0_10 = arith.constant 0 : index
    %c0_11 = arith.constant 0 : index
    %19 = vector.load %arg8[%c0_10, %c0_11] : memref<8x256xf32, #tpu.memory_space<vmem>>, vector<8x256xf32>
    %20 = arith.mulf %16, %19 : vector<8x256xf32>
    %21 = arith.addf %18, %20 : vector<8x256xf32>
    %c0_12 = arith.constant 0 : index
    %c0_13 = arith.constant 0 : index
    %c0_14 = arith.constant 0 : index
    %22 = vector.load %arg9[%c0_12, %c0_13, %c0_14] : memref<1x8x256xf32, #tpu.memory_space<vmem>>, vector<1x8x256xf32>
    %23 = vector.shape_cast %22 : vector<1x8x256xf32> to vector<8x256xf32>
    %24 = vector.shape_cast %21 : vector<8x256xf32> to vector<1x8x256xf32>
    tpu.vector_store %arg9[%c0_12, %c0_13, %c0_14], %24 {strides = array<i32>} : memref<1x8x256xf32, #tpu.memory_space<vmem>>, vector<1x8x256xf32>,
    return
  }
  func.func @transform_0(%arg0: i32, %arg1: i32, %arg2: i32) -> (i32, i32, i32) {
    %c0_i32 = arith.constant 0 : i32
    %c0_i32_0 = arith.constant 0 : i32
    return %arg0, %arg1, %c0_i32 : i32, i32, i32
  }
  func.func @transform_1(%arg0: i32, %arg1: i32, %arg2: i32) -> (i32, i32) {
    %c0_i32 = arith.constant 0 : i32
    %c0_i32_0 = arith.constant 0 : i32
    %c0_i32_1 = arith.constant 0 : i32
    return %c0_i32, %c0_i32_0 : i32, i32
  }
  func.func @transform_2(%arg0: i32, %arg1: i32, %arg2: i32) -> (i32, i32) {
    %c0_i32 = arith.constant 0 : i32
    %c0_i32_0 = arith.constant 0 : i32
    return %c0_i32, %arg2 : i32, i32
  }
  func.func @transform_3(%arg0: i32, %arg1: i32, %arg2: i32) -> (i32, i32) {
    %c0_i32 = arith.constant 0 : i32
    %c0_i32_0 = arith.constant 0 : i32
    return %c0_i32, %arg2 : i32, i32
  }
  func.func @transform_4(%arg0: i32, %arg1: i32, %arg2: i32) -> (i32, i32) {
    %c0_i32 = arith.constant 0 : i32
    return %arg1, %arg2 : i32, i32
  }
  func.func @transform_5(%arg0: i32, %arg1: i32, %arg2: i32) -> (i32, i32) {
    %c0_i32 = arith.constant 0 : i32
    return %arg1, %arg2 : i32, i32
  }
  func.func @transform_6(%arg0: i32, %arg1: i32, %arg2: i32) -> (i32, i32, i32) {
    %c0_i32 = arith.constant 0 : i32
    return %arg0, %arg1, %arg2 : i32, i32, i32
  }
}

module attributes {stable_mosaic.version = 11 : i64} {
  func.func @_linear_bias_residual_kernel(%arg0: i32, %arg1: i32, %arg2: memref<16x128xf32, #tpu.memory_space<vmem>>, %arg3: memref<128x128xf32, #tpu.memory_space<vmem>>, %arg4: memref<1x128xf32, #tpu.memory_space<vmem>>, %arg5: memref<16x128xf32, #tpu.memory_space<vmem>>, %arg6: memref<16x128xf32, #tpu.memory_space<vmem>>) attributes {dimension_semantics = [#tpu.dimension_semantics<parallel>, #tpu.dimension_semantics<parallel>], iteration_bounds = array<i64: 1, 1>, scalar_prefetch = 0 : i64, scratch_operands = 0 : i64, tpu.core_type = #tpu.core_type<tc>, window_params = [{transform_indices = @transform_0, window_bounds = array<i64: 16, 128>}, {transform_indices = @transform_1, window_bounds = array<i64: 128, 128>}, {transform_indices = @transform_2, window_bounds = array<i64: 1, 128>}, {transform_indices = @transform_3, window_bounds = array<i64: 16, 128>}, {transform_indices = @transform_4, window_bounds = array<i64: 16, 128>}]} {
    %c0 = arith.constant 0 : index
    %c0_0 = arith.constant 0 : index
    %0 = vector.load %arg2[%c0, %c0_0] : memref<16x128xf32, #tpu.memory_space<vmem>>, vector<16x128xf32>
    %c0_1 = arith.constant 0 : index
    %c0_2 = arith.constant 0 : index
    %1 = vector.load %arg3[%c0_1, %c0_2] : memref<128x128xf32, #tpu.memory_space<vmem>>, vector<128x128xf32>
    %cst = arith.constant dense<0.000000e+00> : vector<16x128xf32>
    %2 = tpu.matmul %0, %1, %cst {dimension_numbers = #tpu.dot_dimension_numbers<[1], [0], [0], [1], [0, 0, 1, 1], [], []>} : vector<16x128xf32>, vector<128x128xf32>, vector<16x128xf32> -> vector<16x128xf32>
    %c0_3 = arith.constant 0 : index
    %c0_4 = arith.constant 0 : index
    %3 = vector.load %arg4[%c0_3, %c0_4] : memref<1x128xf32, #tpu.memory_space<vmem>>, vector<1x128xf32>
    %4 = vector.broadcast %3 : vector<1x128xf32> to vector<16x128xf32>
    %5 = arith.addf %2, %4 : vector<16x128xf32>
    %c0_5 = arith.constant 0 : index
    %c0_6 = arith.constant 0 : index
    %6 = vector.load %arg5[%c0_5, %c0_6] : memref<16x128xf32, #tpu.memory_space<vmem>>, vector<16x128xf32>
    %7 = arith.addf %5, %6 : vector<16x128xf32>
    %c0_7 = arith.constant 0 : index
    %c0_8 = arith.constant 0 : index
    %8 = vector.load %arg6[%c0_7, %c0_8] : memref<16x128xf32, #tpu.memory_space<vmem>>, vector<16x128xf32>
    tpu.vector_store %arg6[%c0_7, %c0_8], %7 {strides = array<i32>} : memref<16x128xf32, #tpu.memory_space<vmem>>, vector<16x128xf32>,
    return
  }
  func.func @transform_0(%arg0: i32, %arg1: i32) -> (i32, i32) {
    %c0_i32 = arith.constant 0 : i32
    %c0_i32_0 = arith.constant 0 : i32
    return %arg0, %c0_i32 : i32, i32
  }
  func.func @transform_1(%arg0: i32, %arg1: i32) -> (i32, i32) {
    %c0_i32 = arith.constant 0 : i32
    %c0_i32_0 = arith.constant 0 : i32
    return %c0_i32, %arg1 : i32, i32
  }
  func.func @transform_2(%arg0: i32, %arg1: i32) -> (i32, i32) {
    %c0_i32 = arith.constant 0 : i32
    %c0_i32_0 = arith.constant 0 : i32
    return %c0_i32, %arg1 : i32, i32
  }
  func.func @transform_3(%arg0: i32, %arg1: i32) -> (i32, i32) {
    %c0_i32 = arith.constant 0 : i32
    return %arg0, %arg1 : i32, i32
  }
  func.func @transform_4(%arg0: i32, %arg1: i32) -> (i32, i32) {
    %c0_i32 = arith.constant 0 : i32
    return %arg0, %arg1 : i32, i32
  }
}

module attributes {stable_mosaic.version = 11 : i64} {
  func.func @_rmsnorm_swiglu_kernel(%arg0: i32, %arg1: i32, %arg2: memref<16x128xf32, #tpu.memory_space<vmem>>, %arg3: memref<1x128xf32, #tpu.memory_space<vmem>>, %arg4: memref<128x256xf32, #tpu.memory_space<vmem>>, %arg5: memref<128x256xf32, #tpu.memory_space<vmem>>, %arg6: memref<16x256xf32, #tpu.memory_space<vmem>>, %arg7: memref<16x128xf32, #tpu.memory_space<vmem>>) attributes {dimension_semantics = [#tpu.dimension_semantics<parallel>, #tpu.dimension_semantics<arbitrary>], iteration_bounds = array<i64: 1, 2>, scalar_prefetch = 0 : i64, scratch_operands = 1 : i64, tpu.core_type = #tpu.core_type<tc>, window_params = [{transform_indices = @transform_0, window_bounds = array<i64: 16, 128>}, {pipeline_mode = #tpu.pipeline_mode<synchronous>, transform_indices = @transform_1, window_bounds = array<i64: 1, 128>}, {transform_indices = @transform_2, window_bounds = array<i64: 128, 256>}, {transform_indices = @transform_3, window_bounds = array<i64: 128, 256>}, {transform_indices = @transform_4, window_bounds = array<i64: 16, 256>}]} {
    %c0_i32 = arith.constant 0 : i32
    %0 = arith.cmpi eq, %arg1, %c0_i32 : i32
    %1 = arith.extui %0 : i1 to i32
    %c0_i32_0 = arith.constant 0 : i32
    %2 = arith.cmpi ne, %1, %c0_i32_0 : i32
    scf.if %2 {
      %c0_11 = arith.constant 0 : index
      %c0_12 = arith.constant 0 : index
      %17 = vector.load %arg2[%c0_11, %c0_12] : memref<16x128xf32, #tpu.memory_space<vmem>>, vector<16x128xf32>
      %18 = arith.mulf %17, %17 : vector<16x128xf32>
      %cst_13 = arith.constant dense<0.000000e+00> : vector<16xf32>
      %19 = vector.multi_reduction <add>, %18, %cst_13 [1] : vector<16x128xf32> to vector<16xf32>
      %20 = vector.shape_cast %19 : vector<16xf32> to vector<16x1xf32>
      %cst_14 = arith.constant 1.280000e+02 : f32
      %21 = vector.broadcast %cst_14 : f32 to vector<16x1xf32>
      %22 = arith.divf %20, %21 : vector<16x1xf32>
      %cst_15 = arith.constant 9.99999997E-7 : f32
      %23 = vector.broadcast %cst_15 : f32 to vector<16x1xf32>
      %24 = arith.addf %22, %23 : vector<16x1xf32>
      %25 = math.rsqrt %24 : vector<16x1xf32>
      %26 = vector.broadcast %25 : vector<16x1xf32> to vector<16x128xf32>
      %27 = arith.mulf %17, %26 : vector<16x128xf32>
      %c0_16 = arith.constant 0 : index
      %c0_17 = arith.constant 0 : index
      %28 = vector.load %arg3[%c0_16, %c0_17] : memref<1x128xf32, #tpu.memory_space<vmem>>, vector<1x128xf32>
      %29 = vector.broadcast %28 : vector<1x128xf32> to vector<16x128xf32>
      %30 = arith.mulf %27, %29 : vector<16x128xf32>
      %c0_18 = arith.constant 0 : index
      %c0_19 = arith.constant 0 : index
      %31 = vector.load %arg7[%c0_18, %c0_19] : memref<16x128xf32, #tpu.memory_space<vmem>>, vector<16x128xf32>
      tpu.vector_store %arg7[%c0_18, %c0_19], %30 {strides = array<i32>} : memref<16x128xf32, #tpu.memory_space<vmem>>, vector<16x128xf32>,
    } else {
    }
    %c0 = arith.constant 0 : index
    %c0_1 = arith.constant 0 : index
    %3 = vector.load %arg7[%c0, %c0_1] : memref<16x128xf32, #tpu.memory_space<vmem>>, vector<16x128xf32>
    %c0_2 = arith.constant 0 : index
    %c0_3 = arith.constant 0 : index
    %4 = vector.load %arg4[%c0_2, %c0_3] : memref<128x256xf32, #tpu.memory_space<vmem>>, vector<128x256xf32>
    %cst = arith.constant dense<0.000000e+00> : vector<16x256xf32>
    %5 = tpu.matmul %3, %4, %cst {dimension_numbers = #tpu.dot_dimension_numbers<[1], [0], [0], [1], [0, 0, 1, 1], [], []>} : vector<16x128xf32>, vector<128x256xf32>, vector<16x256xf32> -> vector<16x256xf32>
    %c0_4 = arith.constant 0 : index
    %c0_5 = arith.constant 0 : index
    %6 = vector.load %arg5[%c0_4, %c0_5] : memref<128x256xf32, #tpu.memory_space<vmem>>, vector<128x256xf32>
    %cst_6 = arith.constant dense<0.000000e+00> : vector<16x256xf32>
    %7 = tpu.matmul %3, %6, %cst_6 {dimension_numbers = #tpu.dot_dimension_numbers<[1], [0], [0], [1], [0, 0, 1, 1], [], []>} : vector<16x128xf32>, vector<128x256xf32>, vector<16x256xf32> -> vector<16x256xf32>
    %cst_7 = arith.constant 0.000000e+00 : f32
    %8 = vector.broadcast %cst_7 : f32 to vector<16x256xf32>
    %9 = arith.subf %8, %5 : vector<16x256xf32>
    %10 = math.exp %9 : vector<16x256xf32>
    %cst_8 = arith.constant 1.000000e+00 : f32
    %11 = vector.broadcast %cst_8 : f32 to vector<16x256xf32>
    %12 = arith.addf %11, %10 : vector<16x256xf32>
    %13 = tpu.reciprocal %12 {approx = true} : vector<16x256xf32> -> vector<16x256xf32>
    %14 = arith.mulf %5, %13 : vector<16x256xf32>
    %15 = arith.mulf %14, %7 : vector<16x256xf32>
    %c0_9 = arith.constant 0 : index
    %c0_10 = arith.constant 0 : index
    %16 = vector.load %arg6[%c0_9, %c0_10] : memref<16x256xf32, #tpu.memory_space<vmem>>, vector<16x256xf32>
    tpu.vector_store %arg6[%c0_9, %c0_10], %15 {strides = array<i32>} : memref<16x256xf32, #tpu.memory_space<vmem>>, vector<16x256xf32>,
    return
  }
  func.func @transform_0(%arg0: i32, %arg1: i32) -> (i32, i32) {
    %c0_i32 = arith.constant 0 : i32
    %c0_i32_0 = arith.constant 0 : i32
    return %arg0, %c0_i32 : i32, i32
  }
  func.func @transform_1(%arg0: i32, %arg1: i32) -> (i32, i32) {
    %c0_i32 = arith.constant 0 : i32
    %c0_i32_0 = arith.constant 0 : i32
    %c0_i32_1 = arith.constant 0 : i32
    return %c0_i32, %c0_i32_0 : i32, i32
  }
  func.func @transform_2(%arg0: i32, %arg1: i32) -> (i32, i32) {
    %c0_i32 = arith.constant 0 : i32
    %c0_i32_0 = arith.constant 0 : i32
    return %c0_i32, %arg1 : i32, i32
  }
  func.func @transform_3(%arg0: i32, %arg1: i32) -> (i32, i32) {
    %c0_i32 = arith.constant 0 : i32
    %c0_i32_0 = arith.constant 0 : i32
    return %c0_i32, %arg1 : i32, i32
  }
  func.func @transform_4(%arg0: i32, %arg1: i32) -> (i32, i32) {
    %c0_i32 = arith.constant 0 : i32
    return %arg0, %arg1 : i32, i32
  }
}

module attributes {stable_mosaic.version = 11 : i64} {
  func.func @_attention_kernel(%arg0: i32, %arg1: i32, %arg2: i32, %arg3: memref<8x8x32xf32, #tpu.memory_space<vmem>>, %arg4: memref<8x8x32xf32, #tpu.memory_space<vmem>>, %arg5: memref<8x8x32xf32, #tpu.memory_space<vmem>>, %arg6: memref<8x8x32xf32, #tpu.memory_space<vmem>>, %arg7: memref<8x8x32xf32, #tpu.memory_space<vmem>>) attributes {dimension_semantics = [#tpu.dimension_semantics<parallel>, #tpu.dimension_semantics<parallel>, #tpu.dimension_semantics<arbitrary>], iteration_bounds = array<i64: 1, 1, 1>, scalar_prefetch = 0 : i64, scratch_operands = 1 : i64, tpu.core_type = #tpu.core_type<tc>, window_params = [{transform_indices = @transform_0, window_bounds = array<i64: 8, 8, 32>}, {transform_indices = @transform_1, window_bounds = array<i64: 8, 8, 32>}, {transform_indices = @transform_2, window_bounds = array<i64: 8, 8, 32>}, {transform_indices = @transform_3, window_bounds = array<i64: 8, 8, 32>}]} {
    %c0_i32 = arith.constant 0 : i32
    %0 = arith.cmpi eq, %arg2, %c0_i32 : i32
    %1 = arith.extui %0 : i1 to i32
    %c0_i32_0 = arith.constant 0 : i32
    %2 = arith.cmpi ne, %1, %c0_i32_0 : i32
    scf.if %2 {
      %cst_18 = arith.constant 0.000000e+00 : f32
      %14 = vector.broadcast %cst_18 : f32 to vector<8x8x32xf32>
      %c0_19 = arith.constant 0 : index
      %c0_20 = arith.constant 0 : index
      %c0_21 = arith.constant 0 : index
      %15 = vector.load %arg7[%c0_19, %c0_20, %c0_21] : memref<8x8x32xf32, #tpu.memory_space<vmem>>, vector<8x8x32xf32>
      tpu.vector_store %arg7[%c0_19, %c0_20, %c0_21], %14 {strides = array<i32>} : memref<8x8x32xf32, #tpu.memory_space<vmem>>, vector<8x8x32xf32>,
    } else {
    }
    %c0 = arith.constant 0 : index
    %c0_1 = arith.constant 0 : index
    %c0_2 = arith.constant 0 : index
    %3 = vector.load %arg3[%c0, %c0_1, %c0_2] : memref<8x8x32xf32, #tpu.memory_space<vmem>>, vector<8x8x32xf32>
    %c0_3 = arith.constant 0 : index
    %c0_4 = arith.constant 0 : index
    %c0_5 = arith.constant 0 : index
    %4 = vector.load %arg4[%c0_3, %c0_4, %c0_5] : memref<8x8x32xf32, #tpu.memory_space<vmem>>, vector<8x8x32xf32>
    %c0_6 = arith.constant 0 : index
    %c0_7 = arith.constant 0 : index
    %c0_8 = arith.constant 0 : index
    %5 = vector.load %arg5[%c0_6, %c0_7, %c0_8] : memref<8x8x32xf32, #tpu.memory_space<vmem>>, vector<8x8x32xf32>
    "tpu.trace_start"() <{level = 10 : i32, message = "bqd,bkd->bqk"}> : () -> ()
    %cst = arith.constant dense<0.000000e+00> : vector<8x8x8xf32>
    %6 = tpu.matmul %3, %4, %cst {dimension_numbers = #tpu.dot_dimension_numbers<[2], [2], [1], [1], [0, 0, 0, 1, 1, 1], [0], [0]>} : vector<8x8x32xf32>, vector<8x8x32xf32>, vector<8x8x8xf32> -> vector<8x8x8xf32>
    "tpu.trace_stop"() : () -> ()
    %c0_9 = arith.constant 0 : index
    %c0_10 = arith.constant 0 : index
    %c0_11 = arith.constant 0 : index
    %7 = vector.load %arg7[%c0_9, %c0_10, %c0_11] : memref<8x8x32xf32, #tpu.memory_space<vmem>>, vector<8x8x32xf32>
    "tpu.trace_start"() <{level = 10 : i32, message = "bqk,bkd->bqd"}> : () -> ()
    %cst_12 = arith.constant dense<0.000000e+00> : vector<8x8x32xf32>
    %8 = tpu.matmul %6, %5, %cst_12 {dimension_numbers = #tpu.dot_dimension_numbers<[2], [1], [1], [2], [0, 0, 0, 1, 1, 2], [0], [0]>} : vector<8x8x8xf32>, vector<8x8x32xf32>, vector<8x8x32xf32> -> vector<8x8x32xf32>
    "tpu.trace_stop"() : () -> ()
    %9 = arith.addf %7, %8 : vector<8x8x32xf32>
    %c0_13 = arith.constant 0 : index
    %c0_14 = arith.constant 0 : index
    %c0_15 = arith.constant 0 : index
    %10 = vector.load %arg7[%c0_13, %c0_14, %c0_15] : memref<8x8x32xf32, #tpu.memory_space<vmem>>, vector<8x8x32xf32>
    tpu.vector_store %arg7[%c0_13, %c0_14, %c0_15], %9 {strides = array<i32>} : memref<8x8x32xf32, #tpu.memory_space<vmem>>, vector<8x8x32xf32>,
    %c0_i32_16 = arith.constant 0 : i32
    %11 = arith.cmpi eq, %arg2, %c0_i32_16 : i32
    %12 = arith.extui %11 : i1 to i32
    %c0_i32_17 = arith.constant 0 : i32
    %13 = arith.cmpi ne, %12, %c0_i32_17 : i32
    scf.if %13 {
      %c0_18 = arith.constant 0 : index
      %c0_19 = arith.constant 0 : index
      %c0_20 = arith.constant 0 : index
      %14 = vector.load %arg7[%c0_18, %c0_19, %c0_20] : memref<8x8x32xf32, #tpu.memory_space<vmem>>, vector<8x8x32xf32>
      %c0_21 = arith.constant 0 : index
      %c0_22 = arith.constant 0 : index
      %c0_23 = arith.constant 0 : index
      %15 = vector.load %arg6[%c0_21, %c0_22, %c0_23] : memref<8x8x32xf32, #tpu.memory_space<vmem>>, vector<8x8x32xf32>
      tpu.vector_store %arg6[%c0_21, %c0_22, %c0_23], %14 {strides = array<i32>} : memref<8x8x32xf32, #tpu.memory_space<vmem>>, vector<8x8x32xf32>,
    } else {
    }
    return
  }
  func.func @transform_0(%arg0: i32, %arg1: i32, %arg2: i32) -> (i32, i32, i32) {
    %c0_i32 = arith.constant 0 : i32
    %c0_i32_0 = arith.constant 0 : i32
    return %arg0, %arg1, %c0_i32 : i32, i32, i32
  }
  func.func @transform_1(%arg0: i32, %arg1: i32, %arg2: i32) -> (i32, i32, i32) {
    %c0_i32 = arith.constant 0 : i32
    %c0_i32_0 = arith.constant 0 : i32
    return %arg0, %arg2, %c0_i32 : i32, i32, i32
  }
  func.func @transform_2(%arg0: i32, %arg1: i32, %arg2: i32) -> (i32, i32, i32) {
    %c0_i32 = arith.constant 0 : i32
    %c0_i32_0 = arith.constant 0 : i32
    return %arg0, %arg2, %c0_i32 : i32, i32, i32
  }
  func.func @transform_3(%arg0: i32, %arg1: i32, %arg2: i32) -> (i32, i32, i32) {
    %c0_i32 = arith.constant 0 : i32
    %c0_i32_0 = arith.constant 0 : i32
    return %arg0, %arg1, %c0_i32 : i32, i32, i32
  }
}

module attributes {stable_mosaic.version = 11 : i64} {
  func.func @_linear_bias_residual_kernel(%arg0: i32, %arg1: i32, %arg2: memref<16x384xf32, #tpu.memory_space<vmem>>, %arg3: memref<384x128xf32, #tpu.memory_space<vmem>>, %arg4: memref<1x128xf32, #tpu.memory_space<vmem>>, %arg5: memref<16x128xf32, #tpu.memory_space<vmem>>, %arg6: memref<16x128xf32, #tpu.memory_space<vmem>>) attributes {dimension_semantics = [#tpu.dimension_semantics<parallel>, #tpu.dimension_semantics<parallel>], iteration_bounds = array<i64: 1, 1>, scalar_prefetch = 0 : i64, scratch_operands = 0 : i64, tpu.core_type = #tpu.core_type<tc>, window_params = [{transform_indices = @transform_0, window_bounds = array<i64: 16, 384>}, {transform_indices = @transform_1, window_bounds = array<i64: 384, 128>}, {transform_indices = @transform_2, window_bounds = array<i64: 1, 128>}, {transform_indices = @transform_3, window_bounds = array<i64: 16, 128>}, {transform_indices = @transform_4, window_bounds = array<i64: 16, 128>}]} {
    %c0 = arith.constant 0 : index
    %c0_0 = arith.constant 0 : index
    %0 = vector.load %arg2[%c0, %c0_0] : memref<16x384xf32, #tpu.memory_space<vmem>>, vector<16x384xf32>
    %c0_1 = arith.constant 0 : index
    %c0_2 = arith.constant 0 : index
    %1 = vector.load %arg3[%c0_1, %c0_2] : memref<384x128xf32, #tpu.memory_space<vmem>>, vector<384x128xf32>
    %cst = arith.constant dense<0.000000e+00> : vector<16x128xf32>
    %2 = tpu.matmul %0, %1, %cst {dimension_numbers = #tpu.dot_dimension_numbers<[1], [0], [0], [1], [0, 0, 1, 1], [], []>} : vector<16x384xf32>, vector<384x128xf32>, vector<16x128xf32> -> vector<16x128xf32>
    %c0_3 = arith.constant 0 : index
    %c0_4 = arith.constant 0 : index
    %3 = vector.load %arg4[%c0_3, %c0_4] : memref<1x128xf32, #tpu.memory_space<vmem>>, vector<1x128xf32>
    %4 = vector.broadcast %3 : vector<1x128xf32> to vector<16x128xf32>
    %5 = arith.addf %2, %4 : vector<16x128xf32>
    %c0_5 = arith.constant 0 : index
    %c0_6 = arith.constant 0 : index
    %6 = vector.load %arg5[%c0_5, %c0_6] : memref<16x128xf32, #tpu.memory_space<vmem>>, vector<16x128xf32>
    %7 = arith.addf %5, %6 : vector<16x128xf32>
    %c0_7 = arith.constant 0 : index
    %c0_8 = arith.constant 0 : index
    %8 = vector.load %arg6[%c0_7, %c0_8] : memref<16x128xf32, #tpu.memory_space<vmem>>, vector<16x128xf32>
    tpu.vector_store %arg6[%c0_7, %c0_8], %7 {strides = array<i32>} : memref<16x128xf32, #tpu.memory_space<vmem>>, vector<16x128xf32>,
    return
  }
  func.func @transform_0(%arg0: i32, %arg1: i32) -> (i32, i32) {
    %c0_i32 = arith.constant 0 : i32
    %c0_i32_0 = arith.constant 0 : i32
    return %arg0, %c0_i32 : i32, i32
  }
  func.func @transform_1(%arg0: i32, %arg1: i32) -> (i32, i32) {
    %c0_i32 = arith.constant 0 : i32
    %c0_i32_0 = arith.constant 0 : i32
    return %c0_i32, %arg1 : i32, i32
  }
  func.func @transform_2(%arg0: i32, %arg1: i32) -> (i32, i32) {
    %c0_i32 = arith.constant 0 : i32
    %c0_i32_0 = arith.constant 0 : i32
    return %c0_i32, %arg1 : i32, i32
  }
  func.func @transform_3(%arg0: i32, %arg1: i32) -> (i32, i32) {
    %c0_i32 = arith.constant 0 : i32
    return %arg0, %arg1 : i32, i32
  }
  func.func @transform_4(%arg0: i32, %arg1: i32) -> (i32, i32) {
    %c0_i32 = arith.constant 0 : i32
    return %arg0, %arg1 : i32, i32
  }
}

</mosaic_0001>

<bundles_post_ra>
// kernel: transformer_block_forward.7
= control target key start
LH: loop header
LB: loop body
LE: loop exit
PB: predicated region body
PF: predicated region fallthrough
CT: control target
= control target key end

     0   :  { %9 = vsyncpa [#allocation3], 0  ;;  %s135_s18 = smov [#allocation2]   ;;  %s136_s20 = smov 128   ;;  %s187_s0 = inlined_call_operand.vmem [shape: f32[16,128], index: 0, kind: input, shape index: {}]   ;;  %s188_s1 = inlined_call_operand.hbm [shape: f32[128,128], index: 1, kind: input, shape index: {}]   ;;  %s189_s2 = inlined_call_operand.vmem [shape: f32[1,128], index: 2, kind: input, shape index: {}]   ;;  %s190_s3 = inlined_call_operand.vmem [shape: f32[16,128], index: 3, kind: input, shape index: {}]   ;;  %s191_s4 = inlined_call_operand.vmem [shape: f32[16,128], index: 4, kind: output, shape index: {}]  }
   0x1   :  { %s16_s17 = sshll.u32 %s188_s1, 4  ;;  %s18_s19 = sshll.u32 %s135_s18, 4  ;;  %s17_s17 = int_to_ptr.hbm [resolvable:$true] %s16_s17  ;;  %s19_s19 = int_to_ptr.vmem [resolvable:$true] %s18_s19 }
   0x2   :  { %s137_s21 = smov 8  }
   0x3   :  { %24 = dma.hbm_to_vmem [thread:$0]  %s17_s17, 2048, %s19_s19, [#allocation3], %s136_s20, %s136_s20, %s137_s21  }
   0x4   :  { %133 = dma.done.wait [#allocation3], 2048  }
   0x5   :  { %134 = vsyncadd [#allocation3], 4294965248  ;;  %v50_v0 = vld [vmem:[#allocation2 + $0x78] sm:$0xff]  ;;  %v49_v1 = vld [vmem:[#allocation2 + $0x70] sm:$0xff] }
   0x6   :  { %55 = vmatpush.msra.mxu0 %v50_v0  ;;  %89 = vmatpush.msra.mxu1 %v50_v0  ;;  %v48_v2 = vld [vmem:[#allocation2 + $0x68] sm:$0xff]  ;;  %v47_v3 = vld [vmem:[#allocation2 + $0x60] sm:$0xff]  ;;  %v46_v4 = vld [vmem:[#allocation2 + $0x58] sm:$0xff] }
   0x7   :  { %v45_v5 = vld [vmem:[#allocation2 + $0x50] sm:$0xff]  ;;  %v44_v6 = vld [vmem:[#allocation2 + $0x48] sm:$0xff]  ;;  %v43_v7 = vld [vmem:[#allocation2 + $0x40] sm:$0xff] }
   0x8   :  { %56 = vmatpush.msra.mxu0 %v49_v1  ;;  %90 = vmatpush.msra.mxu1 %v49_v1  ;;  %v42_v8 = vld [vmem:[#allocation2 + $0x38] sm:$0xff]  ;;  %v41_v9 = vld [vmem:[#allocation2 + $0x30] sm:$0xff]  ;;  %v40_v10 = vld [vmem:[#allocation2 + $0x28] sm:$0xff] }
   0x9   :  { %v39_v11 = vld [vmem:[#allocation2 + $0x20] sm:$0xff]  ;;  %v38_v12 = vld [vmem:[#allocation2 + $0x18] sm:$0xff]  ;;  %v37_v13 = vld [vmem:[#allocation2 + $0x10] sm:$0xff] }
   0xa   :  { %57 = vmatpush.msra.mxu0 %v48_v2  ;;  %91 = vmatpush.msra.mxu1 %v48_v2  ;;  %v36_v14 = vld [vmem:[#allocation2 + $0x8] sm:$0xff]  ;;  %v35_v15 = vld [vmem:[#allocation2] sm:$0xff] }
   0xb   :  { %v33_v16 = vld [vmem:[%s187_s0] sm:$0xff]  ;;  %v34_v17 = vld [vmem:[%s187_s0 + $0x8] sm:$0xff] }
   0xc   :  { %58 = vmatpush.msra.mxu0 %v47_v3  ;;  %92 = vmatpush.msra.mxu1 %v47_v3  ;;  %v108_v18 = vld [vmem:[%s189_s2] ss:$0 sm:$0xff]  ;;  %v79_v22 = vld [vmem:[%s190_s3 + $0x8] sm:$0xff] }
   0xd   :  { %v78_v20 = vld [vmem:[%s190_s3] sm:$0xff] }
   0xe   :  { %59 = vmatpush.msra.mxu0 %v46_v4  ;;  %93 = vmatpush.msra.mxu1 %v46_v4 }
  0x10   :  { %60 = vmatpush.msra.mxu0 %v45_v5  ;;  %94 = vmatpush.msra.mxu1 %v45_v5 }
  0x12   :  { %61 = vmatpush.msra.mxu0 %v44_v6  ;;  %95 = vmatpush.msra.mxu1 %v44_v6 }
  0x14   :  { %62 = vmatpush.msra.mxu0 %v43_v7  ;;  %96 = vmatpush.msra.mxu1 %v43_v7 }
  0x16   :  { %63 = vmatpush.msra.mxu0 %v42_v8  ;;  %97 = vmatpush.msra.mxu1 %v42_v8 }
  0x18   :  { %64 = vmatpush.msra.mxu0 %v41_v9  ;;  %98 = vmatpush.msra.mxu1 %v41_v9 }
  0x1a   :  { %65 = vmatpush.msra.mxu0 %v40_v10  ;;  %99 = vmatpush.msra.mxu1 %v40_v10 }
  0x1c   :  { %66 = vmatpush.msra.mxu0 %v39_v11  ;;  %100 = vmatpush.msra.mxu1 %v39_v11 }
  0x1e   :  { %67 = vmatpush.msra.mxu0 %v38_v12  ;;  %101 = vmatpush.msra.mxu1 %v38_v12 }
  0x20   :  { %68 = vmatpush.msra.mxu0 %v37_v13  ;;  %102 = vmatpush.msra.mxu1 %v37_v13 }
  0x22   :  { %69 = vmatpush.msra.mxu0 %v36_v14  ;;  %103 = vmatpush.msra.mxu1 %v36_v14 }
  0x24   :  { %70 = vmatpush.msra.mxu0 %v35_v15  ;;  %104 = vmatpush.msra.mxu1 %v35_v15 }
  0x25   :  { %71 = vmatmul.f32.vlgmr.msra.gmra.mxu0 %v33_v16  ;;  %74 = vmatmul.f32.vlgmr.msra.gmra.mxu1 %v34_v17 }
  0xa2   :  { %v72_v19 = vpop.f32.mrf.mxu0  ;;  %v75_v21 = vpop.f32.mrf.mxu1 }
  0xa3   :  { %v73_v23 = vadd.f32 %v108_v18, %v72_v19  ;;  %v76_v24 = vadd.f32 %v108_v18, %v75_v21 }
  0xa5   :  { %v80_v25 = vadd.f32 %v78_v20, %v73_v23  ;;  %v81_v26 = vadd.f32 %v79_v22, %v76_v24 }
  0xa7   :  { %82 = vst [vmem:[%s191_s4] sm:$0xff] %v80_v25 }
  0xa8   :  { %83 = vst [vmem:[%s191_s4 + $0x8] sm:$0xff] %v81_v26 }
  0xa9   :  { %88 = vsyncpa [#allocation3], 1 }

// kernel: transformer_block_forward.5
= control target key start
LH: loop header
LB: loop body
LE: loop exit
PB: predicated region body
PF: predicated region fallthrough
CT: control target
= control target key end

     0   :  { %s2578_s0 = inlined_call_operand.hbm [shape: f32[2,8,128], index: 0, kind: input, shape index: {}]   ;;  %s2579_s1 = inlined_call_operand.vmem [shape: f32[1,128], index: 1, kind: input, shape index: {}]   ;;  %s2580_s2 = inlined_call_operand.hbm [shape: f32[128,384], index: 2, kind: input, shape index: {}]   ;;  %s2581_s3 = inlined_call_operand.vmem [shape: f32[1,384], index: 3, kind: input, shape index: {}]   ;;  %s2582_s4 = inlined_call_operand.hbm [shape: f32[8,384], index: 4, kind: input, shape index: {}]   ;;  %s2583_s5 = inlined_call_operand.hbm [shape: f32[8,384], index: 5, kind: input, shape index: {}]   ;;  %s2584_s6 = inlined_call_operand.vmem [shape: f32[2,8,384], index: 6, kind: output, shape index: {}]  }
   0x1   :  { %2591 = sst [smem:[#allocation24_spill]] %s2578_s0 }
   0x2   :  { %2592 = sst [smem:[#allocation25_spill]] %s2579_s1 }
   0x3   :  { %2593 = sst [smem:[#allocation26_spill]] %s2581_s3 }
   0x4   :  { %2594 = sst [smem:[#allocation27_spill]] %s2584_s6 }
   0x5   :  { %11 = vsyncpa [#allocation4], 0 }
   0x6   :  { %13 = vsyncpa [#allocation4 + $0x1], 0 }
   0x7   :  { %14 = vsyncpa [#allocation6], 0 }
   0x8   :  { %16 = vsyncpa [#allocation6 + $0x1], 0 }
   0x9   :  { %17 = vsyncpa [#allocation9], 0 }
   0xa   :  { %19 = vsyncpa [#allocation9 + $0x1], 0  ;;  %s1933_s21 = smov 0   ;;  %s1935_s22 = smov 0  }
   0xb   :  { %s1937_s23 = smov 0   ;;  %s1939_s24 = smov 0  }
   0xc   :  { %s1941_s25 = smov 0   ;;  %s1943_s26 = smov 0  }
   0xd   :  { %s1945_s27 = smov 0   ;;  %s1947_s28 = smov 0  }
   0xe   :  { %s1949_s29 = smov 0   ;;  %s1951_s30 = smov 0  }
   0xf   :  { %s1953_s7 = smov 0   ;;  %s1955_s8 = smov 0  }
  0x10   :  { %s1957_s9 = smov 0  }
  0x11 LB: > { %2595 = sst [smem:[#allocation14_spill]] %s1778_s22  ;;  %s1997_s10 = sadd.s32 4294967295, %s1822_s9   ;;  %s1822_s9 = sphi %s1957_s9, %s25_s9   ;;  %s1818_s8 = sphi %s1955_s8, %s2638_s8   ;;  %s1814_s7 = sphi %s1953_s7, %s2645_s7   ;;  %s1810_s30 = sphi %s1951_s30, %s2636_s30   ;;  %s1806_s29 = sphi %s1949_s29, %s2644_s29   ;;  %s1802_s28 = sphi %s1947_s28, %s2635_s28   ;;  %s1798_s27 = sphi %s1945_s27, %s2643_s27   ;;  %s1794_s26 = sphi %s1943_s26, %s2642_s26   ;;  %s1790_s25 = sphi %s1941_s25, %s2641_s25   ;;  %s1786_s24 = sphi %s1939_s24, %s2640_s24   ;;  %s1782_s23 = sphi %s1937_s23, %s2639_s23   ;;  %s1778_s22 = sphi %s1935_s22, %s2632_s22   ;;  %s1774_s21 = sphi %s1933_s21, %s2631_s21  }
  0x12   : > { %2596 = sst [smem:[#allocation15_spill]] %s1802_s28  ;;  %s37_s11 = sadd.s32 1, %s1814_s7 }
  0x13   : > { %2597 = sst [smem:[#allocation16_spill]] %s1810_s30  ;;  %p38_p0 = scmp.ge.s32.totalorder %s37_s11, 2 }
  0x14   : > { %2598 = sst [smem:[#allocation17_spill]] %s1818_s8  ;;  %s44_s12 = sadd.s32 1, %s1818_s8 }
  0x15   : > { %s53_s13 = sadd.s32 1, %s1802_s28  ;;  %p60_p1 = scmp.ne.s32.totalorder %s1802_s28, %s1798_s27 }
  0x16   : > { %s2647_s11 = smov (%p38_p0, %s37_s11), 0  ;;  %s2649_s12 = smov (!%p38_p0, %s44_s12), %s1818_s8 }
  0x17   : > { %2599 = sst [smem:[#allocation18_spill]] %s2647_s11  ;;  %p61_p2 = scmp.eq.s32.totalorder %s1822_s9, 0 }
  0x18   : > { %p66_p3 = scmp.ne.s32.totalorder %s1798_s27, %s1794_s26  ;;  %p46_p4 = scmp.ge.s32.totalorder %s2649_s12, 2 }
  0x19   : > { %p67_p5 = scmp.eq.s32.totalorder %s1997_s10, 0  ;;  %p2012_p6 = por %p61_p2, %p60_p1 }
  0x1a   : > { %s97_s15 = ssub.s32 %s1814_s7, %s2647_s11  ;;  %s2651_s12 = smov (%p46_p4, %s2649_s12), 0 }
  0x1b   : > { %2601 = sst [smem:[#allocation19_spill]] %s2651_s12  ;;  %p2022_p7 = por %p67_p5, %p66_p3 }
  0x1c   : > { %p98_p8 = scmp.eq.s32.totalorder %s97_s15, 0  ;;  %s48_s17 = ssub.s32 %s1818_s8, %s2651_s12 }
  0x1d   : > { %s100_s18 = sadd.s32 1, %s1790_s25  ;;  %p51_p9 = scmp.eq.s32.totalorder %s48_s17, 0 }
  0x1e   : > { %p107_p10 = scmp.ne.s32.totalorder %s1790_s25, %s1786_s24  ;;  %p113_p12 = scmp.ne.s32.totalorder %s1786_s24, %s1782_s23 }
  0x1f   : > { %s2032_s19 = scalar_select %p98_p8, %s1790_s25, %s100_s18  }
  0x20   : > { %s2035_s20 = scalar_select %p51_p9, %s1802_s28, %s53_s13  }
  0x21   : > { %2603 = sst [smem:[#allocation20_spill]] %s2032_s19  ;;  %p2039_p11 = por %p107_p10, %p61_p2 }
  0x22   : > { %2604 = sst [smem:[#allocation21_spill]] %s2035_s20  ;;  %s209_s11 = sor.u32 %s97_s15, %s48_s17 }
  0x23   : > { %s212_s6 = sadd.s32 1, %s1778_s22  ;;  %p2048_p13 = por %p113_p12, %p67_p5 }
  0x24   : > { %p210_p0 = scmp.eq.s32.totalorder %s209_s11, 0  ;;  %p222_p1 = scmp.ne.s32.totalorder %s1778_s22, %s1774_s21 }
  0x25   : > { %p223_p3 = scmp.eq.s32.totalorder %s1997_s10, 3  ;;  %p1176_p2 = scmp.ge.s32.totalorder %s1822_s9, 4 }
  0x26   : > { %s2056_s18 = scalar_select %p210_p0, %s1778_s22, %s212_s6  }
  0x27   : > { %p2058_p4 = por %p223_p3, %p222_p1  ;;  %248 = sbr.rel (%p1176_p2) target bundleno = 144 (0x90), region = 20 }
  0x28   : > { %2607 = sst [smem:[#allocation22_spill]] %s2056_s18  ;;  %s252_s23 = sand.u32 (!%p1176_p2), 1, %s1802_s28  }
  0x29   : > { %s2608_s13 = scalar_select %p2058_p4, 1, 0 }
  0x2a   : > { %s1178_s15 = sshll.u32 (!%p1176_p2), %s1818_s8, 3  ;;  %s1177_s17 = sshll.u32 (!%p1176_p2), %s252_s23, 3 }
  0x2b   : > { %2609 = sst [smem:[#allocation23_spill]] %s2608_s13  ;;  %s256_s6 = scalar_lea.vmem (!%p1176_p2), [#allocation3], %s1177_s17 }
  0x2c   : > { %s2610_s0 = sld [smem:[#allocation24_spill]]  ;;  %s265_s18 = sshll.u32 %s256_s6, 4  ;;  %s266_s18 = int_to_ptr.vmem [resolvable:$true] %s265_s18 }
  0x2d   : > { %s253_s22 = scalar_lea.sflag [#allocation4], %s252_s23  ;;  %s272_s8 = sand.u32 (%p2039_p11), 1, %s1822_s9  }
  0x2e   : > { %s274_s28 = sand.u32 (%p2039_p11), 1, %s1790_s25   ;;  %s1180_s1 = sshll.u32 (%p2039_p11), %s1814_s7, 1 }
  0x2f   : > { %s1179_s13 = sshll.u32 (%p2039_p11), %s274_s28, 8  ;;  %s278_s12 = ssub.s32 (%p2039_p11), 3, %s1180_s1 }
  0x30   : > { %271 = sbr.rel (!%p2039_p11) target bundleno = 74 (0x4a), region = 28  ;;  %p279_p5 = scmp.lt.s32.totalorder (%p2039_p11), %s278_s12, 2 }
  0x31   : > { %s2078_s14 = scalar_lea.sflag (%p2039_p11), [#allocation6], %s272_s8 }
  0x32   : > { %s261_s11 = scalar_lea.hbm %s2610_s0, %s1178_s15 }
  0x33   : > { %s263_s19 = sshll.u32 %s261_s11, 4  ;;  %s264_s19 = int_to_ptr.hbm [resolvable:$true] %s263_s19 }
  0x34   : > { %1250 = dma.hbm_to_vmem [thread:$0]  (%p2012_p6), %s264_s19, 128, %s266_s18, %s253_s22  }
  0x35   : > { %s2653_s12 = smov (!%p279_p5, %s278_s12), 2  ;;  %s276_s22 = scalar_lea.vmem [#allocation5], %s1179_s13 }
  0x36   : > { %s1181_s20 = sshll.u32 %s2653_s12, 7 }
  0x37   : > { %s282_s15 = ssub.s32 256, %s1181_s20 }
  0x38   : > { %s283_s23 = sshll.u32 %s282_s15, 4 }
  0x39   : > { %284 = vsyncadd %s2078_s14, %s283_s23  ;;  %p2081_p6 = scmp.ne.s32.totalorder %s1181_s20, 0  ;;  %s1240_s1 = sshll.u32 %s1814_s7, 4 }
  0x3a   : > { %s287_s17 = scalar_lea.hbm %s2580_s2, %s1240_s1  ;;  %s1184_s11 = sshll.u32 %s2653_s12, 3 }
  0x3b   : > { %s290_s6 = sshll.u32 %s287_s17, 4  ;;  %s292_s8 = sshll.u32 %s276_s22, 4  ;;  %s291_s6 = int_to_ptr.hbm [resolvable:$true] %s290_s6  ;;  %s293_s8 = int_to_ptr.vmem [resolvable:$true] %s292_s8 }
  0x3c   : > { %s1242_s13 = sshll.u32 %s2653_s12, 11  ;;  %s1546_s23 = sshra.s32 %s293_s8, 4  ;;  %s1547_s23 = int_to_ptr.vmem [resolvable:$true] %s1546_s23 }
  0x3d   : > { %s1529_s15 = sshrl.u32 %s1242_s13, 4  ;;  %s1888_s20 = smov [#allocation5]  }
  0x3e   : > { %s1553_s0 = scalar_lea.vmem %s1547_s23, %s1529_s15  ;;  %s1557_s3 = scalar_lea.vmem %s1888_s20, 512 }
  0x3f   : > { %p1554_p8 = scmp.ne.s32.totalorder %s1547_s23, %s1553_s0  ;;  %p1559_p12 = scmp.lt.s32.totalorder %s1557_s3, %s1553_s0 }
  0x41   : > { %p1555_p9 = pnand %p1554_p8, %p2081_p6 }
  0x43   : > { %p1556_p10 = pneg %p1555_p9 }
  0x45   : > { %p1561_p0 = pnand %p1559_p12, %p1556_p10 }
  0x47   : > { %1564 = shalt.err (!%p1561_p0)
}
  0x48   : > { %s1889_s1 = smov 384   ;;  %s1890_s22 = smov 256  }
  0x49   : > { %298 = dma.hbm_to_vmem [thread:$0]  (%p2081_p6), %s291_s6, %s1242_s13, %s293_s8, %s2078_s14, %s1889_s1, %s1890_s22, %s1184_s11  }
  0x4a PF: > { %315 = sbr.rel (!%p2039_p11) target bundleno = 109 (0x6d), region = 36  ;;  %s316_s12 = sand.u32 (%p2039_p11), 1, %s1822_s9  }
  0x4b   : > { %s318_s28 = sand.u32 (%p2039_p11), 1, %s1790_s25   ;;  %s1188_s17 = sshll.u32 (%p2039_p11), %s1814_s7, 1 }
  0x4c   : > { %s1187_s18 = sshll.u32 (%p2039_p11), %s318_s28, 4  ;;  %s322_s0 = ssub.s32 (%p2039_p11), 3, %s1188_s17 }
  0x4d   : > { %p323_p1 = scmp.lt.s32.totalorder (%p2039_p11), %s322_s0, 2  ;;  %s2104_s14 = scalar_lea.sflag (%p2039_p11), [#allocation6], %s316_s12 }
  0x4e   : > { %s320_s11 = scalar_lea.vmem (%p2039_p11), [#allocation7], %s1187_s18 }
  0x4f   : > { %s2655_s0 = smov (!%p323_p1, %s322_s0), 2 }
  0x50   : > { %s1189_s3 = sshll.u32 %s2655_s0, 3 }
  0x51   : > { %s326_s15 = ssub.s32 16, %s1189_s3 }
  0x52   : > { %s327_s19 = sshll.u32 %s326_s15, 4 }
  0x53   : > { %328 = vsyncadd %s2104_s14, %s327_s19  ;;  %p2107_p3 = scmp.ne.s32.totalorder %s1189_s3, 0  ;;  %s1243_s8 = sshll.u32 %s1814_s7, 4 }
  0x54   : > { %s333_s20 = scalar_lea.hbm %s2582_s4, %s1243_s8  ;;  %s1193_s1 = sshll.u32 %s2655_s0, 7 }
  0x55   : > { %s336_s22 = sshll.u32 %s333_s20, 4  ;;  %s338_s12 = sshll.u32 %s320_s11, 4  ;;  %s337_s22 = int_to_ptr.hbm [resolvable:$true] %s336_s22  ;;  %s339_s12 = int_to_ptr.vmem [resolvable:$true] %s338_s12 }
  0x56   : > { %s1566_s28 = sshra.s32 %s337_s22, 4  ;;  %s1568_s18 = sshrl.u32 %s1193_s1, 4  ;;  %s1567_s28 = int_to_ptr.hbm [resolvable:$true] %s1566_s28 }
  0x57   : > { %s1573_s17 = scalar_lea.hbm %s1567_s28, %s1568_s18  ;;  %s1577_s19 = scalar_lea.hbm %s2582_s4, 24 }
  0x58   : > { %p1574_p2 = scmp.ne.s32.totalorder %s1567_s28, %s1573_s17  ;;  %p1579_p8 = scmp.lt.s32.totalorder %s1577_s19, %s1573_s17 }
  0x5a   : > { %p1575_p5 = pnand %p1574_p2, %p2107_p3 }
  0x5c   : > { %p1576_p6 = pneg %p1575_p5 }
  0x5e   : > { %p1581_p9 = pnand %p1579_p8, %p1576_p6 }
  0x60   : > { %1584 = shalt.err (!%p1581_p9)
}
  0x61   : > { %s1585_s8 = sshra.s32 %s339_s12, 4  ;;  %s1891_s13 = smov [#allocation7]   ;;  %s1586_s8 = int_to_ptr.vmem [resolvable:$true] %s1585_s8 }
  0x62   : > { %s1592_s11 = scalar_lea.vmem %s1586_s8, %s1568_s18  ;;  %s1596_s23 = scalar_lea.vmem %s1891_s13, 32 }
  0x63   : > { %p1593_p10 = scmp.ne.s32.totalorder %s1586_s8, %s1592_s11  ;;  %p1598_p1 = scmp.lt.s32.totalorder %s1596_s23, %s1592_s11 }
  0x65   : > { %p1594_p12 = pnand %p1593_p10, %p2107_p3 }
  0x67   : > { %p1595_p0 = pneg %p1594_p12 }
  0x69   : > { %p1600_p2 = pnand %p1598_p1, %p1595_p0 }
  0x6b   : > { %1603 = shalt.err (!%p1600_p2)
}
  0x6c   : > { %341 = dma.hbm_to_vmem [thread:$0]  (%p2107_p3), %s337_s22, %s1193_s1, %s339_s12, %s2104_s14  }
  0x6d PF: > { %344 = sbr.rel (!%p2039_p11) target bundleno = 144 (0x90), region = 40  ;;  %s345_s20 = sand.u32 (%p2039_p11), 1, %s1790_s25  }
  0x6e   : > { %s1195_s28 = sshll.u32 (%p2039_p11), %s1814_s7, 1  ;;  %s1194_s18 = sshll.u32 (%p2039_p11), %s345_s20, 4 }
  0x6f   : > { %s351_s17 = ssub.s32 (%p2039_p11), 3, %s1195_s28  ;;  %s2137_s19 = scalar_lea.sflag (%p2039_p11), [#allocation9], %s345_s20 }
  0x70   : > { %p352_p5 = scmp.lt.s32.totalorder (%p2039_p11), %s351_s17, 2  ;;  %s349_s0 = scalar_lea.vmem (%p2039_p11), [#allocation8], %s1194_s18 }
  0x72   : > { %s2657_s17 = smov (!%p352_p5, %s351_s17), 2 }
  0x73   : > { %s1196_s3 = sshll.u32 %s2657_s17, 3 }
  0x74   : > { %s355_s6 = ssub.s32 16, %s1196_s3 }
  0x75   : > { %s356_s15 = sshll.u32 %s355_s6, 4 }
  0x76   : > { %357 = vsyncadd %s2137_s19, %s356_s15  ;;  %p2140_p11 = scmp.ne.s32.totalorder %s1196_s3, 0  ;;  %s1244_s14 = sshll.u32 %s1814_s7, 4 }
  0x77   : > { %s362_s12 = scalar_lea.hbm %s2583_s5, %s1244_s14  ;;  %s1200_s8 = sshll.u32 %s2657_s17, 7 }
  0x78   : > { %s365_s11 = sshll.u32 %s362_s12, 4  ;;  %s367_s13 = sshll.u32 %s349_s0, 4  ;;  %s366_s11 = int_to_ptr.hbm [resolvable:$true] %s365_s11  ;;  %s368_s13 = int_to_ptr.vmem [resolvable:$true] %s367_s13 }
  0x79   : > { %s1605_s23 = sshra.s32 %s366_s11, 4  ;;  %s1607_s20 = sshrl.u32 %s1200_s8, 4  ;;  %s1606_s23 = int_to_ptr.hbm [resolvable:$true] %s1605_s23 }
  0x7a   : > { %s1612_s28 = scalar_lea.hbm %s1606_s23, %s1607_s20  ;;  %s1616_s6 = scalar_lea.hbm %s2583_s5, 24 }
  0x7b   : > { %p1613_p3 = scmp.ne.s32.totalorder %s1606_s23, %s1612_s28  ;;  %p1618_p9 = scmp.lt.s32.totalorder %s1616_s6, %s1612_s28 }
  0x7d   : > { %p1614_p6 = pnand %p1613_p3, %p2140_p11 }
  0x7f   : > { %p1615_p8 = pneg %p1614_p6 }
  0x81   : > { %p1620_p10 = pnand %p1618_p9, %p1615_p8 }
  0x83   : > { %1623 = shalt.err (!%p1620_p10)
}
  0x84   : > { %s1624_s15 = sshra.s32 %s368_s13, 4  ;;  %s1892_s14 = smov [#allocation8]   ;;  %s1625_s15 = int_to_ptr.vmem [resolvable:$true] %s1624_s15 }
  0x85   : > { %s1631_s0 = scalar_lea.vmem %s1625_s15, %s1607_s20  ;;  %s1635_s1 = scalar_lea.vmem %s1892_s14, 32 }
  0x86   : > { %p1632_p12 = scmp.ne.s32.totalorder %s1625_s15, %s1631_s0  ;;  %p1637_p2 = scmp.lt.s32.totalorder %s1635_s1, %s1631_s0 }
  0x88   : > { %p1633_p0 = pnand %p1632_p12, %p2140_p11 }
  0x8a   : > { %p1634_p1 = pneg %p1633_p0 }
  0x8c   : > { %p1639_p5 = pnand %p1637_p2, %p1634_p1 }
  0x8e   : > { %1642 = shalt.err (!%p1639_p5)
}
  0x8f   : > { %370 = dma.hbm_to_vmem [thread:$0]  (%p2140_p11), %s366_s11, %s1200_s8, %s368_s13, %s2137_s19  }
  0x90 PF: > { %p1201_p3 = scmp.ge.s32.totalorder %s1822_s9, 1  ;;  %p372_p6 = scmp.lt.s32.totalorder %s1822_s9, 5 }
  0x92   : > { %p373_p8 = pnand %p1201_p3, %p372_p6 }
  0x93   : > { %s378_s22 = sand.u32 (!%p373_p8), 1, %s1798_s27  }
  0x94   : > { %376 = sbr.rel (%p373_p8) target bundleno = 757 (0x2f5), region = 44  ;;  %s1202_s12 = sshll.u32 (!%p373_p8), %s378_s22, 3 }
  0x95   : > { %s379_s23 = scalar_lea.sflag (!%p373_p8), [#allocation4], %s378_s22  ;;  %s382_s20 = scalar_lea.vmem (!%p373_p8), [#allocation3], %s1202_s12 }
  0x99   : > { %1761 = dma.done.wait (%p2022_p7), %s379_s23, 128  }
  0x9a   : > { %1763 = vsyncadd (%p2022_p7), %s379_s23, 4294967168  ;;  %s388_s17 = sand.u32 1, %s1997_s10   ;;  %s390_s19 = sand.u32 1, %s1786_s24  }
  0x9b   : > { %s1203_s26 = sshll.u32 %s390_s19, 8  ;;  %s389_s8 = scalar_lea.sflag [#allocation6], %s388_s17 }
  0x9c   : > { %s2172_s11 = scalar_lea.vmem [#allocation5], %s1203_s26 }
  0x9d   : > { %1765 = dma.done.wait (%p2048_p13), %s389_s8, 4352  }
  0x9e   : > { %1767 = vsyncadd (%p2048_p13), %s389_s8, 4294962944  ;;  %s1204_s13 = sshll.u32 %s390_s19, 4  ;;  %s409_s16 = scalar_lea.sflag [#allocation9], %s390_s19 }
  0x9f   : > { %s2178_s28 = scalar_lea.vmem [#allocation7], %s1204_s13  ;;  %s2180_s18 = scalar_lea.vmem [#allocation8], %s1204_s13 }
  0xa0   : > { %1769 = dma.done.wait (%p2048_p13), %s409_s16, 256  }
  0xa1   : > { %1771 = vsyncadd (%p2048_p13), %s409_s16, 4294967040  ;;  %s460_s10 = sand.u32 1, %s1774_s21   ;;  %s2188_s3 = sshll.u32 %s1806_s29, 1 }
  0xa2   : > { %s1206_s6 = sshll.u32 %s460_s10, 4  ;;  %p472_p7 = scmp.lt.s32.totalorder %s2188_s3, 2 }
  0xa3   : > { %s2614_s1 = sld [smem:[#allocation26_spill]]  ;;  %s2198_s12 = scalar_lea.vmem [#allocation10], %s1206_s6  }
  0xa4   : > { %s2192_s15 = scalar_select %p472_p7, %s2188_s3, 2 }
  0xa5   : > { %p1208_p13 = scmp.ne.s32.totalorder %s1806_s29, 0 }
  0xa6   : > { %s2615_s30 = sld [smem:[#allocation25_spill]] (!%p1208_p13) }
  0xa7   : > { %497 = sbr.rel (%p1208_p13) target bundleno = 318 (0x13e), region = 64 }
  0xa9   : > { %s474_s22 = scalar_lea.vmem %s2614_s1, %s2192_s15 }
  0xac   : > { %v498_v0 = vld [vmem:[%s382_s20] sm:$0xff]  ;;  %v1893_v2 = vmov 128.0   ;;  %v1494_v18 = vld [vmem:[%s2615_s30] ss:$0 sm:$0xff] }
  0xad   : > { %v499_v1 = vmul.f32 %v498_v0, %v498_v0  ;;  %1495 = vrcp.f32 %v1893_v2 }
  0xaf   : > { %500 = vadd.xlane.f32.xlu0 %v499_v1 }
  0xb3   : > { %v1496_v3 = vpop.eup %1495 }
  0xb4   : > { %v503_v4 = vmul.f32 128.0, %v1496_v3  ;;  %vm507_vm0 = vweird.f32 %v1496_v3 }
  0xb6   : > { %v504_v5 = vsub.f32 1.0, %v503_v4 }
  0xb8   : > { %v505_v6 = vmul.f32 %v1496_v3, %v504_v5 }
  0xba   : > { %v506_v7 = vadd.f32 %v1496_v3, %v505_v6 }
  0xbc   : > { %v508_v8 = vsel %vm507_vm0, %v1496_v3, %v506_v7 }
 0x122   : > { %v501_v9 = vpop.xlane.xlu0 %500 }
 0x123   : > { %v509_v10 = vmul.f32 %v508_v8, %v501_v9 }
 0x125   : > { %v510_v11 = vadd.f32 1e-06, %v509_v10 }
 0x127   : > { %1497 = vrsqrt.f32 %v510_v11  ;;  %vm517_vm2 = vweird.f32 %v510_v11 }
 0x12d   : > { %v1498_v12 = vpop.eup %1497 }
 0x12e   : > { %v512_v13 = vmul.f32 %v1498_v12, %v510_v11  ;;  %vm518_vm1 = vweird.f32 %v1498_v12 }
 0x12f   : > { %vm519_vm3 = vmor %vm517_vm2, %vm518_vm1 }
 0x130   : > { %v513_v14 = vmul.f32 %v1498_v12, %v512_v13 }
 0x132   : > { %v514_v15 = vmul.f32 0.5, %v513_v14 }
 0x134   : > { %v515_v16 = vsub.f32 1.5, %v514_v15 }
 0x136   : > { %v516_v17 = vmul.f32 %v1498_v12, %v515_v16 }
 0x138   : > { %v520_v19 = vsel %vm519_vm3, %v1498_v12, %v516_v17 }
 0x139   : > { %v521_v20 = vmul.f32 %v520_v19, %v498_v0 }
 0x13b   : > { %v526_v21 = vmul.f32 %v1494_v18, %v521_v20 }
 0x13d   : > { %527 = vst [vmem:[#allocation2] sm:$0xff] %v526_v21 }
 0x13e PF: > { %v559_v22 = vld [vmem:[%s2172_s11 + $0xf0] sm:$0xff]  ;;  %v557_v23 = vld [vmem:[%s2172_s11 + $0xe0] sm:$0xff]  ;;  %v560_v24 = vld [vmem:[%s2172_s11 + $0xf8] sm:$0xff]  ;;  %s1894_s19 = smov 1   ;;  %s1895_s26 = smov 127   ;;  %v611_v62 = vlaneseq }
 0x13f   : > { %567 = vmatpush.msra.mxu0 %v559_v22  ;;  %v555_v25 = vld [vmem:[%s2172_s11 + $0xd0] sm:$0xff]  ;;  %587 = vmatpush.msra.mxu1 %v560_v24  ;;  %v558_v26 = vld [vmem:[%s2172_s11 + $0xe8] sm:$0xff]  ;;  %v556_v27 = vld [vmem:[%s2172_s11 + $0xd8] sm:$0xff]  ;;  %s650_s13 = ssub.s32 (%p2058_p4), 3, %s2188_s3  ;;  %s2619_s0 = sld [smem:[#allocation27_spill]] (%p2058_p4) }
 0x140   : > { %v553_v28 = vld [vmem:[%s2172_s11 + $0xc0] sm:$0xff]  ;;  %v554_v29 = vld [vmem:[%s2172_s11 + $0xc8] sm:$0xff]  ;;  %v551_v30 = vld [vmem:[%s2172_s11 + $0xb0] sm:$0xff]  ;;  %v612_v63 = vand.u32 127, %v611_v62  ;;  %p651_p11 = scmp.lt.s32.totalorder (%p2058_p4), %s650_s13, 2 }
 0x141   : > { %568 = vmatpush.msra.mxu0 %v557_v23  ;;  %588 = vmatpush.msra.mxu1 %v558_v26  ;;  %v552_v31 = vld [vmem:[%s2172_s11 + $0xb8] sm:$0xff]  ;;  %v549_v32 = vld [vmem:[%s2172_s11 + $0xa0] sm:$0xff]  ;;  %v550_v33 = vld [vmem:[%s2172_s11 + $0xa8] sm:$0xff] }
 0x142   : > { %v547_v34 = vld [vmem:[%s2172_s11 + $0x90] sm:$0xff]  ;;  %v548_v35 = vld [vmem:[%s2172_s11 + $0x98] sm:$0xff]  ;;  %v545_v36 = vld [vmem:[%s2172_s11 + $0x80] sm:$0xff]  ;;  %v623_v0 = vadd.s32 128, %v612_v63  ;;  %v624_v3 = vand.u32 1, %v612_v63  ;;  %vm620_vm4 = vcmp.lt.s32.totalorder %v612_v63, 1 }
 0x143   : > { %569 = vmatpush.msra.mxu0 %v555_v25  ;;  %589 = vmatpush.msra.mxu1 %v556_v27  ;;  %v546_v37 = vld [vmem:[%s2172_s11 + $0x88] sm:$0xff]  ;;  %v543_v38 = vld [vmem:[%s2172_s11 + $0x70] sm:$0xff]  ;;  %v544_v39 = vld [vmem:[%s2172_s11 + $0x78] sm:$0xff]  ;;  %vm613_vm5 = vcmp.lt.s32.totalorder %v612_v63, 127 }
 0x144   : > { %v541_v40 = vld [vmem:[%s2172_s11 + $0x60] sm:$0xff]  ;;  %v542_v41 = vld [vmem:[%s2172_s11 + $0x68] sm:$0xff]  ;;  %v539_v42 = vld [vmem:[%s2172_s11 + $0x50] sm:$0xff]  ;;  %v625_v4 = vand.u32 1, %v623_v0  ;;  %vm626_vm6 = vcmp.eq.s32.totalorder %v624_v3, 0 }
 0x145   : > { %570 = vmatpush.msra.mxu0 %v553_v28  ;;  %590 = vmatpush.msra.mxu1 %v554_v29  ;;  %v540_v43 = vld [vmem:[%s2172_s11 + $0x58] sm:$0xff]  ;;  %v537_v44 = vld [vmem:[%s2172_s11 + $0x40] sm:$0xff]  ;;  %v538_v45 = vld [vmem:[%s2172_s11 + $0x48] sm:$0xff] }
 0x146   : > { %v535_v46 = vld [vmem:[%s2172_s11 + $0x30] sm:$0xff]  ;;  %v536_v47 = vld [vmem:[%s2172_s11 + $0x38] sm:$0xff]  ;;  %v533_v48 = vld [vmem:[%s2172_s11 + $0x20] sm:$0xff]  ;;  %vm627_vm7 = vcmp.eq.s32.totalorder %v625_v4, 0 }
 0x147   : > { %571 = vmatpush.msra.mxu0 %v551_v30  ;;  %591 = vmatpush.msra.mxu1 %v552_v31  ;;  %v534_v49 = vld [vmem:[%s2172_s11 + $0x28] sm:$0xff]  ;;  %v531_v50 = vld [vmem:[%s2172_s11 + $0x10] sm:$0xff]  ;;  %v532_v51 = vld [vmem:[%s2172_s11 + $0x18] sm:$0xff] }
 0x148   : > { %v529_v52 = vld [vmem:[%s2172_s11] sm:$0xff]  ;;  %v528_v53 = vld [vmem:[#allocation2] sm:$0xff] }
 0x149   : > { %572 = vmatpush.msra.mxu0 %v549_v32  ;;  %592 = vmatpush.msra.mxu1 %v550_v33  ;;  %v530_v54 = vld [vmem:[%s2172_s11 + $0x8] sm:$0xff]  ;;  %v630_v5 = vld [vmem:[%s2178_s28] sm:$0xff]  ;;  %s2618_s11 = sld [smem:[#allocation16_spill]] (%p2058_p4) }
 0x14a   : > { %v561_v55 = vld [vmem:[%s474_s22] sm:$0x3]  ;;  %v634_v8 = vld [vmem:[%s2180_s18] sm:$0xff] }
 0x14b   : > { %573 = vmatpush.msra.mxu0 %v547_v34  ;;  %593 = vmatpush.msra.mxu1 %v548_v35  ;;  %v563_v56 = vperm.slane %v561_v55, 0  ;;  %v564_v59 = vperm.slane %v561_v55, 1  ;;  %v631_v6 = vld [vmem:[%s2178_s28 + $0x8] sm:$0xff] }
 0x14c   : > { %v635_v9 = vld [vmem:[%s2180_s18 + $0x8] sm:$0xff] }
 0x14d   : > { %574 = vmatpush.msra.mxu0 %v545_v36  ;;  %594 = vmatpush.msra.mxu1 %v546_v37 }
 0x14f   : > { %575 = vmatpush.msra.mxu0 %v543_v38  ;;  %595 = vmatpush.msra.mxu1 %v544_v39  ;;  %s1249_s28 = smul.u32 (%p2058_p4), 3, %s2618_s11 }
 0x151   : > { %576 = vmatpush.msra.mxu0 %v541_v40  ;;  %596 = vmatpush.msra.mxu1 %v542_v41  ;;  %s658_s16 = sadd.s32 (%p2058_p4), %s1249_s28, %s2188_s3 }
 0x152   : > { %s1213_s18 = sshll.u32 (%p2058_p4), %s658_s16, 3 }
 0x153   : > { %577 = vmatpush.msra.mxu0 %v539_v42  ;;  %597 = vmatpush.msra.mxu1 %v540_v43  ;;  %s2257_s14 = scalar_lea.vmem (%p2058_p4), %s2619_s0, %s1213_s18  }
 0x155   : > { %578 = vmatpush.msra.mxu0 %v537_v44  ;;  %598 = vmatpush.msra.mxu1 %v538_v45 }
 0x157   : > { %579 = vmatpush.msra.mxu0 %v535_v46  ;;  %599 = vmatpush.msra.mxu1 %v536_v47 }
 0x159   : > { %580 = vmatpush.msra.mxu0 %v533_v48  ;;  %600 = vmatpush.msra.mxu1 %v534_v49 }
 0x15b   : > { %581 = vmatpush.msra.mxu0 %v531_v50  ;;  %601 = vmatpush.msra.mxu1 %v532_v51 }
 0x15d   : > { %582 = vmatpush.msra.mxu0 %v529_v52  ;;  %602 = vmatpush.msra.mxu1 %v530_v54 }
 0x15e   : > { %583 = vmatmul.f32.vlgmr.msra.gmra.mxu0 %v528_v53  ;;  %603 = vmatmul.f32.vlgmr.msra.gmra.mxu1 %v528_v53 }
 0x1db   : > { %v584_v57 = vpop.f32.mrf.mxu0  ;;  %v604_v60 = vpop.f32.mrf.mxu1 }
 0x1dc   : > { %v585_v58 = vadd.f32 %v584_v57, %v563_v56  ;;  %v605_v61 = vadd.f32 %v604_v60, %v564_v59 }
 0x1de   : > { %616 = vrot.lane.b32.xlu1 %v585_v58, %s1894_s19  ;;  %607 = vrot.lane.b32.xlu0 %v585_v58, %s1895_s26  ;;  %v632_v17 = vmul.f32 %v630_v5, %v585_v58  ;;  %v633_v18 = vmul.f32 %v631_v6, %v605_v61 }
 0x1e6   : > { %618 = vrot.lane.b32.xlu1 %v605_v61, %s1894_s19  ;;  %609 = vrot.lane.b32.xlu0 %v605_v61, %s1895_s26 }
 0x250   : > { %v617_v1 = vpop.permute.xlu1 %616  ;;  %v608_v2 = vpop.permute.xlu0 %607 }
 0x258   : > { %v619_v7 = vpop.permute.xlu1 %618  ;;  %v610_v10 = vpop.permute.xlu0 %609 }
 0x259   : > { %v621_v11 = vsel %vm620_vm4, %v617_v1, %v619_v7  ;;  %v622_v12 = vsel %vm620_vm4, %v619_v7, %v617_v1  ;;  %v614_v13 = vsel %vm613_vm5, %v608_v2, %v610_v10  ;;  %v615_v14 = vsel %vm613_vm5, %v610_v10, %v608_v2 }
 0x25a   : > { %v628_v15 = vsel %vm626_vm6, %v614_v13, %v622_v12  ;;  %v629_v16 = vsel %vm627_vm7, %v615_v14, %v621_v11 }
 0x25b   : > { %v636_v19 = vmul.f32 %v634_v8, %v628_v15  ;;  %v637_v20 = vmul.f32 %v635_v9, %v629_v16 }
 0x25c   : > { %648 = sbr.rel (!%p2058_p4) target bundleno = 757 (0x2f5), region = 68 }
 0x25d   : > { %v638_v21 = vadd.f32 %v636_v19, %v632_v17  ;;  %v639_v22 = vadd.f32 %v637_v20, %v633_v18 }
 0x25f   : > { %640 = vst [vmem:[%s2198_s12] sm:$0xff] %v638_v21 }
 0x260   : > { %641 = vst [vmem:[%s2198_s12 + $0x8] sm:$0xff] %v639_v22 }
 0x261   : > { %s2659_s13 = smov (!%p651_p11, %s650_s13), 2 }
 0x262   : > { %s2252_s10 = sshll.u32 %s2659_s13, 3 }
 0x263   : > { %p1215_p9 = scmp.eq.s32.totalorder %s2252_s10, 0 }
 0x264   : > { %p665_p4 = scmp.lt.u32.totalorder (!%p1215_p9), %s2252_s10, 8 }
 0x265   : > { %664 = sbr.rel (%p1215_p9) target bundleno = 757 (0x2f5), region = 72 }
 0x26a   : > { %668 = sbr.rel (%p665_p4) target bundleno = 748 (0x2ec), region = 76  ;;  %s2262_s1 = sand.u32 (!%p665_p4), 7, %s2252_s10  }
 0x26b   : > { %p685_p10 = scmp.eq.s32.totalorder (!%p665_p4), %s2262_s1, 0  ;;  %p1216_p12 = scmp.ne.s32.totalorder (!%p665_p4), %s2262_s1, 0 }
 0x26f   : > { %688 = sbr.rel (%p1216_p12) target bundleno = 683 (0x2ab), region = 91  ;;  %s689_s3 = sshrl.u32 (!%p1216_p12), %s2252_s10, 3 }
 0x270   : > { %s2269_s22 = sshrl.u32 (!%p1216_p12), %s689_s3, 5 }
 0x271   : > { %p1217_p0 = scmp.le.s32.totalorder (!%p1216_p12), %s2269_s22, 0 }
 0x274   : > { %1051 = sbr.rel (%p1217_p0) target bundleno = 666 (0x29a), region = 206  ;;  %s2620_s21 = smov (!%p1217_p0), %s2257_s14 }
 0x275   : > { %s2621_s29 = smov (!%p1217_p0), %s2198_s12  ;;  %s2278_s30 = smov (!%p1217_p0), 0  }
 0x276   : > { %s2280_s23 = smov (!%p1217_p0), 0  }
 0x279 LB: >> { %v700_v23 = vld [vmem:[%s1830_s29] sm:$0xff]  ;;  %v702_v24 = vld [vmem:[%s1830_s29 + $0x8] sm:$0xff]  ;;  %v704_v25 = vld [vmem:[%s1830_s29 + $0x10] sm:$0xff]  ;;  %s764_s20 = sadd.s32 1, %s1834_s30  ;;  %s694_s23 = sadd.s32 1, %s1838_s23   ;;  %s1838_s23 = sphi %s2280_s23, %s694_s23   ;;  %s1834_s30 = sphi %s2278_s30, %s2624_s30   ;;  %s1830_s29 = sphi %s2621_s29, %s2623_s29   ;;  %s1826_s21 = sphi %s2620_s21, %s2622_s21  }
 0x27a   : >> { %701 = vst [vmem:[%s1826_s21] sm:$0xff] %v700_v23  ;;  %v706_v26 = vld [vmem:[%s1830_s29 + $0x18] sm:$0xff]  ;;  %p765_p1 = scmp.ge.s32.totalorder %s764_s20, %s2269_s22  ;;  %v708_v27 = vld [vmem:[%s1830_s29 + $0x20] sm:$0xff]  ;;  %v710_v28 = vld [vmem:[%s1830_s29 + $0x28] sm:$0xff]  ;;  %p693_p2 = scmp.ge.s32.totalorder %s694_s23, %s2269_s22 }
 0x27b   : >> { %703 = vst [vmem:[%s1826_s21 + $0x8] sm:$0xff] %v702_v24  ;;  %v712_v29 = vld [vmem:[%s1830_s29 + $0x30] sm:$0xff]  ;;  %v714_v30 = vld [vmem:[%s1830_s29 + $0x38] sm:$0xff]  ;;  %v716_v31 = vld [vmem:[%s1830_s29 + $0x40] sm:$0xff] }
 0x27c   : >> { %705 = vst [vmem:[%s1826_s21 + $0x10] sm:$0xff] %v704_v25  ;;  %s2661_s20 = smov (%p765_p1, %s764_s20), 0  ;;  %v718_v32 = vld [vmem:[%s1830_s29 + $0x48] sm:$0xff]  ;;  %v720_v33 = vld [vmem:[%s1830_s29 + $0x50] sm:$0xff]  ;;  %v722_v34 = vld [vmem:[%s1830_s29 + $0x58] sm:$0xff] }
 0x27d   : >> { %707 = vst [vmem:[%s1826_s21 + $0x18] sm:$0xff] %v706_v26  ;;  %s1218_s17 = sshll.u32 %s2661_s20, 8  ;;  %v724_v35 = vld [vmem:[%s1830_s29 + $0x60] sm:$0xff]  ;;  %v726_v36 = vld [vmem:[%s1830_s29 + $0x68] sm:$0xff]  ;;  %v728_v37 = vld [vmem:[%s1830_s29 + $0x70] sm:$0xff]  ;;  %s2624_s30 = smov %s2661_s20 }
 0x27e   : >> { %709 = vst [vmem:[%s1826_s21 + $0x20] sm:$0xff] %v708_v27  ;;  %s2312_s19 = scalar_lea.vmem %s2198_s12, %s1218_s17 [#allocation10]   ;;  %s2315_s26 = scalar_lea.vmem %s2257_s14, %s1218_s17   ;;  %v730_v38 = vld [vmem:[%s1830_s29 + $0x78] sm:$0xff]  ;;  %v732_v39 = vld [vmem:[%s1830_s29 + $0x80] sm:$0xff]  ;;  %v734_v40 = vld [vmem:[%s1830_s29 + $0x88] sm:$0xff] }
 0x27f   : >> { %711 = vst [vmem:[%s1826_s21 + $0x28] sm:$0xff] %v710_v28  ;;  %v736_v41 = vld [vmem:[%s1830_s29 + $0x90] sm:$0xff]  ;;  %v738_v42 = vld [vmem:[%s1830_s29 + $0x98] sm:$0xff]  ;;  %v740_v43 = vld [vmem:[%s1830_s29 + $0xa0] sm:$0xff] }
 0x280   : >> { %713 = vst [vmem:[%s1826_s21 + $0x30] sm:$0xff] %v712_v29  ;;  %v742_v44 = vld [vmem:[%s1830_s29 + $0xa8] sm:$0xff]  ;;  %v744_v45 = vld [vmem:[%s1830_s29 + $0xb0] sm:$0xff]  ;;  %v746_v46 = vld [vmem:[%s1830_s29 + $0xb8] sm:$0xff] }
 0x281   : >> { %715 = vst [vmem:[%s1826_s21 + $0x38] sm:$0xff] %v714_v30  ;;  %v748_v47 = vld [vmem:[%s1830_s29 + $0xc0] sm:$0xff]  ;;  %v750_v48 = vld [vmem:[%s1830_s29 + $0xc8] sm:$0xff]  ;;  %v752_v49 = vld [vmem:[%s1830_s29 + $0xd0] sm:$0xff] }
 0x282   : >> { %717 = vst [vmem:[%s1826_s21 + $0x40] sm:$0xff] %v716_v31  ;;  %v754_v50 = vld [vmem:[%s1830_s29 + $0xd8] sm:$0xff]  ;;  %v756_v51 = vld [vmem:[%s1830_s29 + $0xe0] sm:$0xff]  ;;  %v758_v52 = vld [vmem:[%s1830_s29 + $0xe8] sm:$0xff] }
 0x283   : >> { %719 = vst [vmem:[%s1826_s21 + $0x48] sm:$0xff] %v718_v32  ;;  %v760_v53 = vld [vmem:[%s1830_s29 + $0xf0] sm:$0xff]  ;;  %v762_v54 = vld [vmem:[%s1830_s29 + $0xf8] sm:$0xff]  ;;  %s2623_s29 = smov %s2312_s19 }
 0x284   : >> { %721 = vst [vmem:[%s1826_s21 + $0x50] sm:$0xff] %v720_v33 }
 0x285   : >> { %723 = vst [vmem:[%s1826_s21 + $0x58] sm:$0xff] %v722_v34 }
 0x286   : >> { %725 = vst [vmem:[%s1826_s21 + $0x60] sm:$0xff] %v724_v35 }
 0x287   : >> { %727 = vst [vmem:[%s1826_s21 + $0x68] sm:$0xff] %v726_v36 }
 0x288   : >> { %729 = vst [vmem:[%s1826_s21 + $0x70] sm:$0xff] %v728_v37 }
 0x289   : >> { %731 = vst [vmem:[%s1826_s21 + $0x78] sm:$0xff] %v730_v38 }
 0x28a   : >> { %733 = vst [vmem:[%s1826_s21 + $0x80] sm:$0xff] %v732_v39 }
 0x28b   : >> { %735 = vst [vmem:[%s1826_s21 + $0x88] sm:$0xff] %v734_v40 }
 0x28c   : >> { %737 = vst [vmem:[%s1826_s21 + $0x90] sm:$0xff] %v736_v41 }
 0x28d   : >> { %739 = vst [vmem:[%s1826_s21 + $0x98] sm:$0xff] %v738_v42 }
 0x28e   : >> { %741 = vst [vmem:[%s1826_s21 + $0xa0] sm:$0xff] %v740_v43 }
 0x28f   : >> { %743 = vst [vmem:[%s1826_s21 + $0xa8] sm:$0xff] %v742_v44 }
 0x290   : >> { %745 = vst [vmem:[%s1826_s21 + $0xb0] sm:$0xff] %v744_v45 }
 0x291   : >> { %747 = vst [vmem:[%s1826_s21 + $0xb8] sm:$0xff] %v746_v46 }
 0x292   : >> { %749 = vst [vmem:[%s1826_s21 + $0xc0] sm:$0xff] %v748_v47 }
 0x293   : >> { %751 = vst [vmem:[%s1826_s21 + $0xc8] sm:$0xff] %v750_v48 }
 0x294   : >> { %753 = vst [vmem:[%s1826_s21 + $0xd0] sm:$0xff] %v752_v49 }
 0x295   : >> { %755 = vst [vmem:[%s1826_s21 + $0xd8] sm:$0xff] %v754_v50  ;;  %696 = sbr.rel (!%p693_p2) target bundleno = 633 (0x279), region = 212 }
 0x296   : >> { %757 = vst [vmem:[%s1826_s21 + $0xe0] sm:$0xff] %v756_v51 }
 0x297   : >> { %759 = vst [vmem:[%s1826_s21 + $0xe8] sm:$0xff] %v758_v52 }
 0x298   : >> { %761 = vst [vmem:[%s1826_s21 + $0xf0] sm:$0xff] %v760_v53 }
 0x299   : >> { %763 = vst [vmem:[%s1826_s21 + $0xf8] sm:$0xff] %v762_v54  ;;  %s2622_s21 = smov %s2315_s26 }
 0x29a PF: > { %s2381_s8 = sand.u32 31, %s689_s3   ;;  %s1245_s11 = sshll.u32 %s2269_s22, 8 }
 0x29b   : > { %s775_s13 = scalar_lea.vmem %s2198_s12, %s1245_s11 [#allocation10]   ;;  %s777_s28 = scalar_lea.vmem %s2257_s14, %s1245_s11  }
 0x29c   : > { %p1223_p5 = scmp.le.s32.totalorder %s2381_s8, 0 }
 0x29d   : > { %s1840_s16 = smov (!%p1223_p5), %s777_s28   ;;  %s1844_s18 = smov (!%p1223_p5), %s775_s13  }
 0x29e   : > { %1065 = sbr.rel (%p1223_p5) target bundleno = 683 (0x2ab), region = 217  ;;  %s1848_s6 = smov (!%p1223_p5), 0  }
 0x29f   : > { %s1852_s15 = smov (!%p1223_p5), 0  }
 0x2a3 LB: >> { %v787_v55 = vld [vmem:[%s1846_s18] sm:$0xff]  ;;  %s789_s0 = sadd.s32 1, %s1850_s6  ;;  %s781_s15 = sadd.s32 1, %s1854_s15   ;;  %s1854_s15 = sphi %s1852_s15, %s781_s15   ;;  %s1850_s6 = sphi %s1848_s6, %s1849_s6   ;;  %s1846_s18 = sphi %s1844_s18, %s794_s18   ;;  %s1842_s16 = sphi %s1840_s16, %s795_s16  }
 0x2a4   : >> { %788 = vst [vmem:[%s1842_s16] sm:$0xff] %v787_v55  ;;  %p790_p3 = scmp.ge.s32.totalorder %s789_s0, %s2381_s8  ;;  %p780_p6 = scmp.ge.s32.totalorder %s781_s15, %s2381_s8 }
 0x2a6   : >> { %s2663_s0 = smov (%p790_p3, %s789_s0), 0  ;;  %783 = sbr.rel (!%p780_p6) target bundleno = 675 (0x2a3), region = 223 }
 0x2a7   : >> { %s1224_s3 = sshll.u32 %s2663_s0, 3  ;;  %s1849_s6 = smov %s2663_s0  }
 0x2a8   : >> { %s794_s18 = scalar_lea.vmem %s775_s13, %s1224_s3 [#allocation10]   ;;  %s795_s16 = scalar_lea.vmem %s777_s28, %s1224_s3  }
 0x2ab PF: > { %798 = sbr.rel (%p685_p10) target bundleno = 748 (0x2ec), region = 109  ;;  %s2393_s22 = ssub.s32 (!%p685_p10), %s2252_s10, %s2262_s1 }
 0x2ac   : > { %s804_s21 = sshrl.u32 (!%p685_p10), %s2252_s10, 3  ;;  %s801_s29 = scalar_lea.vmem (!%p685_p10), %s2198_s12, %s2393_s22 [#allocation10] }
 0x2ad   : > { %s803_s30 = scalar_lea.vmem (!%p685_p10), %s2257_s14, %s2393_s22  ;;  %s2402_s23 = sshrl.u32 (!%p685_p10), %s804_s21, 5 }
 0x2ae   : > { %p1226_p8 = scmp.le.s32.totalorder (!%p685_p10), %s2402_s23, 0 }
 0x2b0   : > { %1079 = sbr.rel (%p1226_p8) target bundleno = 726 (0x2d6), region = 228  ;;  %s2625_s20 = smov (!%p1226_p8), %s2257_s14 }
 0x2b1   : > { %s2626_s17 = smov (!%p1226_p8), %s2198_s12  ;;  %s2411_s19 = smov (!%p1226_p8), 0  }
 0x2b2   : > { %s2413_s26 = smov (!%p1226_p8), 0  }
 0x2b5 LB: >> { %v815_v56 = vld [vmem:[%s1862_s17] sm:$0xff]  ;;  %v817_v57 = vld [vmem:[%s1862_s17 + $0x8] sm:$0xff]  ;;  %v819_v58 = vld [vmem:[%s1862_s17 + $0x10] sm:$0xff]  ;;  %s879_s8 = sadd.s32 1, %s1866_s19  ;;  %s809_s26 = sadd.s32 1, %s1870_s26   ;;  %s1870_s26 = sphi %s2413_s26, %s809_s26   ;;  %s1866_s19 = sphi %s2411_s19, %s2629_s19   ;;  %s1862_s17 = sphi %s2626_s17, %s2628_s17   ;;  %s1858_s20 = sphi %s2625_s20, %s2627_s20  }
 0x2b6   : >> { %816 = vst [vmem:[%s1858_s20] sm:$0xff] %v815_v56  ;;  %v821_v59 = vld [vmem:[%s1862_s17 + $0x18] sm:$0xff]  ;;  %p880_p7 = scmp.ge.s32.totalorder %s879_s8, %s2402_s23  ;;  %v823_v60 = vld [vmem:[%s1862_s17 + $0x20] sm:$0xff]  ;;  %v825_v61 = vld [vmem:[%s1862_s17 + $0x28] sm:$0xff]  ;;  %p808_p13 = scmp.ge.s32.totalorder %s809_s26, %s2402_s23 }
 0x2b7   : >> { %818 = vst [vmem:[%s1858_s20 + $0x8] sm:$0xff] %v817_v57  ;;  %v827_v62 = vld [vmem:[%s1862_s17 + $0x30] sm:$0xff]  ;;  %v829_v63 = vld [vmem:[%s1862_s17 + $0x38] sm:$0xff]  ;;  %v831_v0 = vld [vmem:[%s1862_s17 + $0x40] sm:$0xff] }
 0x2b8   : >> { %820 = vst [vmem:[%s1858_s20 + $0x10] sm:$0xff] %v819_v58  ;;  %s2665_s8 = smov (%p880_p7, %s879_s8), 0  ;;  %v833_v1 = vld [vmem:[%s1862_s17 + $0x48] sm:$0xff]  ;;  %v835_v2 = vld [vmem:[%s1862_s17 + $0x50] sm:$0xff]  ;;  %v837_v3 = vld [vmem:[%s1862_s17 + $0x58] sm:$0xff] }
 0x2b9   : >> { %822 = vst [vmem:[%s1858_s20 + $0x18] sm:$0xff] %v821_v59  ;;  %s1227_s11 = sshll.u32 %s2665_s8, 8  ;;  %v839_v4 = vld [vmem:[%s1862_s17 + $0x60] sm:$0xff]  ;;  %v841_v5 = vld [vmem:[%s1862_s17 + $0x68] sm:$0xff]  ;;  %v843_v6 = vld [vmem:[%s1862_s17 + $0x70] sm:$0xff]  ;;  %s2629_s19 = smov %s2665_s8 }
 0x2ba   : >> { %824 = vst [vmem:[%s1858_s20 + $0x20] sm:$0xff] %v823_v60  ;;  %s2445_s13 = scalar_lea.vmem %s2198_s12, %s1227_s11 [#allocation10]   ;;  %s2448_s28 = scalar_lea.vmem %s2257_s14, %s1227_s11   ;;  %v845_v7 = vld [vmem:[%s1862_s17 + $0x78] sm:$0xff]  ;;  %v847_v8 = vld [vmem:[%s1862_s17 + $0x80] sm:$0xff]  ;;  %v849_v9 = vld [vmem:[%s1862_s17 + $0x88] sm:$0xff] }
 0x2bb   : >> { %826 = vst [vmem:[%s1858_s20 + $0x28] sm:$0xff] %v825_v61  ;;  %v851_v10 = vld [vmem:[%s1862_s17 + $0x90] sm:$0xff]  ;;  %v853_v11 = vld [vmem:[%s1862_s17 + $0x98] sm:$0xff]  ;;  %v855_v12 = vld [vmem:[%s1862_s17 + $0xa0] sm:$0xff] }
 0x2bc   : >> { %828 = vst [vmem:[%s1858_s20 + $0x30] sm:$0xff] %v827_v62  ;;  %v857_v13 = vld [vmem:[%s1862_s17 + $0xa8] sm:$0xff]  ;;  %v859_v14 = vld [vmem:[%s1862_s17 + $0xb0] sm:$0xff]  ;;  %v861_v15 = vld [vmem:[%s1862_s17 + $0xb8] sm:$0xff] }
 0x2bd   : >> { %830 = vst [vmem:[%s1858_s20 + $0x38] sm:$0xff] %v829_v63  ;;  %v863_v16 = vld [vmem:[%s1862_s17 + $0xc0] sm:$0xff]  ;;  %v865_v17 = vld [vmem:[%s1862_s17 + $0xc8] sm:$0xff]  ;;  %v867_v18 = vld [vmem:[%s1862_s17 + $0xd0] sm:$0xff] }
 0x2be   : >> { %832 = vst [vmem:[%s1858_s20 + $0x40] sm:$0xff] %v831_v0  ;;  %v869_v19 = vld [vmem:[%s1862_s17 + $0xd8] sm:$0xff]  ;;  %v871_v20 = vld [vmem:[%s1862_s17 + $0xe0] sm:$0xff]  ;;  %v873_v21 = vld [vmem:[%s1862_s17 + $0xe8] sm:$0xff] }
 0x2bf   : >> { %834 = vst [vmem:[%s1858_s20 + $0x48] sm:$0xff] %v833_v1  ;;  %v875_v22 = vld [vmem:[%s1862_s17 + $0xf0] sm:$0xff]  ;;  %v877_v23 = vld [vmem:[%s1862_s17 + $0xf8] sm:$0xff]  ;;  %s2628_s17 = smov %s2445_s13 }
 0x2c0   : >> { %836 = vst [vmem:[%s1858_s20 + $0x50] sm:$0xff] %v835_v2 }
 0x2c1   : >> { %838 = vst [vmem:[%s1858_s20 + $0x58] sm:$0xff] %v837_v3 }
 0x2c2   : >> { %840 = vst [vmem:[%s1858_s20 + $0x60] sm:$0xff] %v839_v4 }
 0x2c3   : >> { %842 = vst [vmem:[%s1858_s20 + $0x68] sm:$0xff] %v841_v5 }
 0x2c4   : >> { %844 = vst [vmem:[%s1858_s20 + $0x70] sm:$0xff] %v843_v6 }
 0x2c5   : >> { %846 = vst [vmem:[%s1858_s20 + $0x78] sm:$0xff] %v845_v7 }
 0x2c6   : >> { %848 = vst [vmem:[%s1858_s20 + $0x80] sm:$0xff] %v847_v8 }
 0x2c7   : >> { %850 = vst [vmem:[%s1858_s20 + $0x88] sm:$0xff] %v849_v9 }
 0x2c8   : >> { %852 = vst [vmem:[%s1858_s20 + $0x90] sm:$0xff] %v851_v10 }
 0x2c9   : >> { %854 = vst [vmem:[%s1858_s20 + $0x98] sm:$0xff] %v853_v11 }
 0x2ca   : >> { %856 = vst [vmem:[%s1858_s20 + $0xa0] sm:$0xff] %v855_v12 }
 0x2cb   : >> { %858 = vst [vmem:[%s1858_s20 + $0xa8] sm:$0xff] %v857_v13 }
 0x2cc   : >> { %860 = vst [vmem:[%s1858_s20 + $0xb0] sm:$0xff] %v859_v14 }
 0x2cd   : >> { %862 = vst [vmem:[%s1858_s20 + $0xb8] sm:$0xff] %v861_v15 }
 0x2ce   : >> { %864 = vst [vmem:[%s1858_s20 + $0xc0] sm:$0xff] %v863_v16 }
 0x2cf   : >> { %866 = vst [vmem:[%s1858_s20 + $0xc8] sm:$0xff] %v865_v17 }
 0x2d0   : >> { %868 = vst [vmem:[%s1858_s20 + $0xd0] sm:$0xff] %v867_v18 }
 0x2d1   : >> { %870 = vst [vmem:[%s1858_s20 + $0xd8] sm:$0xff] %v869_v19  ;;  %811 = sbr.rel (!%p808_p13) target bundleno = 693 (0x2b5), region = 234 }
 0x2d2   : >> { %872 = vst [vmem:[%s1858_s20 + $0xe0] sm:$0xff] %v871_v20 }
 0x2d3   : >> { %874 = vst [vmem:[%s1858_s20 + $0xe8] sm:$0xff] %v873_v21 }
 0x2d4   : >> { %876 = vst [vmem:[%s1858_s20 + $0xf0] sm:$0xff] %v875_v22 }
 0x2d5   : >> { %878 = vst [vmem:[%s1858_s20 + $0xf8] sm:$0xff] %v877_v23  ;;  %s2627_s20 = smov %s2448_s28 }
 0x2d6 PF: > { %s2514_s16 = sand.u32 31, %s804_s21   ;;  %s1247_s18 = sshll.u32 %s2402_s23, 8 }
 0x2d7   : > { %s890_s6 = scalar_lea.vmem %s2198_s12, %s1247_s18 [#allocation10]   ;;  %s892_s15 = scalar_lea.vmem %s2257_s14, %s1247_s18  }
 0x2d8   : > { %p1232_p11 = scmp.le.s32.totalorder %s2514_s16, 0 }
 0x2d9   : > { %s1872_s0 = smov (!%p1232_p11), %s892_s15   ;;  %s1876_s3 = smov (!%p1232_p11), %s890_s6  }
 0x2da   : > { %1093 = sbr.rel (%p1232_p11) target bundleno = 743 (0x2e7), region = 239  ;;  %s1880_s8 = smov (!%p1232_p11), 0  }
 0x2db   : > { %s1884_s11 = smov (!%p1232_p11), 0  }
 0x2df LB: >> { %v902_v24 = vld [vmem:[%s1878_s3] sm:$0xff]  ;;  %s904_s21 = sadd.s32 1, %s1882_s8  ;;  %s896_s11 = sadd.s32 1, %s1886_s11   ;;  %s1886_s11 = sphi %s1884_s11, %s896_s11   ;;  %s1882_s8 = sphi %s1880_s8, %s1881_s8   ;;  %s1878_s3 = sphi %s1876_s3, %s909_s3   ;;  %s1874_s0 = sphi %s1872_s0, %s910_s0  }
 0x2e0   : >> { %903 = vst [vmem:[%s1874_s0] sm:$0xff] %v902_v24  ;;  %p905_p9 = scmp.ge.s32.totalorder %s904_s21, %s2514_s16  ;;  %p895_p4 = scmp.ge.s32.totalorder %s896_s11, %s2514_s16 }
 0x2e2   : >> { %s2667_s21 = smov (%p905_p9, %s904_s21), 0  ;;  %898 = sbr.rel (!%p895_p4) target bundleno = 735 (0x2df), region = 245 }
 0x2e3   : >> { %s1233_s23 = sshll.u32 %s2667_s21, 3  ;;  %s1881_s8 = smov %s2667_s21  }
 0x2e4   : >> { %s909_s3 = scalar_lea.vmem %s890_s6, %s1233_s23 [#allocation10]   ;;  %s910_s0 = scalar_lea.vmem %s892_s15, %s1233_s23  }
 0x2e7 PF: > { %s1896_s20 = smov 1  }
 0x2e8   : > { %s911_s17 = sshll.u32 %s1896_s20, %s2262_s1 }
 0x2e9   : > { %s1235_s19 = sadd.s32 4294967295, %s911_s17 }
 0x2ea   : > { %v921_v25 = vld [vmem:[%s801_s29] sm:%s1235_s19] }
 0x2eb   : > { %922 = vst [vmem:[%s803_s30] sm:%s1235_s19] %v921_v25 }
 0x2ec PF: > { %p1236_p10 = scmp.ge.u32.totalorder %s2252_s10, 8 }
 0x2ed   : > { %s1897_s26 = smov (!%p1236_p10), 1  }
 0x2ee   : > { %671 = sbr.rel (%p1236_p10) target bundleno = 757 (0x2f5), region = 80  ;;  %s672_s13 = sshll.u32 (!%p1236_p10), %s1897_s26, %s2252_s10 }
 0x2ef   : > { %s1237_s28 = sadd.s32 (!%p1236_p10), 4294967295, %s672_s13 }
 0x2f3   : > { %v682_v26 = vld [vmem:[%s2198_s12] sm:%s1237_s28] }
 0x2f4   : > { %683 = vst [vmem:[%s2257_s14] sm:%s1237_s28] %v682_v26 }
 0x2f5 PF: > { %s25_s9 = sadd.s32 1, %s1822_s9   ;;  %s2631_s21 = sld [smem:[#allocation14_spill]] }
 0x2f6   : > { %p2534_p12 = scmp.ge.s32.totalorder %s25_s9, 6   ;;  %s2632_s22 = sld [smem:[#allocation22_spill]] }
 0x2f7   : > { %s2633_s29 = sld [smem:[#allocation20_spill]]  ;;  %s2639_s23 = smov %s1786_s24 }
 0x2f8   : > { %s2634_s10 = sld [smem:[#allocation15_spill]]  ;;  %s2640_s24 = smov %s1790_s25 }
 0x2f9   : > { %s2635_s28 = sld [smem:[#allocation21_spill]]  ;;  %s2642_s26 = smov %s1798_s27 }
 0x2fa   : > { %s2636_s30 = sld [smem:[#allocation17_spill]] }
 0x2fb   : > { %s2637_s12 = sld [smem:[#allocation18_spill]] }
 0x2fc   : > { %s2638_s8 = sld [smem:[#allocation19_spill]] }
 0x2fd   : > { %s2641_s25 = smov %s2633_s29  ;;  %s2644_s29 = smov %s1814_s7 }
 0x2fe   : > { %s2643_s27 = smov %s2634_s10  ;;  %24 = sbr.rel (!%p2534_p12) target bundleno = 17 (0x11), region = 256 }
 0x301   : > { %s2645_s7 = smov %s2637_s12 }
 0x303   :  { %936 = vsyncpa [#allocation4], 1 }
 0x304   :  { %938 = vsyncpa [#allocation4 + $0x1], 1 }
 0x305   :  { %939 = vsyncpa [#allocation6], 1 }
 0x306   :  { %941 = vsyncpa [#allocation6 + $0x1], 1 }
 0x307   :  { %942 = vsyncpa [#allocation9], 1 }
 0x308   :  { %944 = vsyncpa [#allocation9 + $0x1], 1 }

// kernel: transformer_block_forward.8
= control target key start
LH: loop header
LB: loop body
LE: loop exit
PB: predicated region body
PF: predicated region fallthrough
CT: control target
= control target key end

     0   :  { %s4442_s0 = inlined_call_operand.vmem [shape: f32[16,128], index: 0, kind: input, shape index: {}]   ;;  %s4443_s1 = inlined_call_operand.vmem [shape: f32[1,128], index: 1, kind: input, shape index: {}]   ;;  %s4444_s2 = inlined_call_operand.vmem [shape: f32[128,384], index: 2, kind: input, shape index: {}]   ;;  %s4445_s3 = inlined_call_operand.vmem [shape: f32[128,384], index: 3, kind: input, shape index: {}]   ;;  %s4446_s4 = inlined_call_operand.vmem [shape: f32[16,384], index: 4, kind: output, shape index: {}]  }
   0x1   :  { %4448 = sst [smem:[#allocation7_spill]] %s4444_s2 }
   0x2   :  { %s2961_s15 = smov 0   ;;  %s2963_s16 = smov 0  }
   0x3   :  { %s2965_s17 = smov 0   ;;  %s2967_s18 = smov 0  }
   0x4   :  { %s2969_s19 = smov 0  }
   0x5 LB: > { %s23_s20 = sadd.s32 1, %s2731_s18  ;;  %s1937_s21 = sadd.s32 4294967295, %s2735_s19   ;;  %s2735_s19 = sphi %s2969_s19, %s14_s19   ;;  %s2731_s18 = sphi %s2967_s18, %s4507_s18   ;;  %s2727_s17 = sphi %s2965_s17, %s4506_s17   ;;  %s2723_s16 = sphi %s2963_s16, %s4505_s16   ;;  %s2719_s15 = sphi %s2961_s15, %s4504_s15  }
   0x6   : > { %p24_p0 = scmp.ge.s32.totalorder %s23_s20, 2  ;;  %p87_p1 = scmp.ne.s32.totalorder %s2723_s16, %s2719_s15 }
   0x7   : > { %p88_p2 = scmp.eq.s32.totalorder %s2735_s19, 0  ;;  %p145_p4 = scmp.eq.s32.totalorder %s1937_s21, 1 }
   0x8   : > { %s4509_s20 = smov (%p24_p0, %s23_s20), 0  ;;  %s80_s24 = sadd.s32 1, %s2723_s16 }
   0x9   : > { %4449 = sst [smem:[#allocation6_spill]] %s4509_s20  ;;  %p2993_p3 = por %p88_p2, %p87_p1 }
   0xa   : > { %s77_s23 = ssub.s32 %s2731_s18, %s4509_s20  ;;  %p3000_p6 = por %p145_p4, %p87_p1 }
   0xb   : > { %p78_p5 = scmp.eq.s32.totalorder %s77_s23, 0  ;;  %p1941_p7 = scmp.ge.s32.totalorder %s2735_s19, 2 }
   0xd   : > { %s3005_s26 = scalar_select %p78_p5, %s2723_s16, %s80_s24  }
   0xe   : > { %179 = sbr.rel (%p1941_p7) target bundleno = 421 (0x1a5), region = 24 }
  0x13   : > { %182 = sbr.rel (!%p2993_p3) target bundleno = 220 (0xdc), region = 28  ;;  %s184_s27 = sand.u32 (%p2993_p3), 1, %s2723_s16  }
  0x14   : > { %s1943_s28 = sshll.u32 (%p2993_p3), %s2731_s18, 1  ;;  %s1942_s29 = sshll.u32 (%p2993_p3), %s184_s27, 8 }
  0x15   : > { %s188_s30 = ssub.s32 (%p2993_p3), 3, %s1943_s28  ;;  %s2036_s5 = sshll.u32 (%p2993_p3), %s2731_s18, 4 }
  0x16   : > { %p189_p8 = scmp.lt.s32.totalorder (%p2993_p3), %s188_s30, 2  ;;  %s4452_s2 = sld [smem:[#allocation7_spill]] (%p2993_p3) }
  0x17   : > { %s3020_s11 = scalar_lea.vmem (%p2993_p3), [#allocation3], %s1942_s29  }
  0x18   : > { %s4511_s30 = smov (!%p189_p8, %s188_s30), 2 }
  0x19   : > { %s1944_s9 = sshll.u32 %s4511_s30, 7  ;;  %s3018_s10 = sshll.u32 %s4511_s30, 3 }
  0x1a   : > { %p1948_p9 = scmp.eq.s32.totalorder %s1944_s9, 0 }
  0x1b   : > { %p199_p10 = scmp.lt.u32.totalorder (!%p1948_p9), %s3018_s10, 8 }
  0x1c   : > { %s3016_s8 = scalar_lea.vmem %s4452_s2, %s2036_s5   ;;  %198 = sbr.rel (%p1948_p9) target bundleno = 220 (0xdc), region = 32 }
  0x21   : > { %202 = sbr.rel (%p199_p10) target bundleno = 196 (0xc4), region = 36  ;;  %s3024_s12 = sand.u32 (!%p199_p10), 7, %s3018_s10  }
  0x22   : > { %p249_p11 = scmp.eq.s32.totalorder (!%p199_p10), %s3024_s12, 0  ;;  %p1949_p12 = scmp.ne.s32.totalorder (!%p199_p10), %s3024_s12, 0 }
  0x26   : > { %252 = sbr.rel (%p1949_p12) target bundleno = 107 (0x6b), region = 51  ;;  %s253_s13 = sshrl.u32 (!%p1949_p12), %s3018_s10, 3 }
  0x27   : > { %s3031_s14 = sshrl.u32 (!%p1949_p12), %s253_s13, 1 }
  0x28   : > { %p1950_p13 = scmp.le.s32.totalorder (!%p1949_p12), %s3031_s14, 0 }
  0x2b   : > { %1730 = sbr.rel (%p1950_p13) target bundleno = 81 (0x51), region = 332  ;;  %s4453_s21 = smov (!%p1950_p13), %s3020_s11 }
  0x2c   : > { %s4454_s23 = smov (!%p1950_p13), %s3016_s8  ;;  %s3040_s24 = smov (!%p1950_p13), 0  }
  0x2d   : > { %s3042_s27 = smov (!%p1950_p13), 0  }
  0x30 LB: >> { %v264_v0 = vld [vmem:[%s2743_s23] sm:$0xff]  ;;  %v266_v1 = vld [vmem:[%s2743_s23 + $0x8] sm:$0xff]  ;;  %v268_v2 = vld [vmem:[%s2743_s23 + $0x18] sm:$0xff]  ;;  %s328_s28 = sadd.s32 1, %s2747_s24  ;;  %s258_s27 = sadd.s32 1, %s2751_s27   ;;  %s2751_s27 = sphi %s3042_s27, %s258_s27   ;;  %s2747_s24 = sphi %s3040_s24, %s4457_s24   ;;  %s2743_s23 = sphi %s4454_s23, %s4456_s23   ;;  %s2739_s21 = sphi %s4453_s21, %s4455_s21  }
  0x31   : >> { %265 = vst [vmem:[%s2739_s21] sm:$0xff] %v264_v0  ;;  %v270_v3 = vld [vmem:[%s2743_s23 + $0x20] sm:$0xff]  ;;  %p329_p0 = scmp.ge.s32.totalorder %s328_s28, %s3031_s14  ;;  %v272_v4 = vld [vmem:[%s2743_s23 + $0x30] sm:$0xff]  ;;  %v274_v5 = vld [vmem:[%s2743_s23 + $0x38] sm:$0xff]  ;;  %p257_p1 = scmp.ge.s32.totalorder %s258_s27, %s3031_s14 }
  0x32   : >> { %267 = vst [vmem:[%s2739_s21 + $0x8] sm:$0xff] %v266_v1  ;;  %v276_v6 = vld [vmem:[%s2743_s23 + $0x48] sm:$0xff]  ;;  %v278_v7 = vld [vmem:[%s2743_s23 + $0x50] sm:$0xff]  ;;  %v280_v8 = vld [vmem:[%s2743_s23 + $0x60] sm:$0xff] }
  0x33   : >> { %269 = vst [vmem:[%s2739_s21 + $0x10] sm:$0xff] %v268_v2  ;;  %s4513_s28 = smov (%p329_p0, %s328_s28), 0  ;;  %v282_v9 = vld [vmem:[%s2743_s23 + $0x68] sm:$0xff]  ;;  %v284_v10 = vld [vmem:[%s2743_s23 + $0x78] sm:$0xff]  ;;  %v286_v11 = vld [vmem:[%s2743_s23 + $0x80] sm:$0xff] }
  0x34   : >> { %271 = vst [vmem:[%s2739_s21 + $0x18] sm:$0xff] %v270_v3  ;;  %s1951_s29 = sshll.u32 %s4513_s28, 4  ;;  %v288_v12 = vld [vmem:[%s2743_s23 + $0x90] sm:$0xff]  ;;  %v290_v13 = vld [vmem:[%s2743_s23 + $0x98] sm:$0xff]  ;;  %v292_v14 = vld [vmem:[%s2743_s23 + $0xa8] sm:$0xff]  ;;  %s4457_s24 = smov %s4513_s28 }
  0x35   : >> { %273 = vst [vmem:[%s2739_s21 + $0x20] sm:$0xff] %v272_v4  ;;  %s3074_s30 = scalar_lea.vmem %s3016_s8, %s1951_s29   ;;  %s3077_s5 = scalar_lea.vmem %s3020_s11, %s1951_s29 [#allocation3]   ;;  %v294_v15 = vld [vmem:[%s2743_s23 + $0xb0] sm:$0xff]  ;;  %v296_v16 = vld [vmem:[%s2743_s23 + $0xc0] sm:$0xff]  ;;  %v298_v17 = vld [vmem:[%s2743_s23 + $0xc8] sm:$0xff] }
  0x36   : >> { %275 = vst [vmem:[%s2739_s21 + $0x28] sm:$0xff] %v274_v5  ;;  %v300_v18 = vld [vmem:[%s2743_s23 + $0xd8] sm:$0xff]  ;;  %v302_v19 = vld [vmem:[%s2743_s23 + $0xe0] sm:$0xff]  ;;  %v304_v20 = vld [vmem:[%s2743_s23 + $0xf0] sm:$0xff] }
  0x37   : >> { %277 = vst [vmem:[%s2739_s21 + $0x30] sm:$0xff] %v276_v6  ;;  %v306_v21 = vld [vmem:[%s2743_s23 + $0xf8] sm:$0xff]  ;;  %v308_v22 = vld [vmem:[%s2743_s23 + $0x108] sm:$0xff]  ;;  %v310_v23 = vld [vmem:[%s2743_s23 + $0x110] sm:$0xff] }
  0x38   : >> { %279 = vst [vmem:[%s2739_s21 + $0x38] sm:$0xff] %v278_v7  ;;  %v312_v24 = vld [vmem:[%s2743_s23 + $0x120] sm:$0xff]  ;;  %v314_v25 = vld [vmem:[%s2743_s23 + $0x128] sm:$0xff]  ;;  %v316_v26 = vld [vmem:[%s2743_s23 + $0x138] sm:$0xff] }
  0x39   : >> { %281 = vst [vmem:[%s2739_s21 + $0x40] sm:$0xff] %v280_v8  ;;  %v318_v27 = vld [vmem:[%s2743_s23 + $0x140] sm:$0xff]  ;;  %v320_v28 = vld [vmem:[%s2743_s23 + $0x150] sm:$0xff]  ;;  %v322_v29 = vld [vmem:[%s2743_s23 + $0x158] sm:$0xff] }
  0x3a   : >> { %283 = vst [vmem:[%s2739_s21 + $0x48] sm:$0xff] %v282_v9  ;;  %v324_v30 = vld [vmem:[%s2743_s23 + $0x168] sm:$0xff]  ;;  %v326_v31 = vld [vmem:[%s2743_s23 + $0x170] sm:$0xff]  ;;  %s4456_s23 = smov %s3074_s30 }
  0x3b   : >> { %285 = vst [vmem:[%s2739_s21 + $0x50] sm:$0xff] %v284_v10 }
  0x3c   : >> { %287 = vst [vmem:[%s2739_s21 + $0x58] sm:$0xff] %v286_v11 }
  0x3d   : >> { %289 = vst [vmem:[%s2739_s21 + $0x60] sm:$0xff] %v288_v12 }
  0x3e   : >> { %291 = vst [vmem:[%s2739_s21 + $0x68] sm:$0xff] %v290_v13 }
  0x3f   : >> { %293 = vst [vmem:[%s2739_s21 + $0x70] sm:$0xff] %v292_v14 }
  0x40   : >> { %295 = vst [vmem:[%s2739_s21 + $0x78] sm:$0xff] %v294_v15 }
  0x41   : >> { %297 = vst [vmem:[%s2739_s21 + $0x80] sm:$0xff] %v296_v16 }
  0x42   : >> { %299 = vst [vmem:[%s2739_s21 + $0x88] sm:$0xff] %v298_v17 }
  0x43   : >> { %301 = vst [vmem:[%s2739_s21 + $0x90] sm:$0xff] %v300_v18 }
  0x44   : >> { %303 = vst [vmem:[%s2739_s21 + $0x98] sm:$0xff] %v302_v19 }
  0x45   : >> { %305 = vst [vmem:[%s2739_s21 + $0xa0] sm:$0xff] %v304_v20 }
  0x46   : >> { %307 = vst [vmem:[%s2739_s21 + $0xa8] sm:$0xff] %v306_v21 }
  0x47   : >> { %309 = vst [vmem:[%s2739_s21 + $0xb0] sm:$0xff] %v308_v22 }
  0x48   : >> { %311 = vst [vmem:[%s2739_s21 + $0xb8] sm:$0xff] %v310_v23 }
  0x49   : >> { %313 = vst [vmem:[%s2739_s21 + $0xc0] sm:$0xff] %v312_v24 }
  0x4a   : >> { %315 = vst [vmem:[%s2739_s21 + $0xc8] sm:$0xff] %v314_v25 }
  0x4b   : >> { %317 = vst [vmem:[%s2739_s21 + $0xd0] sm:$0xff] %v316_v26 }
  0x4c   : >> { %319 = vst [vmem:[%s2739_s21 + $0xd8] sm:$0xff] %v318_v27  ;;  %260 = sbr.rel (!%p257_p1) target bundleno = 48 (0x30), region = 338 }
  0x4d   : >> { %321 = vst [vmem:[%s2739_s21 + $0xe0] sm:$0xff] %v320_v28 }
  0x4e   : >> { %323 = vst [vmem:[%s2739_s21 + $0xe8] sm:$0xff] %v322_v29 }
  0x4f   : >> { %325 = vst [vmem:[%s2739_s21 + $0xf0] sm:$0xff] %v324_v30 }
  0x50   : >> { %327 = vst [vmem:[%s2739_s21 + $0xf8] sm:$0xff] %v326_v31  ;;  %s4455_s21 = smov %s3077_s5 }
  0x51 PF: > { %s3143_s6 = sand.u32 1, %s253_s13   ;;  %s2037_s7 = sshll.u32 %s3031_s14, 4 }
  0x52   : > { %s3147_s9 = scalar_lea.vmem %s3016_s8, %s2037_s7   ;;  %s3150_s29 = scalar_lea.vmem %s3020_s11, %s2037_s7 [#allocation3]  }
  0x53   : > { %p1956_p2 = scmp.le.s32.totalorder %s3143_s6, 0 }
  0x54   : > { %s4458_s27 = smov (!%p1956_p2), %s3150_s29  ;;  %s4459_s21 = smov (!%p1956_p2), %s3147_s9 }
  0x55   : > { %1744 = sbr.rel (%p1956_p2) target bundleno = 107 (0x6b), region = 343  ;;  %s3159_s23 = smov (!%p1956_p2), 0  }
  0x56   : > { %s3161_s24 = smov (!%p1956_p2), 0  }
  0x5a LB: >> { %v351_v32 = vld [vmem:[%s2759_s21] sm:$0xff]  ;;  %v353_v33 = vld [vmem:[%s2759_s21 + $0x18] sm:$0xff]  ;;  %v355_v34 = vld [vmem:[%s2759_s21 + $0x30] sm:$0xff]  ;;  %s383_s13 = sadd.s32 1, %s2763_s23  ;;  %s345_s24 = sadd.s32 1, %s2767_s24   ;;  %s2767_s24 = sphi %s3161_s24, %s345_s24   ;;  %s2763_s23 = sphi %s3159_s23, %s4462_s23   ;;  %s2759_s21 = sphi %s4459_s21, %s4461_s21   ;;  %s2755_s27 = sphi %s4458_s27, %s4460_s27  }
  0x5b   : >> { %352 = vst [vmem:[%s2755_s27] sm:$0xff] %v351_v32  ;;  %v357_v35 = vld [vmem:[%s2759_s21 + $0x48] sm:$0xff]  ;;  %p384_p4 = scmp.ge.s32.totalorder %s383_s13, %s3143_s6  ;;  %v359_v36 = vld [vmem:[%s2759_s21 + $0x60] sm:$0xff]  ;;  %v361_v37 = vld [vmem:[%s2759_s21 + $0x78] sm:$0xff]  ;;  %p344_p5 = scmp.ge.s32.totalorder %s345_s24, %s3143_s6 }
  0x5c   : >> { %354 = vst [vmem:[%s2755_s27 + $0x10] sm:$0xff] %v353_v33  ;;  %v363_v38 = vld [vmem:[%s2759_s21 + $0x90] sm:$0xff]  ;;  %v365_v39 = vld [vmem:[%s2759_s21 + $0xa8] sm:$0xff]  ;;  %v367_v40 = vld [vmem:[%s2759_s21 + $0xc0] sm:$0xff] }
  0x5d   : >> { %356 = vst [vmem:[%s2755_s27 + $0x20] sm:$0xff] %v355_v34  ;;  %s4515_s13 = smov (%p384_p4, %s383_s13), 0  ;;  %v369_v41 = vld [vmem:[%s2759_s21 + $0xd8] sm:$0xff]  ;;  %v371_v42 = vld [vmem:[%s2759_s21 + $0xf0] sm:$0xff]  ;;  %v373_v43 = vld [vmem:[%s2759_s21 + $0x108] sm:$0xff] }
  0x5e   : >> { %358 = vst [vmem:[%s2755_s27 + $0x30] sm:$0xff] %v357_v35  ;;  %s1957_s14 = sshll.u32 %s4515_s13, 3  ;;  %v375_v44 = vld [vmem:[%s2759_s21 + $0x120] sm:$0xff]  ;;  %v377_v45 = vld [vmem:[%s2759_s21 + $0x138] sm:$0xff]  ;;  %v379_v46 = vld [vmem:[%s2759_s21 + $0x150] sm:$0xff]  ;;  %s4462_s23 = smov %s4515_s13 }
  0x5f   : >> { %360 = vst [vmem:[%s2755_s27 + $0x40] sm:$0xff] %v359_v36  ;;  %s388_s28 = scalar_lea.vmem %s3147_s9, %s1957_s14   ;;  %s389_s30 = scalar_lea.vmem %s3150_s29, %s1957_s14 [#allocation3]   ;;  %v381_v47 = vld [vmem:[%s2759_s21 + $0x168] sm:$0xff] }
  0x60   : >> { %362 = vst [vmem:[%s2755_s27 + $0x50] sm:$0xff] %v361_v37  ;;  %s4461_s21 = smov %s388_s28 }
  0x61   : >> { %364 = vst [vmem:[%s2755_s27 + $0x60] sm:$0xff] %v363_v38 }
  0x62   : >> { %366 = vst [vmem:[%s2755_s27 + $0x70] sm:$0xff] %v365_v39 }
  0x63   : >> { %368 = vst [vmem:[%s2755_s27 + $0x80] sm:$0xff] %v367_v40 }
  0x64   : >> { %370 = vst [vmem:[%s2755_s27 + $0x90] sm:$0xff] %v369_v41 }
  0x65   : >> { %372 = vst [vmem:[%s2755_s27 + $0xa0] sm:$0xff] %v371_v42 }
  0x66   : >> { %374 = vst [vmem:[%s2755_s27 + $0xb0] sm:$0xff] %v373_v43  ;;  %347 = sbr.rel (!%p344_p5) target bundleno = 90 (0x5a), region = 349 }
  0x67   : >> { %376 = vst [vmem:[%s2755_s27 + $0xc0] sm:$0xff] %v375_v44 }
  0x68   : >> { %378 = vst [vmem:[%s2755_s27 + $0xd0] sm:$0xff] %v377_v45 }
  0x69   : >> { %380 = vst [vmem:[%s2755_s27 + $0xe0] sm:$0xff] %v379_v46 }
  0x6a   : >> { %382 = vst [vmem:[%s2755_s27 + $0xf0] sm:$0xff] %v381_v47  ;;  %s4460_s27 = smov %s389_s30 }
  0x6b PF: > { %392 = sbr.rel (%p249_p11) target bundleno = 196 (0xc4), region = 69  ;;  %s394_s5 = ssub.s32 (!%p249_p11), %s3018_s10, %s3024_s12 }
  0x6c   : > { %s398_s7 = sshrl.u32 (!%p249_p11), %s3018_s10, 3  ;;  %s3228_s14 = scalar_lea.vmem (!%p249_p11), %s3016_s8, %s394_s5 }
  0x6d   : > { %s3231_s28 = scalar_lea.vmem (!%p249_p11), %s3020_s11, %s394_s5 [#allocation3]  ;;  %s3235_s24 = sshrl.u32 (!%p249_p11), %s398_s7, 1 }
  0x6e   : > { %p1959_p7 = scmp.le.s32.totalorder (!%p249_p11), %s3235_s24, 0 }
  0x70   : > { %1758 = sbr.rel (%p1959_p7) target bundleno = 150 (0x96), region = 354  ;;  %s4463_s6 = smov (!%p1959_p7), %s3020_s11 }
  0x71   : > { %s4464_s9 = smov (!%p1959_p7), %s3016_s8  ;;  %s3244_s29 = smov (!%p1959_p7), 0  }
  0x72   : > { %s3246_s27 = smov (!%p1959_p7), 0  }
  0x75 LB: >> { %v409_v48 = vld [vmem:[%s2775_s9] sm:$0xff]  ;;  %v411_v49 = vld [vmem:[%s2775_s9 + $0x8] sm:$0xff]  ;;  %v413_v50 = vld [vmem:[%s2775_s9 + $0x18] sm:$0xff]  ;;  %s473_s21 = sadd.s32 1, %s2779_s29  ;;  %s403_s27 = sadd.s32 1, %s2783_s27   ;;  %s2783_s27 = sphi %s3246_s27, %s403_s27   ;;  %s2779_s29 = sphi %s3244_s29, %s4467_s29   ;;  %s2775_s9 = sphi %s4464_s9, %s4466_s9   ;;  %s2771_s6 = sphi %s4463_s6, %s4465_s6  }
  0x76   : >> { %410 = vst [vmem:[%s2771_s6] sm:$0xff] %v409_v48  ;;  %v415_v51 = vld [vmem:[%s2775_s9 + $0x20] sm:$0xff]  ;;  %p474_p8 = scmp.ge.s32.totalorder %s473_s21, %s3235_s24  ;;  %v417_v52 = vld [vmem:[%s2775_s9 + $0x30] sm:$0xff]  ;;  %v419_v53 = vld [vmem:[%s2775_s9 + $0x38] sm:$0xff]  ;;  %p402_p9 = scmp.ge.s32.totalorder %s403_s27, %s3235_s24 }
  0x77   : >> { %412 = vst [vmem:[%s2771_s6 + $0x8] sm:$0xff] %v411_v49  ;;  %v421_v54 = vld [vmem:[%s2775_s9 + $0x48] sm:$0xff]  ;;  %v423_v55 = vld [vmem:[%s2775_s9 + $0x50] sm:$0xff]  ;;  %v425_v56 = vld [vmem:[%s2775_s9 + $0x60] sm:$0xff] }
  0x78   : >> { %414 = vst [vmem:[%s2771_s6 + $0x10] sm:$0xff] %v413_v50  ;;  %s4517_s21 = smov (%p474_p8, %s473_s21), 0  ;;  %v427_v57 = vld [vmem:[%s2775_s9 + $0x68] sm:$0xff]  ;;  %v429_v58 = vld [vmem:[%s2775_s9 + $0x78] sm:$0xff]  ;;  %v431_v59 = vld [vmem:[%s2775_s9 + $0x80] sm:$0xff] }
  0x79   : >> { %416 = vst [vmem:[%s2771_s6 + $0x18] sm:$0xff] %v415_v51  ;;  %s1960_s23 = sshll.u32 %s4517_s21, 4  ;;  %v433_v60 = vld [vmem:[%s2775_s9 + $0x90] sm:$0xff]  ;;  %v435_v61 = vld [vmem:[%s2775_s9 + $0x98] sm:$0xff]  ;;  %v437_v62 = vld [vmem:[%s2775_s9 + $0xa8] sm:$0xff]  ;;  %s4467_s29 = smov %s4517_s21 }
  0x7a   : >> { %418 = vst [vmem:[%s2771_s6 + $0x20] sm:$0xff] %v417_v52  ;;  %s3278_s13 = scalar_lea.vmem %s3016_s8, %s1960_s23   ;;  %s3281_s30 = scalar_lea.vmem %s3020_s11, %s1960_s23 [#allocation3]   ;;  %v439_v63 = vld [vmem:[%s2775_s9 + $0xb0] sm:$0xff]  ;;  %v441_v0 = vld [vmem:[%s2775_s9 + $0xc0] sm:$0xff]  ;;  %v443_v1 = vld [vmem:[%s2775_s9 + $0xc8] sm:$0xff] }
  0x7b   : >> { %420 = vst [vmem:[%s2771_s6 + $0x28] sm:$0xff] %v419_v53  ;;  %v445_v2 = vld [vmem:[%s2775_s9 + $0xd8] sm:$0xff]  ;;  %v447_v3 = vld [vmem:[%s2775_s9 + $0xe0] sm:$0xff]  ;;  %v449_v4 = vld [vmem:[%s2775_s9 + $0xf0] sm:$0xff] }
  0x7c   : >> { %422 = vst [vmem:[%s2771_s6 + $0x30] sm:$0xff] %v421_v54  ;;  %v451_v5 = vld [vmem:[%s2775_s9 + $0xf8] sm:$0xff]  ;;  %v453_v6 = vld [vmem:[%s2775_s9 + $0x108] sm:$0xff]  ;;  %v455_v7 = vld [vmem:[%s2775_s9 + $0x110] sm:$0xff] }
  0x7d   : >> { %424 = vst [vmem:[%s2771_s6 + $0x38] sm:$0xff] %v423_v55  ;;  %v457_v8 = vld [vmem:[%s2775_s9 + $0x120] sm:$0xff]  ;;  %v459_v9 = vld [vmem:[%s2775_s9 + $0x128] sm:$0xff]  ;;  %v461_v10 = vld [vmem:[%s2775_s9 + $0x138] sm:$0xff] }
  0x7e   : >> { %426 = vst [vmem:[%s2771_s6 + $0x40] sm:$0xff] %v425_v56  ;;  %v463_v11 = vld [vmem:[%s2775_s9 + $0x140] sm:$0xff]  ;;  %v465_v12 = vld [vmem:[%s2775_s9 + $0x150] sm:$0xff]  ;;  %v467_v13 = vld [vmem:[%s2775_s9 + $0x158] sm:$0xff] }
  0x7f   : >> { %428 = vst [vmem:[%s2771_s6 + $0x48] sm:$0xff] %v427_v57  ;;  %v469_v14 = vld [vmem:[%s2775_s9 + $0x168] sm:$0xff]  ;;  %v471_v15 = vld [vmem:[%s2775_s9 + $0x170] sm:$0xff]  ;;  %s4466_s9 = smov %s3278_s13 }
  0x80   : >> { %430 = vst [vmem:[%s2771_s6 + $0x50] sm:$0xff] %v429_v58 }
  0x81   : >> { %432 = vst [vmem:[%s2771_s6 + $0x58] sm:$0xff] %v431_v59 }
  0x82   : >> { %434 = vst [vmem:[%s2771_s6 + $0x60] sm:$0xff] %v433_v60 }
  0x83   : >> { %436 = vst [vmem:[%s2771_s6 + $0x68] sm:$0xff] %v435_v61 }
  0x84   : >> { %438 = vst [vmem:[%s2771_s6 + $0x70] sm:$0xff] %v437_v62 }
  0x85   : >> { %440 = vst [vmem:[%s2771_s6 + $0x78] sm:$0xff] %v439_v63 }
  0x86   : >> { %442 = vst [vmem:[%s2771_s6 + $0x80] sm:$0xff] %v441_v0 }
  0x87   : >> { %444 = vst [vmem:[%s2771_s6 + $0x88] sm:$0xff] %v443_v1 }
  0x88   : >> { %446 = vst [vmem:[%s2771_s6 + $0x90] sm:$0xff] %v445_v2 }
  0x89   : >> { %448 = vst [vmem:[%s2771_s6 + $0x98] sm:$0xff] %v447_v3 }
  0x8a   : >> { %450 = vst [vmem:[%s2771_s6 + $0xa0] sm:$0xff] %v449_v4 }
  0x8b   : >> { %452 = vst [vmem:[%s2771_s6 + $0xa8] sm:$0xff] %v451_v5 }
  0x8c   : >> { %454 = vst [vmem:[%s2771_s6 + $0xb0] sm:$0xff] %v453_v6 }
  0x8d   : >> { %456 = vst [vmem:[%s2771_s6 + $0xb8] sm:$0xff] %v455_v7 }
  0x8e   : >> { %458 = vst [vmem:[%s2771_s6 + $0xc0] sm:$0xff] %v457_v8 }
  0x8f   : >> { %460 = vst [vmem:[%s2771_s6 + $0xc8] sm:$0xff] %v459_v9 }
  0x90   : >> { %462 = vst [vmem:[%s2771_s6 + $0xd0] sm:$0xff] %v461_v10 }
  0x91   : >> { %464 = vst [vmem:[%s2771_s6 + $0xd8] sm:$0xff] %v463_v11  ;;  %405 = sbr.rel (!%p402_p9) target bundleno = 117 (0x75), region = 360 }
  0x92   : >> { %466 = vst [vmem:[%s2771_s6 + $0xe0] sm:$0xff] %v465_v12 }
  0x93   : >> { %468 = vst [vmem:[%s2771_s6 + $0xe8] sm:$0xff] %v467_v13 }
  0x94   : >> { %470 = vst [vmem:[%s2771_s6 + $0xf0] sm:$0xff] %v469_v14 }
  0x95   : >> { %472 = vst [vmem:[%s2771_s6 + $0xf8] sm:$0xff] %v471_v15  ;;  %s4465_s6 = smov %s3281_s30 }
  0x96 PF: > { %s3347_s5 = sand.u32 1, %s398_s7   ;;  %s2039_s23 = sshll.u32 %s3235_s24, 4 }
  0x97   : > { %s3351_s2 = scalar_lea.vmem %s3016_s8, %s2039_s23   ;;  %s3354_s20 = scalar_lea.vmem %s3020_s11, %s2039_s23 [#allocation3]  }
  0x98   : > { %p1965_p10 = scmp.le.s32.totalorder %s3347_s5, 0 }
  0x99   : > { %s4468_s27 = smov (!%p1965_p10), %s3354_s20  ;;  %s4469_s6 = smov (!%p1965_p10), %s3351_s2 }
  0x9a   : > { %1772 = sbr.rel (%p1965_p10) target bundleno = 176 (0xb0), region = 365  ;;  %s3363_s9 = smov (!%p1965_p10), 0  }
  0x9b   : > { %s3365_s29 = smov (!%p1965_p10), 0  }
  0x9f LB: >> { %v496_v16 = vld [vmem:[%s2791_s6] sm:$0xff]  ;;  %v498_v17 = vld [vmem:[%s2791_s6 + $0x18] sm:$0xff]  ;;  %v500_v18 = vld [vmem:[%s2791_s6 + $0x30] sm:$0xff]  ;;  %s528_s7 = sadd.s32 1, %s2795_s9  ;;  %s490_s29 = sadd.s32 1, %s2799_s29   ;;  %s2799_s29 = sphi %s3365_s29, %s490_s29   ;;  %s2795_s9 = sphi %s3363_s9, %s4472_s9   ;;  %s2791_s6 = sphi %s4469_s6, %s4471_s6   ;;  %s2787_s27 = sphi %s4468_s27, %s4470_s27  }
  0xa0   : >> { %497 = vst [vmem:[%s2787_s27] sm:$0xff] %v496_v16  ;;  %v502_v19 = vld [vmem:[%s2791_s6 + $0x48] sm:$0xff]  ;;  %p529_p11 = scmp.ge.s32.totalorder %s528_s7, %s3347_s5  ;;  %v504_v20 = vld [vmem:[%s2791_s6 + $0x60] sm:$0xff]  ;;  %v506_v21 = vld [vmem:[%s2791_s6 + $0x78] sm:$0xff]  ;;  %p489_p12 = scmp.ge.s32.totalorder %s490_s29, %s3347_s5 }
  0xa1   : >> { %499 = vst [vmem:[%s2787_s27 + $0x10] sm:$0xff] %v498_v17  ;;  %v508_v22 = vld [vmem:[%s2791_s6 + $0x90] sm:$0xff]  ;;  %v510_v23 = vld [vmem:[%s2791_s6 + $0xa8] sm:$0xff]  ;;  %v512_v24 = vld [vmem:[%s2791_s6 + $0xc0] sm:$0xff] }
  0xa2   : >> { %501 = vst [vmem:[%s2787_s27 + $0x20] sm:$0xff] %v500_v18  ;;  %s4519_s7 = smov (%p529_p11, %s528_s7), 0  ;;  %v514_v25 = vld [vmem:[%s2791_s6 + $0xd8] sm:$0xff]  ;;  %v516_v26 = vld [vmem:[%s2791_s6 + $0xf0] sm:$0xff]  ;;  %v518_v27 = vld [vmem:[%s2791_s6 + $0x108] sm:$0xff] }
  0xa3   : >> { %503 = vst [vmem:[%s2787_s27 + $0x30] sm:$0xff] %v502_v19  ;;  %s1966_s24 = sshll.u32 %s4519_s7, 3  ;;  %v520_v28 = vld [vmem:[%s2791_s6 + $0x120] sm:$0xff]  ;;  %v522_v29 = vld [vmem:[%s2791_s6 + $0x138] sm:$0xff]  ;;  %v524_v30 = vld [vmem:[%s2791_s6 + $0x150] sm:$0xff]  ;;  %s4472_s9 = smov %s4519_s7 }
  0xa4   : >> { %505 = vst [vmem:[%s2787_s27 + $0x40] sm:$0xff] %v504_v20  ;;  %s533_s21 = scalar_lea.vmem %s3351_s2, %s1966_s24   ;;  %s534_s13 = scalar_lea.vmem %s3354_s20, %s1966_s24 [#allocation3]   ;;  %v526_v31 = vld [vmem:[%s2791_s6 + $0x168] sm:$0xff] }
  0xa5   : >> { %507 = vst [vmem:[%s2787_s27 + $0x50] sm:$0xff] %v506_v21  ;;  %s4471_s6 = smov %s533_s21 }
  0xa6   : >> { %509 = vst [vmem:[%s2787_s27 + $0x60] sm:$0xff] %v508_v22 }
  0xa7   : >> { %511 = vst [vmem:[%s2787_s27 + $0x70] sm:$0xff] %v510_v23 }
  0xa8   : >> { %513 = vst [vmem:[%s2787_s27 + $0x80] sm:$0xff] %v512_v24 }
  0xa9   : >> { %515 = vst [vmem:[%s2787_s27 + $0x90] sm:$0xff] %v514_v25 }
  0xaa   : >> { %517 = vst [vmem:[%s2787_s27 + $0xa0] sm:$0xff] %v516_v26 }
  0xab   : >> { %519 = vst [vmem:[%s2787_s27 + $0xb0] sm:$0xff] %v518_v27  ;;  %492 = sbr.rel (!%p489_p12) target bundleno = 159 (0x9f), region = 371 }
  0xac   : >> { %521 = vst [vmem:[%s2787_s27 + $0xc0] sm:$0xff] %v520_v28 }
  0xad   : >> { %523 = vst [vmem:[%s2787_s27 + $0xd0] sm:$0xff] %v522_v29 }
  0xae   : >> { %525 = vst [vmem:[%s2787_s27 + $0xe0] sm:$0xff] %v524_v30 }
  0xaf   : >> { %527 = vst [vmem:[%s2787_s27 + $0xf0] sm:$0xff] %v526_v31  ;;  %s4470_s27 = smov %s534_s13 }
  0xb0 PF: > { %s2929_s30 = smov 1  }
  0xb1   : > { %s535_s23 = sshll.u32 %s2929_s30, %s3024_s12 }
  0xb2   : > { %s3427_s29 = sadd.s32 4294967295, %s535_s23 }
  0xb3   : > { %v545_v32 = vld [vmem:[%s3228_s14] sm:%s3427_s29]  ;;  %v547_v33 = vld [vmem:[%s3228_s14 + $0x18] sm:%s3427_s29] }
  0xb4   : > { %546 = vst [vmem:[%s3231_s28] sm:%s3427_s29] %v545_v32  ;;  %v549_v34 = vld [vmem:[%s3228_s14 + $0x30] sm:%s3427_s29] }
  0xb5   : > { %548 = vst [vmem:[%s3231_s28 + $0x10] sm:%s3427_s29] %v547_v33  ;;  %v551_v35 = vld [vmem:[%s3228_s14 + $0x48] sm:%s3427_s29] }
  0xb6   : > { %550 = vst [vmem:[%s3231_s28 + $0x20] sm:%s3427_s29] %v549_v34  ;;  %v553_v36 = vld [vmem:[%s3228_s14 + $0x60] sm:%s3427_s29] }
  0xb7   : > { %552 = vst [vmem:[%s3231_s28 + $0x30] sm:%s3427_s29] %v551_v35  ;;  %v555_v37 = vld [vmem:[%s3228_s14 + $0x78] sm:%s3427_s29] }
  0xb8   : > { %554 = vst [vmem:[%s3231_s28 + $0x40] sm:%s3427_s29] %v553_v36  ;;  %v557_v38 = vld [vmem:[%s3228_s14 + $0x90] sm:%s3427_s29] }
  0xb9   : > { %556 = vst [vmem:[%s3231_s28 + $0x50] sm:%s3427_s29] %v555_v37  ;;  %v559_v39 = vld [vmem:[%s3228_s14 + $0xa8] sm:%s3427_s29] }
  0xba   : > { %558 = vst [vmem:[%s3231_s28 + $0x60] sm:%s3427_s29] %v557_v38  ;;  %v561_v40 = vld [vmem:[%s3228_s14 + $0xc0] sm:%s3427_s29] }
  0xbb   : > { %560 = vst [vmem:[%s3231_s28 + $0x70] sm:%s3427_s29] %v559_v39  ;;  %v563_v41 = vld [vmem:[%s3228_s14 + $0xd8] sm:%s3427_s29] }
  0xbc   : > { %562 = vst [vmem:[%s3231_s28 + $0x80] sm:%s3427_s29] %v561_v40  ;;  %v565_v42 = vld [vmem:[%s3228_s14 + $0xf0] sm:%s3427_s29] }
  0xbd   : > { %564 = vst [vmem:[%s3231_s28 + $0x90] sm:%s3427_s29] %v563_v41  ;;  %v567_v43 = vld [vmem:[%s3228_s14 + $0x108] sm:%s3427_s29] }
  0xbe   : > { %566 = vst [vmem:[%s3231_s28 + $0xa0] sm:%s3427_s29] %v565_v42  ;;  %v569_v44 = vld [vmem:[%s3228_s14 + $0x120] sm:%s3427_s29] }
  0xbf   : > { %568 = vst [vmem:[%s3231_s28 + $0xb0] sm:%s3427_s29] %v567_v43  ;;  %v571_v45 = vld [vmem:[%s3228_s14 + $0x138] sm:%s3427_s29] }
  0xc0   : > { %570 = vst [vmem:[%s3231_s28 + $0xc0] sm:%s3427_s29] %v569_v44  ;;  %v573_v46 = vld [vmem:[%s3228_s14 + $0x150] sm:%s3427_s29] }
  0xc1   : > { %572 = vst [vmem:[%s3231_s28 + $0xd0] sm:%s3427_s29] %v571_v45  ;;  %v575_v47 = vld [vmem:[%s3228_s14 + $0x168] sm:%s3427_s29] }
  0xc2   : > { %574 = vst [vmem:[%s3231_s28 + $0xe0] sm:%s3427_s29] %v573_v46 }
  0xc3   : > { %576 = vst [vmem:[%s3231_s28 + $0xf0] sm:%s3427_s29] %v575_v47 }
  0xc4 PF: > { %p1969_p13 = scmp.ge.u32.totalorder %s3018_s10, 8 }
  0xc5   : > { %s2930_s2 = smov (!%p1969_p13), 1  }
  0xc6   : > { %205 = sbr.rel (%p1969_p13) target bundleno = 220 (0xdc), region = 40  ;;  %s206_s20 = sshll.u32 (!%p1969_p13), %s2930_s2, %s3018_s10 }
  0xc7   : > { %s3495_s12 = sadd.s32 (!%p1969_p13), 4294967295, %s206_s20 }
  0xcb   : > { %v216_v48 = vld [vmem:[%s3016_s8] sm:%s3495_s12]  ;;  %v218_v49 = vld [vmem:[%s3016_s8 + $0x18] sm:%s3495_s12] }
  0xcc   : > { %217 = vst [vmem:[%s3020_s11] sm:%s3495_s12] %v216_v48  ;;  %v220_v50 = vld [vmem:[%s3016_s8 + $0x30] sm:%s3495_s12] }
  0xcd   : > { %219 = vst [vmem:[%s3020_s11 + $0x10] sm:%s3495_s12] %v218_v49  ;;  %v222_v51 = vld [vmem:[%s3016_s8 + $0x48] sm:%s3495_s12] }
  0xce   : > { %221 = vst [vmem:[%s3020_s11 + $0x20] sm:%s3495_s12] %v220_v50  ;;  %v224_v52 = vld [vmem:[%s3016_s8 + $0x60] sm:%s3495_s12] }
  0xcf   : > { %223 = vst [vmem:[%s3020_s11 + $0x30] sm:%s3495_s12] %v222_v51  ;;  %v226_v53 = vld [vmem:[%s3016_s8 + $0x78] sm:%s3495_s12] }
  0xd0   : > { %225 = vst [vmem:[%s3020_s11 + $0x40] sm:%s3495_s12] %v224_v52  ;;  %v228_v54 = vld [vmem:[%s3016_s8 + $0x90] sm:%s3495_s12] }
  0xd1   : > { %227 = vst [vmem:[%s3020_s11 + $0x50] sm:%s3495_s12] %v226_v53  ;;  %v230_v55 = vld [vmem:[%s3016_s8 + $0xa8] sm:%s3495_s12] }
  0xd2   : > { %229 = vst [vmem:[%s3020_s11 + $0x60] sm:%s3495_s12] %v228_v54  ;;  %v232_v56 = vld [vmem:[%s3016_s8 + $0xc0] sm:%s3495_s12] }
  0xd3   : > { %231 = vst [vmem:[%s3020_s11 + $0x70] sm:%s3495_s12] %v230_v55  ;;  %v234_v57 = vld [vmem:[%s3016_s8 + $0xd8] sm:%s3495_s12] }
  0xd4   : > { %233 = vst [vmem:[%s3020_s11 + $0x80] sm:%s3495_s12] %v232_v56  ;;  %v236_v58 = vld [vmem:[%s3016_s8 + $0xf0] sm:%s3495_s12] }
  0xd5   : > { %235 = vst [vmem:[%s3020_s11 + $0x90] sm:%s3495_s12] %v234_v57  ;;  %v238_v59 = vld [vmem:[%s3016_s8 + $0x108] sm:%s3495_s12] }
  0xd6   : > { %237 = vst [vmem:[%s3020_s11 + $0xa0] sm:%s3495_s12] %v236_v58  ;;  %v240_v60 = vld [vmem:[%s3016_s8 + $0x120] sm:%s3495_s12] }
  0xd7   : > { %239 = vst [vmem:[%s3020_s11 + $0xb0] sm:%s3495_s12] %v238_v59  ;;  %v242_v61 = vld [vmem:[%s3016_s8 + $0x138] sm:%s3495_s12] }
  0xd8   : > { %241 = vst [vmem:[%s3020_s11 + $0xc0] sm:%s3495_s12] %v240_v60  ;;  %v244_v62 = vld [vmem:[%s3016_s8 + $0x150] sm:%s3495_s12] }
  0xd9   : > { %243 = vst [vmem:[%s3020_s11 + $0xd0] sm:%s3495_s12] %v242_v61  ;;  %v246_v63 = vld [vmem:[%s3016_s8 + $0x168] sm:%s3495_s12] }
  0xda   : > { %245 = vst [vmem:[%s3020_s11 + $0xe0] sm:%s3495_s12] %v244_v62 }
  0xdb   : > { %247 = vst [vmem:[%s3020_s11 + $0xf0] sm:%s3495_s12] %v246_v63 }
  0xdc PF: > { %580 = sbr.rel (!%p2993_p3) target bundleno = 421 (0x1a5), region = 94  ;;  %s582_s10 = sand.u32 (%p2993_p3), 1, %s2723_s16  }
  0xdd   : > { %s1972_s14 = sshll.u32 (%p2993_p3), %s2731_s18, 1  ;;  %s1971_s28 = sshll.u32 (%p2993_p3), %s582_s10, 8 }
  0xde   : > { %s586_s5 = ssub.s32 (%p2993_p3), 3, %s1972_s14  ;;  %s2041_s27 = sshll.u32 (%p2993_p3), %s2731_s18, 4 }
  0xdf   : > { %p587_p0 = scmp.lt.s32.totalorder (%p2993_p3), %s586_s5, 2  ;;  %s3569_s11 = scalar_lea.vmem (%p2993_p3), %s4445_s3, %s2041_s27  }
  0xe0   : > { %s3573_s22 = scalar_lea.vmem (%p2993_p3), [#allocation4], %s1971_s28  }
  0xe1   : > { %s4521_s5 = smov (!%p587_p0, %s586_s5), 2 }
  0xe2   : > { %s1973_s9 = sshll.u32 %s4521_s5, 7  ;;  %s3571_s7 = sshll.u32 %s4521_s5, 3 }
  0xe3   : > { %p1977_p3 = scmp.eq.s32.totalorder %s1973_s9, 0 }
  0xe4   : > { %p597_p1 = scmp.lt.u32.totalorder (!%p1977_p3), %s3571_s7, 8 }
  0xe5   : > { %596 = sbr.rel (%p1977_p3) target bundleno = 421 (0x1a5), region = 98 }
  0xea   : > { %600 = sbr.rel (%p597_p1) target bundleno = 397 (0x18d), region = 102  ;;  %s3577_s24 = sand.u32 (!%p597_p1), 7, %s3571_s7  }
  0xeb   : > { %p647_p2 = scmp.eq.s32.totalorder (!%p597_p1), %s3577_s24, 0  ;;  %p1978_p4 = scmp.ne.s32.totalorder (!%p597_p1), %s3577_s24, 0 }
  0xef   : > { %650 = sbr.rel (%p1978_p4) target bundleno = 308 (0x134), region = 117  ;;  %s651_s21 = sshrl.u32 (!%p1978_p4), %s3571_s7, 3 }
  0xf0   : > { %s3584_s13 = sshrl.u32 (!%p1978_p4), %s651_s21, 1 }
  0xf1   : > { %p1979_p5 = scmp.le.s32.totalorder (!%p1978_p4), %s3584_s13, 0 }
  0xf4   : > { %1786 = sbr.rel (%p1979_p5) target bundleno = 282 (0x11a), region = 376  ;;  %s4473_s30 = smov (!%p1979_p5), %s3573_s22 }
  0xf5   : > { %s4474_s23 = smov (!%p1979_p5), %s3569_s11  ;;  %s3593_s29 = smov (!%p1979_p5), 0  }
  0xf6   : > { %s3595_s2 = smov (!%p1979_p5), 0  }
  0xf9 LB: >> { %v662_v0 = vld [vmem:[%s2807_s23] sm:$0xff]  ;;  %v664_v1 = vld [vmem:[%s2807_s23 + $0x8] sm:$0xff]  ;;  %v666_v2 = vld [vmem:[%s2807_s23 + $0x18] sm:$0xff]  ;;  %s726_s20 = sadd.s32 1, %s2811_s29  ;;  %s656_s2 = sadd.s32 1, %s2815_s2   ;;  %s2815_s2 = sphi %s3595_s2, %s656_s2   ;;  %s2811_s29 = sphi %s3593_s29, %s4477_s29   ;;  %s2807_s23 = sphi %s4474_s23, %s4476_s23   ;;  %s2803_s30 = sphi %s4473_s30, %s4475_s30  }
  0xfa   : >> { %663 = vst [vmem:[%s2803_s30] sm:$0xff] %v662_v0  ;;  %v668_v3 = vld [vmem:[%s2807_s23 + $0x20] sm:$0xff]  ;;  %p727_p7 = scmp.ge.s32.totalorder %s726_s20, %s3584_s13  ;;  %v670_v4 = vld [vmem:[%s2807_s23 + $0x30] sm:$0xff]  ;;  %v672_v5 = vld [vmem:[%s2807_s23 + $0x38] sm:$0xff]  ;;  %p655_p8 = scmp.ge.s32.totalorder %s656_s2, %s3584_s13 }
  0xfb   : >> { %665 = vst [vmem:[%s2803_s30 + $0x8] sm:$0xff] %v664_v1  ;;  %v674_v6 = vld [vmem:[%s2807_s23 + $0x48] sm:$0xff]  ;;  %v676_v7 = vld [vmem:[%s2807_s23 + $0x50] sm:$0xff]  ;;  %v678_v8 = vld [vmem:[%s2807_s23 + $0x60] sm:$0xff] }
  0xfc   : >> { %667 = vst [vmem:[%s2803_s30 + $0x10] sm:$0xff] %v666_v2  ;;  %s4523_s20 = smov (%p727_p7, %s726_s20), 0  ;;  %v680_v9 = vld [vmem:[%s2807_s23 + $0x68] sm:$0xff]  ;;  %v682_v10 = vld [vmem:[%s2807_s23 + $0x78] sm:$0xff]  ;;  %v684_v11 = vld [vmem:[%s2807_s23 + $0x80] sm:$0xff] }
  0xfd   : >> { %669 = vst [vmem:[%s2803_s30 + $0x18] sm:$0xff] %v668_v3  ;;  %s1980_s12 = sshll.u32 %s4523_s20, 4  ;;  %v686_v12 = vld [vmem:[%s2807_s23 + $0x90] sm:$0xff]  ;;  %v688_v13 = vld [vmem:[%s2807_s23 + $0x98] sm:$0xff]  ;;  %v690_v14 = vld [vmem:[%s2807_s23 + $0xa8] sm:$0xff]  ;;  %s4477_s29 = smov %s4523_s20 }
  0xfe   : >> { %671 = vst [vmem:[%s2803_s30 + $0x20] sm:$0xff] %v670_v4  ;;  %s3627_s10 = scalar_lea.vmem %s3569_s11, %s1980_s12   ;;  %s3630_s14 = scalar_lea.vmem %s3573_s22, %s1980_s12 [#allocation4]   ;;  %v692_v15 = vld [vmem:[%s2807_s23 + $0xb0] sm:$0xff]  ;;  %v694_v16 = vld [vmem:[%s2807_s23 + $0xc0] sm:$0xff]  ;;  %v696_v17 = vld [vmem:[%s2807_s23 + $0xc8] sm:$0xff] }
  0xff   : >> { %673 = vst [vmem:[%s2803_s30 + $0x28] sm:$0xff] %v672_v5  ;;  %v698_v18 = vld [vmem:[%s2807_s23 + $0xd8] sm:$0xff]  ;;  %v700_v19 = vld [vmem:[%s2807_s23 + $0xe0] sm:$0xff]  ;;  %v702_v20 = vld [vmem:[%s2807_s23 + $0xf0] sm:$0xff] }
 0x100   : >> { %675 = vst [vmem:[%s2803_s30 + $0x30] sm:$0xff] %v674_v6  ;;  %v704_v21 = vld [vmem:[%s2807_s23 + $0xf8] sm:$0xff]  ;;  %v706_v22 = vld [vmem:[%s2807_s23 + $0x108] sm:$0xff]  ;;  %v708_v23 = vld [vmem:[%s2807_s23 + $0x110] sm:$0xff] }
 0x101   : >> { %677 = vst [vmem:[%s2803_s30 + $0x38] sm:$0xff] %v676_v7  ;;  %v710_v24 = vld [vmem:[%s2807_s23 + $0x120] sm:$0xff]  ;;  %v712_v25 = vld [vmem:[%s2807_s23 + $0x128] sm:$0xff]  ;;  %v714_v26 = vld [vmem:[%s2807_s23 + $0x138] sm:$0xff] }
 0x102   : >> { %679 = vst [vmem:[%s2803_s30 + $0x40] sm:$0xff] %v678_v8  ;;  %v716_v27 = vld [vmem:[%s2807_s23 + $0x140] sm:$0xff]  ;;  %v718_v28 = vld [vmem:[%s2807_s23 + $0x150] sm:$0xff]  ;;  %v720_v29 = vld [vmem:[%s2807_s23 + $0x158] sm:$0xff] }
 0x103   : >> { %681 = vst [vmem:[%s2803_s30 + $0x48] sm:$0xff] %v680_v9  ;;  %v722_v30 = vld [vmem:[%s2807_s23 + $0x168] sm:$0xff]  ;;  %v724_v31 = vld [vmem:[%s2807_s23 + $0x170] sm:$0xff]  ;;  %s4476_s23 = smov %s3627_s10 }
 0x104   : >> { %683 = vst [vmem:[%s2803_s30 + $0x50] sm:$0xff] %v682_v10 }
 0x105   : >> { %685 = vst [vmem:[%s2803_s30 + $0x58] sm:$0xff] %v684_v11 }
 0x106   : >> { %687 = vst [vmem:[%s2803_s30 + $0x60] sm:$0xff] %v686_v12 }
 0x107   : >> { %689 = vst [vmem:[%s2803_s30 + $0x68] sm:$0xff] %v688_v13 }
 0x108   : >> { %691 = vst [vmem:[%s2803_s30 + $0x70] sm:$0xff] %v690_v14 }
 0x109   : >> { %693 = vst [vmem:[%s2803_s30 + $0x78] sm:$0xff] %v692_v15 }
 0x10a   : >> { %695 = vst [vmem:[%s2803_s30 + $0x80] sm:$0xff] %v694_v16 }
 0x10b   : >> { %697 = vst [vmem:[%s2803_s30 + $0x88] sm:$0xff] %v696_v17 }
 0x10c   : >> { %699 = vst [vmem:[%s2803_s30 + $0x90] sm:$0xff] %v698_v18 }
 0x10d   : >> { %701 = vst [vmem:[%s2803_s30 + $0x98] sm:$0xff] %v700_v19 }
 0x10e   : >> { %703 = vst [vmem:[%s2803_s30 + $0xa0] sm:$0xff] %v702_v20 }
 0x10f   : >> { %705 = vst [vmem:[%s2803_s30 + $0xa8] sm:$0xff] %v704_v21 }
 0x110   : >> { %707 = vst [vmem:[%s2803_s30 + $0xb0] sm:$0xff] %v706_v22 }
 0x111   : >> { %709 = vst [vmem:[%s2803_s30 + $0xb8] sm:$0xff] %v708_v23 }
 0x112   : >> { %711 = vst [vmem:[%s2803_s30 + $0xc0] sm:$0xff] %v710_v24 }
 0x113   : >> { %713 = vst [vmem:[%s2803_s30 + $0xc8] sm:$0xff] %v712_v25 }
 0x114   : >> { %715 = vst [vmem:[%s2803_s30 + $0xd0] sm:$0xff] %v714_v26 }
 0x115   : >> { %717 = vst [vmem:[%s2803_s30 + $0xd8] sm:$0xff] %v716_v27  ;;  %658 = sbr.rel (!%p655_p8) target bundleno = 249 (0xf9), region = 382 }
 0x116   : >> { %719 = vst [vmem:[%s2803_s30 + $0xe0] sm:$0xff] %v718_v28 }
 0x117   : >> { %721 = vst [vmem:[%s2803_s30 + $0xe8] sm:$0xff] %v720_v29 }
 0x118   : >> { %723 = vst [vmem:[%s2803_s30 + $0xf0] sm:$0xff] %v722_v30 }
 0x119   : >> { %725 = vst [vmem:[%s2803_s30 + $0xf8] sm:$0xff] %v724_v31  ;;  %s4475_s30 = smov %s3630_s14 }
 0x11a PF: > { %s3696_s28 = sand.u32 1, %s651_s21   ;;  %s2042_s5 = sshll.u32 %s3584_s13, 4 }
 0x11b   : > { %s3700_s27 = scalar_lea.vmem %s3569_s11, %s2042_s5   ;;  %s3703_s6 = scalar_lea.vmem %s3573_s22, %s2042_s5 [#allocation4]  }
 0x11c   : > { %p1985_p9 = scmp.le.s32.totalorder %s3696_s28, 0 }
 0x11d   : > { %s4478_s8 = smov (!%p1985_p9), %s3703_s6  ;;  %s4479_s9 = smov (!%p1985_p9), %s3700_s27 }
 0x11e   : > { %1800 = sbr.rel (%p1985_p9) target bundleno = 308 (0x134), region = 387  ;;  %s3712_s30 = smov (!%p1985_p9), 0  }
 0x11f   : > { %s3714_s23 = smov (!%p1985_p9), 0  }
 0x123 LB: >> { %v749_v32 = vld [vmem:[%s2823_s9] sm:$0xff]  ;;  %v751_v33 = vld [vmem:[%s2823_s9 + $0x18] sm:$0xff]  ;;  %v753_v34 = vld [vmem:[%s2823_s9 + $0x30] sm:$0xff]  ;;  %s781_s21 = sadd.s32 1, %s2827_s30  ;;  %s743_s23 = sadd.s32 1, %s2831_s23   ;;  %s2831_s23 = sphi %s3714_s23, %s743_s23   ;;  %s2827_s30 = sphi %s3712_s30, %s4482_s30   ;;  %s2823_s9 = sphi %s4479_s9, %s4481_s9   ;;  %s2819_s8 = sphi %s4478_s8, %s4480_s8  }
 0x124   : >> { %750 = vst [vmem:[%s2819_s8] sm:$0xff] %v749_v32  ;;  %v755_v35 = vld [vmem:[%s2823_s9 + $0x48] sm:$0xff]  ;;  %p782_p10 = scmp.ge.s32.totalorder %s781_s21, %s3696_s28  ;;  %v757_v36 = vld [vmem:[%s2823_s9 + $0x60] sm:$0xff]  ;;  %v759_v37 = vld [vmem:[%s2823_s9 + $0x78] sm:$0xff]  ;;  %p742_p11 = scmp.ge.s32.totalorder %s743_s23, %s3696_s28 }
 0x125   : >> { %752 = vst [vmem:[%s2819_s8 + $0x10] sm:$0xff] %v751_v33  ;;  %v761_v38 = vld [vmem:[%s2823_s9 + $0x90] sm:$0xff]  ;;  %v763_v39 = vld [vmem:[%s2823_s9 + $0xa8] sm:$0xff]  ;;  %v765_v40 = vld [vmem:[%s2823_s9 + $0xc0] sm:$0xff] }
 0x126   : >> { %754 = vst [vmem:[%s2819_s8 + $0x20] sm:$0xff] %v753_v34  ;;  %s4525_s21 = smov (%p782_p10, %s781_s21), 0  ;;  %v767_v41 = vld [vmem:[%s2823_s9 + $0xd8] sm:$0xff]  ;;  %v769_v42 = vld [vmem:[%s2823_s9 + $0xf0] sm:$0xff]  ;;  %v771_v43 = vld [vmem:[%s2823_s9 + $0x108] sm:$0xff] }
 0x127   : >> { %756 = vst [vmem:[%s2819_s8 + $0x30] sm:$0xff] %v755_v35  ;;  %s1986_s13 = sshll.u32 %s4525_s21, 3  ;;  %v773_v44 = vld [vmem:[%s2823_s9 + $0x120] sm:$0xff]  ;;  %v775_v45 = vld [vmem:[%s2823_s9 + $0x138] sm:$0xff]  ;;  %v777_v46 = vld [vmem:[%s2823_s9 + $0x150] sm:$0xff]  ;;  %s4482_s30 = smov %s4525_s21 }
 0x128   : >> { %758 = vst [vmem:[%s2819_s8 + $0x40] sm:$0xff] %v757_v36  ;;  %s786_s29 = scalar_lea.vmem %s3700_s27, %s1986_s13   ;;  %s787_s2 = scalar_lea.vmem %s3703_s6, %s1986_s13 [#allocation4]   ;;  %v779_v47 = vld [vmem:[%s2823_s9 + $0x168] sm:$0xff] }
 0x129   : >> { %760 = vst [vmem:[%s2819_s8 + $0x50] sm:$0xff] %v759_v37  ;;  %s4481_s9 = smov %s786_s29 }
 0x12a   : >> { %762 = vst [vmem:[%s2819_s8 + $0x60] sm:$0xff] %v761_v38 }
 0x12b   : >> { %764 = vst [vmem:[%s2819_s8 + $0x70] sm:$0xff] %v763_v39 }
 0x12c   : >> { %766 = vst [vmem:[%s2819_s8 + $0x80] sm:$0xff] %v765_v40 }
 0x12d   : >> { %768 = vst [vmem:[%s2819_s8 + $0x90] sm:$0xff] %v767_v41 }
 0x12e   : >> { %770 = vst [vmem:[%s2819_s8 + $0xa0] sm:$0xff] %v769_v42 }
 0x12f   : >> { %772 = vst [vmem:[%s2819_s8 + $0xb0] sm:$0xff] %v771_v43  ;;  %745 = sbr.rel (!%p742_p11) target bundleno = 291 (0x123), region = 393 }
 0x130   : >> { %774 = vst [vmem:[%s2819_s8 + $0xc0] sm:$0xff] %v773_v44 }
 0x131   : >> { %776 = vst [vmem:[%s2819_s8 + $0xd0] sm:$0xff] %v775_v45 }
 0x132   : >> { %778 = vst [vmem:[%s2819_s8 + $0xe0] sm:$0xff] %v777_v46 }
 0x133   : >> { %780 = vst [vmem:[%s2819_s8 + $0xf0] sm:$0xff] %v779_v47  ;;  %s4480_s8 = smov %s787_s2 }
 0x134 PF: > { %790 = sbr.rel (%p647_p2) target bundleno = 397 (0x18d), region = 135  ;;  %s792_s20 = ssub.s32 (!%p647_p2), %s3571_s7, %s3577_s24 }
 0x135   : > { %s796_s12 = sshrl.u32 (!%p647_p2), %s3571_s7, 3  ;;  %s3781_s10 = scalar_lea.vmem (!%p647_p2), %s3569_s11, %s792_s20 }
 0x136   : > { %s3784_s14 = scalar_lea.vmem (!%p647_p2), %s3573_s22, %s792_s20 [#allocation4]  ;;  %s3788_s5 = sshrl.u32 (!%p647_p2), %s796_s12, 1 }
 0x137   : > { %p1988_p12 = scmp.le.s32.totalorder (!%p647_p2), %s3788_s5, 0 }
 0x139   : > { %1814 = sbr.rel (%p1988_p12) target bundleno = 351 (0x15f), region = 398  ;;  %s4483_s28 = smov (!%p1988_p12), %s3573_s22 }
 0x13a   : > { %s4484_s27 = smov (!%p1988_p12), %s3569_s11  ;;  %s3797_s6 = smov (!%p1988_p12), 0  }
 0x13b   : > { %s3799_s8 = smov (!%p1988_p12), 0  }
 0x13e LB: >> { %v807_v48 = vld [vmem:[%s2839_s27] sm:$0xff]  ;;  %v809_v49 = vld [vmem:[%s2839_s27 + $0x8] sm:$0xff]  ;;  %v811_v50 = vld [vmem:[%s2839_s27 + $0x18] sm:$0xff]  ;;  %s871_s9 = sadd.s32 1, %s2843_s6  ;;  %s801_s8 = sadd.s32 1, %s2847_s8   ;;  %s2847_s8 = sphi %s3799_s8, %s801_s8   ;;  %s2843_s6 = sphi %s3797_s6, %s4487_s6   ;;  %s2839_s27 = sphi %s4484_s27, %s4486_s27   ;;  %s2835_s28 = sphi %s4483_s28, %s4485_s28  }
 0x13f   : >> { %808 = vst [vmem:[%s2835_s28] sm:$0xff] %v807_v48  ;;  %v813_v51 = vld [vmem:[%s2839_s27 + $0x20] sm:$0xff]  ;;  %p872_p13 = scmp.ge.s32.totalorder %s871_s9, %s3788_s5  ;;  %v815_v52 = vld [vmem:[%s2839_s27 + $0x30] sm:$0xff]  ;;  %v817_v53 = vld [vmem:[%s2839_s27 + $0x38] sm:$0xff]  ;;  %p800_p0 = scmp.ge.s32.totalorder %s801_s8, %s3788_s5 }
 0x140   : >> { %810 = vst [vmem:[%s2835_s28 + $0x8] sm:$0xff] %v809_v49  ;;  %v819_v54 = vld [vmem:[%s2839_s27 + $0x48] sm:$0xff]  ;;  %v821_v55 = vld [vmem:[%s2839_s27 + $0x50] sm:$0xff]  ;;  %v823_v56 = vld [vmem:[%s2839_s27 + $0x60] sm:$0xff] }
 0x141   : >> { %812 = vst [vmem:[%s2835_s28 + $0x10] sm:$0xff] %v811_v50  ;;  %s4527_s9 = smov (%p872_p13, %s871_s9), 0  ;;  %v825_v57 = vld [vmem:[%s2839_s27 + $0x68] sm:$0xff]  ;;  %v827_v58 = vld [vmem:[%s2839_s27 + $0x78] sm:$0xff]  ;;  %v829_v59 = vld [vmem:[%s2839_s27 + $0x80] sm:$0xff] }
 0x142   : >> { %814 = vst [vmem:[%s2835_s28 + $0x18] sm:$0xff] %v813_v51  ;;  %s1989_s30 = sshll.u32 %s4527_s9, 4  ;;  %v831_v60 = vld [vmem:[%s2839_s27 + $0x90] sm:$0xff]  ;;  %v833_v61 = vld [vmem:[%s2839_s27 + $0x98] sm:$0xff]  ;;  %v835_v62 = vld [vmem:[%s2839_s27 + $0xa8] sm:$0xff]  ;;  %s4487_s6 = smov %s4527_s9 }
 0x143   : >> { %816 = vst [vmem:[%s2835_s28 + $0x20] sm:$0xff] %v815_v52  ;;  %s3831_s23 = scalar_lea.vmem %s3569_s11, %s1989_s30   ;;  %s3834_s21 = scalar_lea.vmem %s3573_s22, %s1989_s30 [#allocation4]   ;;  %v837_v63 = vld [vmem:[%s2839_s27 + $0xb0] sm:$0xff]  ;;  %v839_v0 = vld [vmem:[%s2839_s27 + $0xc0] sm:$0xff]  ;;  %v841_v1 = vld [vmem:[%s2839_s27 + $0xc8] sm:$0xff] }
 0x144   : >> { %818 = vst [vmem:[%s2835_s28 + $0x28] sm:$0xff] %v817_v53  ;;  %v843_v2 = vld [vmem:[%s2839_s27 + $0xd8] sm:$0xff]  ;;  %v845_v3 = vld [vmem:[%s2839_s27 + $0xe0] sm:$0xff]  ;;  %v847_v4 = vld [vmem:[%s2839_s27 + $0xf0] sm:$0xff] }
 0x145   : >> { %820 = vst [vmem:[%s2835_s28 + $0x30] sm:$0xff] %v819_v54  ;;  %v849_v5 = vld [vmem:[%s2839_s27 + $0xf8] sm:$0xff]  ;;  %v851_v6 = vld [vmem:[%s2839_s27 + $0x108] sm:$0xff]  ;;  %v853_v7 = vld [vmem:[%s2839_s27 + $0x110] sm:$0xff] }
 0x146   : >> { %822 = vst [vmem:[%s2835_s28 + $0x38] sm:$0xff] %v821_v55  ;;  %v855_v8 = vld [vmem:[%s2839_s27 + $0x120] sm:$0xff]  ;;  %v857_v9 = vld [vmem:[%s2839_s27 + $0x128] sm:$0xff]  ;;  %v859_v10 = vld [vmem:[%s2839_s27 + $0x138] sm:$0xff] }
 0x147   : >> { %824 = vst [vmem:[%s2835_s28 + $0x40] sm:$0xff] %v823_v56  ;;  %v861_v11 = vld [vmem:[%s2839_s27 + $0x140] sm:$0xff]  ;;  %v863_v12 = vld [vmem:[%s2839_s27 + $0x150] sm:$0xff]  ;;  %v865_v13 = vld [vmem:[%s2839_s27 + $0x158] sm:$0xff] }
 0x148   : >> { %826 = vst [vmem:[%s2835_s28 + $0x48] sm:$0xff] %v825_v57  ;;  %v867_v14 = vld [vmem:[%s2839_s27 + $0x168] sm:$0xff]  ;;  %v869_v15 = vld [vmem:[%s2839_s27 + $0x170] sm:$0xff]  ;;  %s4486_s27 = smov %s3831_s23 }
 0x149   : >> { %828 = vst [vmem:[%s2835_s28 + $0x50] sm:$0xff] %v827_v58 }
 0x14a   : >> { %830 = vst [vmem:[%s2835_s28 + $0x58] sm:$0xff] %v829_v59 }
 0x14b   : >> { %832 = vst [vmem:[%s2835_s28 + $0x60] sm:$0xff] %v831_v60 }
 0x14c   : >> { %834 = vst [vmem:[%s2835_s28 + $0x68] sm:$0xff] %v833_v61 }
 0x14d   : >> { %836 = vst [vmem:[%s2835_s28 + $0x70] sm:$0xff] %v835_v62 }
 0x14e   : >> { %838 = vst [vmem:[%s2835_s28 + $0x78] sm:$0xff] %v837_v63 }
 0x14f   : >> { %840 = vst [vmem:[%s2835_s28 + $0x80] sm:$0xff] %v839_v0 }
 0x150   : >> { %842 = vst [vmem:[%s2835_s28 + $0x88] sm:$0xff] %v841_v1 }
 0x151   : >> { %844 = vst [vmem:[%s2835_s28 + $0x90] sm:$0xff] %v843_v2 }
 0x152   : >> { %846 = vst [vmem:[%s2835_s28 + $0x98] sm:$0xff] %v845_v3 }
 0x153   : >> { %848 = vst [vmem:[%s2835_s28 + $0xa0] sm:$0xff] %v847_v4 }
 0x154   : >> { %850 = vst [vmem:[%s2835_s28 + $0xa8] sm:$0xff] %v849_v5 }
 0x155   : >> { %852 = vst [vmem:[%s2835_s28 + $0xb0] sm:$0xff] %v851_v6 }
 0x156   : >> { %854 = vst [vmem:[%s2835_s28 + $0xb8] sm:$0xff] %v853_v7 }
 0x157   : >> { %856 = vst [vmem:[%s2835_s28 + $0xc0] sm:$0xff] %v855_v8 }
 0x158   : >> { %858 = vst [vmem:[%s2835_s28 + $0xc8] sm:$0xff] %v857_v9 }
 0x159   : >> { %860 = vst [vmem:[%s2835_s28 + $0xd0] sm:$0xff] %v859_v10 }
 0x15a   : >> { %862 = vst [vmem:[%s2835_s28 + $0xd8] sm:$0xff] %v861_v11  ;;  %803 = sbr.rel (!%p800_p0) target bundleno = 318 (0x13e), region = 404 }
 0x15b   : >> { %864 = vst [vmem:[%s2835_s28 + $0xe0] sm:$0xff] %v863_v12 }
 0x15c   : >> { %866 = vst [vmem:[%s2835_s28 + $0xe8] sm:$0xff] %v865_v13 }
 0x15d   : >> { %868 = vst [vmem:[%s2835_s28 + $0xf0] sm:$0xff] %v867_v14 }
 0x15e   : >> { %870 = vst [vmem:[%s2835_s28 + $0xf8] sm:$0xff] %v869_v15  ;;  %s4485_s28 = smov %s3834_s21 }
 0x15f PF: > { %s3900_s13 = sand.u32 1, %s796_s12   ;;  %s2044_s29 = sshll.u32 %s3788_s5, 4 }
 0x160   : > { %s3904_s2 = scalar_lea.vmem %s3569_s11, %s2044_s29   ;;  %s3907_s20 = scalar_lea.vmem %s3573_s22, %s2044_s29 [#allocation4]  }
 0x161   : > { %p1994_p3 = scmp.le.s32.totalorder %s3900_s13, 0 }
 0x162   : > { %s4488_s8 = smov (!%p1994_p3), %s3907_s20  ;;  %s4489_s28 = smov (!%p1994_p3), %s3904_s2 }
 0x163   : > { %1828 = sbr.rel (%p1994_p3) target bundleno = 377 (0x179), region = 409  ;;  %s3916_s27 = smov (!%p1994_p3), 0  }
 0x164   : > { %s3918_s6 = smov (!%p1994_p3), 0  }
 0x168 LB: >> { %v894_v16 = vld [vmem:[%s2855_s28] sm:$0xff]  ;;  %v896_v17 = vld [vmem:[%s2855_s28 + $0x18] sm:$0xff]  ;;  %v898_v18 = vld [vmem:[%s2855_s28 + $0x30] sm:$0xff]  ;;  %s926_s12 = sadd.s32 1, %s2859_s27  ;;  %s888_s6 = sadd.s32 1, %s2863_s6   ;;  %s2863_s6 = sphi %s3918_s6, %s888_s6   ;;  %s2859_s27 = sphi %s3916_s27, %s4492_s27   ;;  %s2855_s28 = sphi %s4489_s28, %s4491_s28   ;;  %s2851_s8 = sphi %s4488_s8, %s4490_s8  }
 0x169   : >> { %895 = vst [vmem:[%s2851_s8] sm:$0xff] %v894_v16  ;;  %v900_v19 = vld [vmem:[%s2855_s28 + $0x48] sm:$0xff]  ;;  %p927_p1 = scmp.ge.s32.totalorder %s926_s12, %s3900_s13  ;;  %v902_v20 = vld [vmem:[%s2855_s28 + $0x60] sm:$0xff]  ;;  %v904_v21 = vld [vmem:[%s2855_s28 + $0x78] sm:$0xff]  ;;  %p887_p2 = scmp.ge.s32.totalorder %s888_s6, %s3900_s13 }
 0x16a   : >> { %897 = vst [vmem:[%s2851_s8 + $0x10] sm:$0xff] %v896_v17  ;;  %v906_v22 = vld [vmem:[%s2855_s28 + $0x90] sm:$0xff]  ;;  %v908_v23 = vld [vmem:[%s2855_s28 + $0xa8] sm:$0xff]  ;;  %v910_v24 = vld [vmem:[%s2855_s28 + $0xc0] sm:$0xff] }
 0x16b   : >> { %899 = vst [vmem:[%s2851_s8 + $0x20] sm:$0xff] %v898_v18  ;;  %s4529_s12 = smov (%p927_p1, %s926_s12), 0  ;;  %v912_v25 = vld [vmem:[%s2855_s28 + $0xd8] sm:$0xff]  ;;  %v914_v26 = vld [vmem:[%s2855_s28 + $0xf0] sm:$0xff]  ;;  %v916_v27 = vld [vmem:[%s2855_s28 + $0x108] sm:$0xff] }
 0x16c   : >> { %901 = vst [vmem:[%s2851_s8 + $0x30] sm:$0xff] %v900_v19  ;;  %s1995_s5 = sshll.u32 %s4529_s12, 3  ;;  %v918_v28 = vld [vmem:[%s2855_s28 + $0x120] sm:$0xff]  ;;  %v920_v29 = vld [vmem:[%s2855_s28 + $0x138] sm:$0xff]  ;;  %v922_v30 = vld [vmem:[%s2855_s28 + $0x150] sm:$0xff]  ;;  %s4492_s27 = smov %s4529_s12 }
 0x16d   : >> { %903 = vst [vmem:[%s2851_s8 + $0x40] sm:$0xff] %v902_v20  ;;  %s931_s9 = scalar_lea.vmem %s3904_s2, %s1995_s5   ;;  %s932_s30 = scalar_lea.vmem %s3907_s20, %s1995_s5 [#allocation4]   ;;  %v924_v31 = vld [vmem:[%s2855_s28 + $0x168] sm:$0xff] }
 0x16e   : >> { %905 = vst [vmem:[%s2851_s8 + $0x50] sm:$0xff] %v904_v21  ;;  %s4491_s28 = smov %s931_s9 }
 0x16f   : >> { %907 = vst [vmem:[%s2851_s8 + $0x60] sm:$0xff] %v906_v22 }
 0x170   : >> { %909 = vst [vmem:[%s2851_s8 + $0x70] sm:$0xff] %v908_v23 }
 0x171   : >> { %911 = vst [vmem:[%s2851_s8 + $0x80] sm:$0xff] %v910_v24 }
 0x172   : >> { %913 = vst [vmem:[%s2851_s8 + $0x90] sm:$0xff] %v912_v25 }
 0x173   : >> { %915 = vst [vmem:[%s2851_s8 + $0xa0] sm:$0xff] %v914_v26 }
 0x174   : >> { %917 = vst [vmem:[%s2851_s8 + $0xb0] sm:$0xff] %v916_v27  ;;  %890 = sbr.rel (!%p887_p2) target bundleno = 360 (0x168), region = 415 }
 0x175   : >> { %919 = vst [vmem:[%s2851_s8 + $0xc0] sm:$0xff] %v918_v28 }
 0x176   : >> { %921 = vst [vmem:[%s2851_s8 + $0xd0] sm:$0xff] %v920_v29 }
 0x177   : >> { %923 = vst [vmem:[%s2851_s8 + $0xe0] sm:$0xff] %v922_v30 }
 0x178   : >> { %925 = vst [vmem:[%s2851_s8 + $0xf0] sm:$0xff] %v924_v31  ;;  %s4490_s8 = smov %s932_s30 }
 0x179 PF: > { %s2931_s23 = smov 1  }
 0x17a   : > { %s933_s21 = sshll.u32 %s2931_s23, %s3577_s24 }
 0x17b   : > { %s3980_s29 = sadd.s32 4294967295, %s933_s21 }
 0x17c   : > { %v943_v32 = vld [vmem:[%s3781_s10] sm:%s3980_s29]  ;;  %v945_v33 = vld [vmem:[%s3781_s10 + $0x18] sm:%s3980_s29] }
 0x17d   : > { %944 = vst [vmem:[%s3784_s14] sm:%s3980_s29] %v943_v32  ;;  %v947_v34 = vld [vmem:[%s3781_s10 + $0x30] sm:%s3980_s29] }
 0x17e   : > { %946 = vst [vmem:[%s3784_s14 + $0x10] sm:%s3980_s29] %v945_v33  ;;  %v949_v35 = vld [vmem:[%s3781_s10 + $0x48] sm:%s3980_s29] }
 0x17f   : > { %948 = vst [vmem:[%s3784_s14 + $0x20] sm:%s3980_s29] %v947_v34  ;;  %v951_v36 = vld [vmem:[%s3781_s10 + $0x60] sm:%s3980_s29] }
 0x180   : > { %950 = vst [vmem:[%s3784_s14 + $0x30] sm:%s3980_s29] %v949_v35  ;;  %v953_v37 = vld [vmem:[%s3781_s10 + $0x78] sm:%s3980_s29] }
 0x181   : > { %952 = vst [vmem:[%s3784_s14 + $0x40] sm:%s3980_s29] %v951_v36  ;;  %v955_v38 = vld [vmem:[%s3781_s10 + $0x90] sm:%s3980_s29] }
 0x182   : > { %954 = vst [vmem:[%s3784_s14 + $0x50] sm:%s3980_s29] %v953_v37  ;;  %v957_v39 = vld [vmem:[%s3781_s10 + $0xa8] sm:%s3980_s29] }
 0x183   : > { %956 = vst [vmem:[%s3784_s14 + $0x60] sm:%s3980_s29] %v955_v38  ;;  %v959_v40 = vld [vmem:[%s3781_s10 + $0xc0] sm:%s3980_s29] }
 0x184   : > { %958 = vst [vmem:[%s3784_s14 + $0x70] sm:%s3980_s29] %v957_v39  ;;  %v961_v41 = vld [vmem:[%s3781_s10 + $0xd8] sm:%s3980_s29] }
 0x185   : > { %960 = vst [vmem:[%s3784_s14 + $0x80] sm:%s3980_s29] %v959_v40  ;;  %v963_v42 = vld [vmem:[%s3781_s10 + $0xf0] sm:%s3980_s29] }
 0x186   : > { %962 = vst [vmem:[%s3784_s14 + $0x90] sm:%s3980_s29] %v961_v41  ;;  %v965_v43 = vld [vmem:[%s3781_s10 + $0x108] sm:%s3980_s29] }
 0x187   : > { %964 = vst [vmem:[%s3784_s14 + $0xa0] sm:%s3980_s29] %v963_v42  ;;  %v967_v44 = vld [vmem:[%s3781_s10 + $0x120] sm:%s3980_s29] }
 0x188   : > { %966 = vst [vmem:[%s3784_s14 + $0xb0] sm:%s3980_s29] %v965_v43  ;;  %v969_v45 = vld [vmem:[%s3781_s10 + $0x138] sm:%s3980_s29] }
 0x189   : > { %968 = vst [vmem:[%s3784_s14 + $0xc0] sm:%s3980_s29] %v967_v44  ;;  %v971_v46 = vld [vmem:[%s3781_s10 + $0x150] sm:%s3980_s29] }
 0x18a   : > { %970 = vst [vmem:[%s3784_s14 + $0xd0] sm:%s3980_s29] %v969_v45  ;;  %v973_v47 = vld [vmem:[%s3781_s10 + $0x168] sm:%s3980_s29] }
 0x18b   : > { %972 = vst [vmem:[%s3784_s14 + $0xe0] sm:%s3980_s29] %v971_v46 }
 0x18c   : > { %974 = vst [vmem:[%s3784_s14 + $0xf0] sm:%s3980_s29] %v973_v47 }
 0x18d PF: > { %p1998_p4 = scmp.ge.u32.totalorder %s3571_s7, 8 }
 0x18e   : > { %s2932_s24 = smov (!%p1998_p4), 1  }
 0x18f   : > { %603 = sbr.rel (%p1998_p4) target bundleno = 421 (0x1a5), region = 106  ;;  %s604_s10 = sshll.u32 (!%p1998_p4), %s2932_s24, %s3571_s7 }
 0x190   : > { %s4048_s14 = sadd.s32 (!%p1998_p4), 4294967295, %s604_s10 }
 0x194   : > { %v614_v48 = vld [vmem:[%s3569_s11] sm:%s4048_s14]  ;;  %v616_v49 = vld [vmem:[%s3569_s11 + $0x18] sm:%s4048_s14] }
 0x195   : > { %615 = vst [vmem:[%s3573_s22] sm:%s4048_s14] %v614_v48  ;;  %v618_v50 = vld [vmem:[%s3569_s11 + $0x30] sm:%s4048_s14] }
 0x196   : > { %617 = vst [vmem:[%s3573_s22 + $0x10] sm:%s4048_s14] %v616_v49  ;;  %v620_v51 = vld [vmem:[%s3569_s11 + $0x48] sm:%s4048_s14] }
 0x197   : > { %619 = vst [vmem:[%s3573_s22 + $0x20] sm:%s4048_s14] %v618_v50  ;;  %v622_v52 = vld [vmem:[%s3569_s11 + $0x60] sm:%s4048_s14] }
 0x198   : > { %621 = vst [vmem:[%s3573_s22 + $0x30] sm:%s4048_s14] %v620_v51  ;;  %v624_v53 = vld [vmem:[%s3569_s11 + $0x78] sm:%s4048_s14] }
 0x199   : > { %623 = vst [vmem:[%s3573_s22 + $0x40] sm:%s4048_s14] %v622_v52  ;;  %v626_v54 = vld [vmem:[%s3569_s11 + $0x90] sm:%s4048_s14] }
 0x19a   : > { %625 = vst [vmem:[%s3573_s22 + $0x50] sm:%s4048_s14] %v624_v53  ;;  %v628_v55 = vld [vmem:[%s3569_s11 + $0xa8] sm:%s4048_s14] }
 0x19b   : > { %627 = vst [vmem:[%s3573_s22 + $0x60] sm:%s4048_s14] %v626_v54  ;;  %v630_v56 = vld [vmem:[%s3569_s11 + $0xc0] sm:%s4048_s14] }
 0x19c   : > { %629 = vst [vmem:[%s3573_s22 + $0x70] sm:%s4048_s14] %v628_v55  ;;  %v632_v57 = vld [vmem:[%s3569_s11 + $0xd8] sm:%s4048_s14] }
 0x19d   : > { %631 = vst [vmem:[%s3573_s22 + $0x80] sm:%s4048_s14] %v630_v56  ;;  %v634_v58 = vld [vmem:[%s3569_s11 + $0xf0] sm:%s4048_s14] }
 0x19e   : > { %633 = vst [vmem:[%s3573_s22 + $0x90] sm:%s4048_s14] %v632_v57  ;;  %v636_v59 = vld [vmem:[%s3569_s11 + $0x108] sm:%s4048_s14] }
 0x19f   : > { %635 = vst [vmem:[%s3573_s22 + $0xa0] sm:%s4048_s14] %v634_v58  ;;  %v638_v60 = vld [vmem:[%s3569_s11 + $0x120] sm:%s4048_s14] }
 0x1a0   : > { %637 = vst [vmem:[%s3573_s22 + $0xb0] sm:%s4048_s14] %v636_v59  ;;  %v640_v61 = vld [vmem:[%s3569_s11 + $0x138] sm:%s4048_s14] }
 0x1a1   : > { %639 = vst [vmem:[%s3573_s22 + $0xc0] sm:%s4048_s14] %v638_v60  ;;  %v642_v62 = vld [vmem:[%s3569_s11 + $0x150] sm:%s4048_s14] }
 0x1a2   : > { %641 = vst [vmem:[%s3573_s22 + $0xd0] sm:%s4048_s14] %v640_v61  ;;  %v644_v63 = vld [vmem:[%s3569_s11 + $0x168] sm:%s4048_s14] }
 0x1a3   : > { %643 = vst [vmem:[%s3573_s22 + $0xe0] sm:%s4048_s14] %v642_v62 }
 0x1a4   : > { %645 = vst [vmem:[%s3573_s22 + $0xf0] sm:%s4048_s14] %v644_v63 }
 0x1a5 PF: > { %p2000_p5 = scmp.ge.s32.totalorder %s2735_s19, 1  ;;  %p977_p7 = scmp.lt.s32.totalorder %s2735_s19, 3 }
 0x1a7   : > { %p978_p8 = pnand %p2000_p5, %p977_p7 }
 0x1a8   : > { %s984_s7 = sand.u32 (!%p978_p8), 1, %s2719_s15   ;;  %p2004_p9 = scmp.ne.s32.totalorder (!%p978_p8), %s2727_s17, 0 }
 0x1a9   : > { %981 = sbr.rel (%p978_p8) target bundleno = 907 (0x38b), region = 160  ;;  %s2001_s13 = sshll.u32 (!%p978_p8), %s984_s7, 8 }
 0x1aa   : > { %s2003_s2 = sshll.u32 (!%p978_p8), %s984_s7, 5  ;;  %s4117_s20 = scalar_lea.vmem (!%p978_p8), [#allocation3], %s2001_s13 }
 0x1ab   : > { %s4119_s8 = scalar_lea.vmem (!%p978_p8), [#allocation4], %s2001_s13  ;;  %s4121_s11 = scalar_lea.vmem (!%p978_p8), [#allocation5], %s2003_s2  }
 0x1ae   : > { %1049 = sbr.rel (%p2004_p9) target bundleno = 589 (0x24d), region = 172 }
 0x1b3   : > { %v1050_v0 = vld [vmem:[%s4442_s0] sm:$0xff]  ;;  %v1051_v2 = vld [vmem:[%s4442_s0 + $0x8] sm:$0xff]  ;;  %v2933_v4 = vmov 128.0  }
 0x1b4   : > { %v1052_v1 = vmul.f32 %v1050_v0, %v1050_v0  ;;  %v1053_v3 = vmul.f32 %v1051_v2, %v1051_v2  ;;  %2483 = vrcp.f32 %v2933_v4  ;;  %v2482_v25 = vld [vmem:[%s4443_s1] ss:$0 sm:$0xff] }
 0x1b6   : > { %1054 = vadd.xlane.f32.xlu0 %v1052_v1 }
 0x1ba   : > { %v2484_v5 = vpop.eup %2483 }
 0x1bb   : > { %v1059_v6 = vmul.f32 128.0, %v2484_v5  ;;  %vm1063_vm0 = vweird.f32 %v2484_v5 }
 0x1bd   : > { %v1060_v7 = vsub.f32 1.0, %v1059_v6 }
 0x1be   : > { %1056 = vadd.xlane.f32.xlu0 %v1053_v3 }
 0x1bf   : > { %v1061_v8 = vmul.f32 %v2484_v5, %v1060_v7 }
 0x1c1   : > { %v1062_v9 = vadd.f32 %v2484_v5, %v1061_v8 }
 0x1c3   : > { %v1064_v10 = vsel %vm1063_vm0, %v2484_v5, %v1062_v9 }
 0x229   : > { %v1055_v11 = vpop.xlane.xlu0 %1054 }
 0x22a   : > { %v1065_v12 = vmul.f32 %v1064_v10, %v1055_v11 }
 0x22c   : > { %v1067_v13 = vadd.f32 1e-06, %v1065_v12 }
 0x22e   : > { %2485 = vrsqrt.f32 %v1067_v13  ;;  %vm1075_vm2 = vweird.f32 %v1067_v13 }
 0x231   : > { %v1057_v14 = vpop.xlane.xlu0 %1056 }
 0x232   : > { %v1066_v15 = vmul.f32 %v1064_v10, %v1057_v14 }
 0x234   : > { %v2486_v16 = vpop.eup %2485  ;;  %v1068_v17 = vadd.f32 1e-06, %v1066_v15 }
 0x235   : > { %v1070_v18 = vmul.f32 %v2486_v16, %v1067_v13  ;;  %vm1076_vm1 = vweird.f32 %v2486_v16 }
 0x236   : > { %2487 = vrsqrt.f32 %v1068_v17  ;;  %vm1077_vm3 = vmor %vm1075_vm2, %vm1076_vm1  ;;  %vm1085_vm5 = vweird.f32 %v1068_v17 }
 0x237   : > { %v1071_v19 = vmul.f32 %v2486_v16, %v1070_v18 }
 0x239   : > { %v1072_v20 = vmul.f32 0.5, %v1071_v19 }
 0x23b   : > { %v1073_v21 = vsub.f32 1.5, %v1072_v20 }
 0x23c   : > { %v2488_v22 = vpop.eup %2487 }
 0x23d   : > { %v1074_v23 = vmul.f32 %v2486_v16, %v1073_v21  ;;  %v1080_v24 = vmul.f32 %v2488_v22, %v1068_v17  ;;  %vm1086_vm4 = vweird.f32 %v2488_v22 }
 0x23e   : > { %vm1087_vm6 = vmor %vm1085_vm5, %vm1086_vm4 }
 0x23f   : > { %v1078_v26 = vsel %vm1077_vm3, %v2486_v16, %v1074_v23  ;;  %v1081_v27 = vmul.f32 %v2488_v22, %v1080_v24 }
 0x240   : > { %v1089_v28 = vmul.f32 %v1078_v26, %v1050_v0 }
 0x241   : > { %v1082_v29 = vmul.f32 0.5, %v1081_v27 }
 0x242   : > { %v1095_v30 = vmul.f32 %v2482_v25, %v1089_v28 }
 0x243   : > { %v1083_v31 = vsub.f32 1.5, %v1082_v29 }
 0x244   : > { %1097 = vst [vmem:[#allocation2] sm:$0xff] %v1095_v30 }
 0x245   : > { %v1084_v32 = vmul.f32 %v2488_v22, %v1083_v31 }
 0x247   : > { %v1088_v33 = vsel %vm1087_vm6, %v2488_v22, %v1084_v32 }
 0x248   : > { %v1090_v34 = vmul.f32 %v1088_v33, %v1051_v2 }
 0x24a   : > { %v1096_v35 = vmul.f32 %v2482_v25, %v1090_v34 }
 0x24c   : > { %1098 = vst [vmem:[#allocation2 + $0x8] sm:$0xff] %v1096_v35 }
 0x24d PF: > { %v1131_v36 = vld [vmem:[%s4117_s20 + $0xf0] sm:$0xff]  ;;  %v1132_v37 = vld [vmem:[%s4117_s20 + $0xf8] sm:$0xff]  ;;  %v1129_v38 = vld [vmem:[%s4117_s20 + $0xe0] sm:$0xff]  ;;  %s2006_s5 = sshll.u32 (%p3000_p6), %s2727_s17, 1  ;;  %s2046_s9 = sshll.u32 (%p3000_p6), %s2727_s17, 4 }
 0x24e   : > { %1133 = vmatpush.msra.mxu0 %v1131_v36  ;;  %1156 = vmatpush.msra.mxu1 %v1132_v37  ;;  %v1130_v39 = vld [vmem:[%s4117_s20 + $0xe8] sm:$0xff]  ;;  %v1127_v40 = vld [vmem:[%s4117_s20 + $0xd0] sm:$0xff]  ;;  %v1128_v41 = vld [vmem:[%s4117_s20 + $0xd8] sm:$0xff]  ;;  %s1298_s30 = ssub.s32 (%p3000_p6), 3, %s2006_s5  ;;  %s4208_s29 = scalar_lea.vmem (%p3000_p6), %s4446_s4, %s2046_s9  }
 0x24f   : > { %v1125_v42 = vld [vmem:[%s4117_s20 + $0xc0] sm:$0xff]  ;;  %v1126_v43 = vld [vmem:[%s4117_s20 + $0xc8] sm:$0xff]  ;;  %v1123_v44 = vld [vmem:[%s4117_s20 + $0xb0] sm:$0xff]  ;;  %p1299_p10 = scmp.lt.s32.totalorder (%p3000_p6), %s1298_s30, 2 }
 0x250   : > { %1134 = vmatpush.msra.mxu0 %v1129_v38  ;;  %1157 = vmatpush.msra.mxu1 %v1130_v39  ;;  %v1124_v45 = vld [vmem:[%s4117_s20 + $0xb8] sm:$0xff]  ;;  %v1209_v46 = vld [vmem:[%s4119_s8 + $0xf0] sm:$0xff]  ;;  %v1207_v48 = vld [vmem:[%s4119_s8 + $0xe0] sm:$0xff] }
 0x251   : > { %v1210_v47 = vld [vmem:[%s4119_s8 + $0xf8] sm:$0xff]  ;;  %v1208_v49 = vld [vmem:[%s4119_s8 + $0xe8] sm:$0xff]  ;;  %v1121_v50 = vld [vmem:[%s4117_s20 + $0xa0] sm:$0xff]  ;;  %1211 = vmatpush.msra.mxu2 %v1209_v46 }
 0x252   : > { %1135 = vmatpush.msra.mxu0 %v1127_v40  ;;  %1158 = vmatpush.msra.mxu1 %v1128_v41  ;;  %v1122_v51 = vld [vmem:[%s4117_s20 + $0xa8] sm:$0xff]  ;;  %v1205_v52 = vld [vmem:[%s4119_s8 + $0xd0] sm:$0xff]  ;;  %v1206_v53 = vld [vmem:[%s4119_s8 + $0xd8] sm:$0xff] }
 0x253   : > { %1234 = vmatpush.msra.mxu3 %v1210_v47  ;;  %v1119_v54 = vld [vmem:[%s4117_s20 + $0x90] sm:$0xff]  ;;  %v1120_v55 = vld [vmem:[%s4117_s20 + $0x98] sm:$0xff]  ;;  %1212 = vmatpush.msra.mxu2 %v1207_v48  ;;  %v1203_v56 = vld [vmem:[%s4119_s8 + $0xc0] sm:$0xff] }
 0x254   : > { %1136 = vmatpush.msra.mxu0 %v1125_v42  ;;  %1159 = vmatpush.msra.mxu1 %v1126_v43  ;;  %v1204_v57 = vld [vmem:[%s4119_s8 + $0xc8] sm:$0xff]  ;;  %v1117_v58 = vld [vmem:[%s4117_s20 + $0x80] sm:$0xff]  ;;  %v1201_v60 = vld [vmem:[%s4119_s8 + $0xb0] sm:$0xff] }
 0x255   : > { %1235 = vmatpush.msra.mxu3 %v1208_v49  ;;  %v1118_v59 = vld [vmem:[%s4117_s20 + $0x88] sm:$0xff]  ;;  %1213 = vmatpush.msra.mxu2 %v1205_v52  ;;  %v1202_v61 = vld [vmem:[%s4119_s8 + $0xb8] sm:$0xff]  ;;  %v1115_v62 = vld [vmem:[%s4117_s20 + $0x70] sm:$0xff] }
 0x256   : > { %1137 = vmatpush.msra.mxu0 %v1123_v44  ;;  %1160 = vmatpush.msra.mxu1 %v1124_v45  ;;  %v1116_v63 = vld [vmem:[%s4117_s20 + $0x78] sm:$0xff]  ;;  %v1199_v0 = vld [vmem:[%s4119_s8 + $0xa0] sm:$0xff]  ;;  %v1200_v1 = vld [vmem:[%s4119_s8 + $0xa8] sm:$0xff] }
 0x257   : > { %1236 = vmatpush.msra.mxu3 %v1206_v53  ;;  %1214 = vmatpush.msra.mxu2 %v1203_v56  ;;  %v1113_v2 = vld [vmem:[%s4117_s20 + $0x60] sm:$0xff]  ;;  %v1114_v3 = vld [vmem:[%s4117_s20 + $0x68] sm:$0xff]  ;;  %v1197_v4 = vld [vmem:[%s4119_s8 + $0x90] sm:$0xff] }
 0x258   : > { %1138 = vmatpush.msra.mxu0 %v1121_v50  ;;  %1161 = vmatpush.msra.mxu1 %v1122_v51  ;;  %v1198_v5 = vld [vmem:[%s4119_s8 + $0x98] sm:$0xff]  ;;  %v1111_v6 = vld [vmem:[%s4117_s20 + $0x50] sm:$0xff]  ;;  %v1195_v8 = vld [vmem:[%s4119_s8 + $0x80] sm:$0xff] }
 0x259   : > { %1237 = vmatpush.msra.mxu3 %v1204_v57  ;;  %1215 = vmatpush.msra.mxu2 %v1201_v60  ;;  %v1112_v7 = vld [vmem:[%s4117_s20 + $0x58] sm:$0xff]  ;;  %v1196_v9 = vld [vmem:[%s4119_s8 + $0x88] sm:$0xff]  ;;  %v1109_v10 = vld [vmem:[%s4117_s20 + $0x40] sm:$0xff] }
 0x25a   : > { %1139 = vmatpush.msra.mxu0 %v1119_v54  ;;  %1162 = vmatpush.msra.mxu1 %v1120_v55  ;;  %v1110_v11 = vld [vmem:[%s4117_s20 + $0x48] sm:$0xff]  ;;  %v1193_v12 = vld [vmem:[%s4119_s8 + $0x70] sm:$0xff]  ;;  %v1194_v13 = vld [vmem:[%s4119_s8 + $0x78] sm:$0xff] }
 0x25b   : > { %1238 = vmatpush.msra.mxu3 %v1202_v61  ;;  %1216 = vmatpush.msra.mxu2 %v1199_v0  ;;  %v1107_v14 = vld [vmem:[%s4117_s20 + $0x30] sm:$0xff]  ;;  %v1108_v15 = vld [vmem:[%s4117_s20 + $0x38] sm:$0xff]  ;;  %v1191_v16 = vld [vmem:[%s4119_s8 + $0x60] sm:$0xff] }
 0x25c   : > { %1140 = vmatpush.msra.mxu0 %v1117_v58  ;;  %1163 = vmatpush.msra.mxu1 %v1118_v59  ;;  %v1192_v17 = vld [vmem:[%s4119_s8 + $0x68] sm:$0xff]  ;;  %v1105_v18 = vld [vmem:[%s4117_s20 + $0x20] sm:$0xff]  ;;  %v1189_v20 = vld [vmem:[%s4119_s8 + $0x50] sm:$0xff] }
 0x25d   : > { %1239 = vmatpush.msra.mxu3 %v1200_v1  ;;  %1217 = vmatpush.msra.mxu2 %v1197_v4  ;;  %v1106_v19 = vld [vmem:[%s4117_s20 + $0x28] sm:$0xff]  ;;  %v1190_v21 = vld [vmem:[%s4119_s8 + $0x58] sm:$0xff]  ;;  %v1103_v22 = vld [vmem:[%s4117_s20 + $0x10] sm:$0xff] }
 0x25e   : > { %1141 = vmatpush.msra.mxu0 %v1115_v62  ;;  %1164 = vmatpush.msra.mxu1 %v1116_v63  ;;  %v1104_v23 = vld [vmem:[%s4117_s20 + $0x18] sm:$0xff]  ;;  %v1187_v24 = vld [vmem:[%s4119_s8 + $0x40] sm:$0xff]  ;;  %v1188_v25 = vld [vmem:[%s4119_s8 + $0x48] sm:$0xff] }
 0x25f   : > { %1240 = vmatpush.msra.mxu3 %v1198_v5  ;;  %1218 = vmatpush.msra.mxu2 %v1195_v8  ;;  %v1101_v26 = vld [vmem:[%s4117_s20] sm:$0xff]  ;;  %v1102_v27 = vld [vmem:[%s4117_s20 + $0x8] sm:$0xff]  ;;  %v1099_v28 = vld [vmem:[#allocation2] sm:$0xff] }
 0x260   : > { %1142 = vmatpush.msra.mxu0 %v1113_v2  ;;  %1165 = vmatpush.msra.mxu1 %v1114_v3  ;;  %v1185_v29 = vld [vmem:[%s4119_s8 + $0x30] sm:$0xff]  ;;  %v1186_v30 = vld [vmem:[%s4119_s8 + $0x38] sm:$0xff]  ;;  %v1183_v31 = vld [vmem:[%s4119_s8 + $0x20] sm:$0xff] }
 0x261   : > { %1241 = vmatpush.msra.mxu3 %v1196_v9  ;;  %1219 = vmatpush.msra.mxu2 %v1193_v12  ;;  %v1184_v32 = vld [vmem:[%s4119_s8 + $0x28] sm:$0xff]  ;;  %v1181_v33 = vld [vmem:[%s4119_s8 + $0x10] sm:$0xff]  ;;  %v1182_v34 = vld [vmem:[%s4119_s8 + $0x18] sm:$0xff] }
 0x262   : > { %1143 = vmatpush.msra.mxu0 %v1111_v6  ;;  %1166 = vmatpush.msra.mxu1 %v1112_v7  ;;  %v1179_v35 = vld [vmem:[%s4119_s8] sm:$0xff]  ;;  %v1180_v36 = vld [vmem:[%s4119_s8 + $0x8] sm:$0xff]  ;;  %v1100_v37 = vld [vmem:[#allocation2 + $0x8] sm:$0xff] }
 0x263   : > { %1242 = vmatpush.msra.mxu3 %v1194_v13  ;;  %1220 = vmatpush.msra.mxu2 %v1191_v16 }
 0x264   : > { %1144 = vmatpush.msra.mxu0 %v1109_v10  ;;  %1167 = vmatpush.msra.mxu1 %v1110_v11 }
 0x265   : > { %1243 = vmatpush.msra.mxu3 %v1192_v17  ;;  %1221 = vmatpush.msra.mxu2 %v1189_v20 }
 0x266   : > { %1145 = vmatpush.msra.mxu0 %v1107_v14  ;;  %1168 = vmatpush.msra.mxu1 %v1108_v15 }
 0x267   : > { %1244 = vmatpush.msra.mxu3 %v1190_v21  ;;  %1222 = vmatpush.msra.mxu2 %v1187_v24 }
 0x268   : > { %1146 = vmatpush.msra.mxu0 %v1105_v18  ;;  %1169 = vmatpush.msra.mxu1 %v1106_v19 }
 0x269   : > { %1245 = vmatpush.msra.mxu3 %v1188_v25  ;;  %1223 = vmatpush.msra.mxu2 %v1185_v29 }
 0x26a   : > { %1147 = vmatpush.msra.mxu0 %v1103_v22  ;;  %1170 = vmatpush.msra.mxu1 %v1104_v23 }
 0x26b   : > { %1246 = vmatpush.msra.mxu3 %v1186_v30  ;;  %1224 = vmatpush.msra.mxu2 %v1183_v31 }
 0x26c   : > { %1148 = vmatpush.msra.mxu0 %v1101_v26  ;;  %1171 = vmatpush.msra.mxu1 %v1102_v27 }
 0x26d   : > { %1149 = vmatmul.f32.vlgmr.msra.gmra.mxu0 %v1099_v28  ;;  %1172 = vmatmul.f32.vlgmr.msra.gmra.mxu1 %v1099_v28 }
 0x26e   : > { %1247 = vmatpush.msra.mxu3 %v1184_v32  ;;  %1225 = vmatpush.msra.mxu2 %v1181_v33 }
 0x270   : > { %1248 = vmatpush.msra.mxu3 %v1182_v34  ;;  %1226 = vmatpush.msra.mxu2 %v1179_v35 }
 0x271   : > { %1227 = vmatmul.f32.vlgmr.msra.gmra.mxu2 %v1099_v28 }
 0x272   : > { %1249 = vmatpush.msra.mxu3 %v1180_v36 }
 0x273   : > { %1250 = vmatmul.f32.vlgmr.msra.gmra.mxu3 %v1099_v28 }
 0x275   : > { %1152 = vmatmul.f32.gmra.mxu0 %v1100_v37  ;;  %1175 = vmatmul.f32.gmra.mxu1 %v1100_v37 }
 0x279   : > { %1230 = vmatmul.f32.gmra.mxu2 %v1100_v37 }
 0x27b   : > { %1253 = vmatmul.f32.gmra.mxu3 %v1100_v37 }
 0x2ea   : > { %v1150_v38 = vpop.f32.mrf.mxu0  ;;  %v1173_v39 = vpop.f32.mrf.mxu1 }
 0x2eb   : > { %v1257_v40 = vsub.f32 0.0, %v1150_v38  ;;  %v1258_v41 = vsub.f32 0.0, %v1173_v39 }
 0x2ed   : > { %v1261_v42 = vmul.f32 1.442695, %v1257_v40  ;;  %v1263_v43 = vmul.f32 1.442695, %v1258_v41 }
 0x2ef   : > { %2489 = vpow2.f32 %v1261_v42 }
 0x2f0   : > { %2491 = vpow2.f32 %v1263_v43 }
 0x2f2   : > { %v1153_v44 = vpop.f32.mrf.mxu0  ;;  %v1176_v45 = vpop.f32.mrf.mxu1 }
 0x2f3   : > { %v1259_v46 = vsub.f32 0.0, %v1153_v44  ;;  %v1260_v47 = vsub.f32 0.0, %v1176_v45 }
 0x2f4   : > { %v1228_v54 = vpop.f32.mrf.mxu2 }
 0x2f5   : > { %v2490_v48 = vpop.eup %2489  ;;  %v1265_v49 = vmul.f32 1.442695, %v1259_v46  ;;  %v1267_v52 = vmul.f32 1.442695, %v1260_v47 }
 0x2f6   : > { %v2492_v50 = vpop.eup %2491  ;;  %v1269_v51 = vadd.f32 1.0, %v2490_v48  ;;  %v1251_v60 = vpop.f32.mrf.mxu3 }
 0x2f7   : > { %v1270_v53 = vadd.f32 1.0, %v2492_v50  ;;  %2493 = vpow2.f32 %v1265_v49 }
 0x2f8   : > { %2495 = vrcp.f32 %v1269_v51 }
 0x2f9   : > { %2497 = vrcp.f32 %v1270_v53 }
 0x2fa   : > { %2499 = vpow2.f32 %v1267_v52 }
 0x2fc   : > { %v1231_v3 = vpop.f32.mrf.mxu2 }
 0x2fd   : > { %v2494_v55 = vpop.eup %2493 }
 0x2fe   : > { %v2496_v56 = vpop.eup %2495  ;;  %v1271_v57 = vadd.f32 1.0, %v2494_v55  ;;  %v1254_v7 = vpop.f32.mrf.mxu3 }
 0x2ff   : > { %v2498_v58 = vpop.eup %2497  ;;  %v1277_v59 = vmul.f32 %v2496_v56, %v1150_v38 }
 0x300   : > { %v2500_v61 = vpop.eup %2499  ;;  %v1278_v62 = vmul.f32 %v2498_v58, %v1173_v39  ;;  %2501 = vrcp.f32 %v1271_v57 }
 0x301   : > { %v1272_v63 = vadd.f32 1.0, %v2500_v61  ;;  %v1281_v0 = vmul.f32 %v1277_v59, %v1228_v54 }
 0x302   : > { %v1282_v1 = vmul.f32 %v1278_v62, %v1251_v60 }
 0x303   : > { %2503 = vrcp.f32 %v1272_v63  ;;  %1285 = vst [vmem:[%s4121_s11] sm:$0xff] %v1281_v0 }
 0x304   : > { %1286 = vst [vmem:[%s4121_s11 + $0x8] sm:$0xff] %v1282_v1 }
 0x306   : > { %v2502_v2 = vpop.eup %2501 }
 0x307   : > { %v1279_v4 = vmul.f32 %v2502_v2, %v1153_v44 }
 0x309   : > { %v2504_v5 = vpop.eup %2503  ;;  %v1283_v6 = vmul.f32 %v1279_v4, %v1231_v3 }
 0x30a   : > { %v1280_v8 = vmul.f32 %v2504_v5, %v1176_v45  ;;  %1295 = sbr.rel (!%p3000_p6) target bundleno = 907 (0x38b), region = 176 }
 0x30b   : > { %1287 = vst [vmem:[%s4121_s11 + $0x10] sm:$0xff] %v1283_v6 }
 0x30c   : > { %v1284_v9 = vmul.f32 %v1280_v8, %v1254_v7 }
 0x30e   : > { %1288 = vst [vmem:[%s4121_s11 + $0x18] sm:$0xff] %v1284_v9 }
 0x30f   : > { %s4531_s30 = smov (!%p1299_p10, %s1298_s30), 2 }
 0x310   : > { %s2007_s24 = sshll.u32 %s4531_s30, 4  ;;  %s4210_s10 = sshll.u32 %s4531_s30, 3 }
 0x311   : > { %p2011_p11 = scmp.eq.s32.totalorder %s2007_s24, 0 }
 0x312   : > { %p1311_p12 = scmp.lt.u32.totalorder (!%p2011_p11), %s4210_s10, 8 }
 0x313   : > { %1310 = sbr.rel (%p2011_p11) target bundleno = 907 (0x38b), region = 180 }
 0x318   : > { %1314 = sbr.rel (%p1311_p12) target bundleno = 897 (0x381), region = 184  ;;  %s4214_s25 = sand.u32 (!%p1311_p12), 7, %s4210_s10  }
 0x319   : > { %p1333_p6 = scmp.eq.s32.totalorder (!%p1311_p12), %s4214_s25, 0  ;;  %p2012_p13 = scmp.ne.s32.totalorder (!%p1311_p12), %s4214_s25, 0 }
 0x31d   : > { %1336 = sbr.rel (%p2012_p13) target bundleno = 844 (0x34c), region = 199  ;;  %s1337_s17 = sshrl.u32 (!%p2012_p13), %s4210_s10, 3 }
 0x31e   : > { %s4221_s14 = sshrl.u32 (!%p2012_p13), %s1337_s17, 4 }
 0x31f   : > { %p2013_p0 = scmp.le.s32.totalorder (!%p2012_p13), %s4221_s14, 0 }
 0x322   : > { %1842 = sbr.rel (%p2013_p0) target bundleno = 827 (0x33b), region = 420  ;;  %s4493_s7 = smov (!%p2013_p0), %s4208_s29 }
 0x323   : > { %s4494_s13 = smov (!%p2013_p0), %s4121_s11  ;;  %s4230_s2 = smov (!%p2013_p0), 0  }
 0x324   : > { %s4232_s20 = smov (!%p2013_p0), 0  }
 0x327 LB: >> { %v1348_v10 = vld [vmem:[%s2871_s13] sm:$0xff]  ;;  %v1350_v11 = vld [vmem:[%s2871_s13 + $0x8] sm:$0xff]  ;;  %v1352_v12 = vld [vmem:[%s2871_s13 + $0x10] sm:$0xff]  ;;  %s1412_s8 = sadd.s32 1, %s2875_s2  ;;  %s1342_s20 = sadd.s32 1, %s2879_s20   ;;  %s2879_s20 = sphi %s4232_s20, %s1342_s20   ;;  %s2875_s2 = sphi %s4230_s2, %s4497_s2   ;;  %s2871_s13 = sphi %s4494_s13, %s4496_s13   ;;  %s2867_s7 = sphi %s4493_s7, %s4495_s7  }
 0x328   : >> { %1349 = vst [vmem:[%s2867_s7] sm:$0xff] %v1348_v10  ;;  %v1382_v13 = vld [vmem:[%s2871_s13 + $0x18] sm:$0xff]  ;;  %v1384_v14 = vld [vmem:[%s2871_s13 + $0x20] sm:$0xff]  ;;  %p1413_p3 = scmp.ge.s32.totalorder %s1412_s8, %s4221_s14  ;;  %v1386_v15 = vld [vmem:[%s2871_s13 + $0x28] sm:$0xff]  ;;  %p1341_p1 = scmp.ge.s32.totalorder %s1342_s20, %s4221_s14 }
 0x329   : >> { %1351 = vst [vmem:[%s2867_s7 + $0x8] sm:$0xff] %v1350_v11  ;;  %v1388_v16 = vld [vmem:[%s2871_s13 + $0x30] sm:$0xff]  ;;  %v1390_v17 = vld [vmem:[%s2871_s13 + $0x38] sm:$0xff]  ;;  %v1392_v18 = vld [vmem:[%s2871_s13 + $0x40] sm:$0xff] }
 0x32a   : >> { %1353 = vst [vmem:[%s2867_s7 + $0x10] sm:$0xff] %v1352_v12  ;;  %s4533_s8 = smov (%p1413_p3, %s1412_s8), 0  ;;  %v1394_v19 = vld [vmem:[%s2871_s13 + $0x48] sm:$0xff]  ;;  %v1396_v20 = vld [vmem:[%s2871_s13 + $0x50] sm:$0xff]  ;;  %v1398_v21 = vld [vmem:[%s2871_s13 + $0x58] sm:$0xff] }
 0x32b   : >> { %1381 = vst [vmem:[%s2867_s7 + $0x18] sm:$0xff] %v1352_v12  ;;  %s2014_s22 = sshll.u32 %s4533_s8, 7  ;;  %v1400_v22 = vld [vmem:[%s2871_s13 + $0x60] sm:$0xff]  ;;  %v1402_v23 = vld [vmem:[%s2871_s13 + $0x68] sm:$0xff]  ;;  %v1404_v24 = vld [vmem:[%s2871_s13 + $0x70] sm:$0xff]  ;;  %s4497_s2 = smov %s4533_s8 }
 0x32c   : >> { %1383 = vst [vmem:[%s2867_s7 + $0x20] sm:$0xff] %v1382_v13  ;;  %s1417_s28 = scalar_lea.vmem %s4121_s11, %s2014_s22 [#allocation5]   ;;  %s1418_s27 = scalar_lea.vmem %s4208_s29, %s2014_s22   ;;  %v1406_v25 = vld [vmem:[%s2871_s13 + $0x78] sm:$0xff]  ;;  %v1408_v26 = vld [vmem:[%s2871_s13 + $0x80] sm:$0xff]  ;;  %v1410_v27 = vld [vmem:[%s2871_s13 + $0x88] sm:$0xff] }
 0x32d   : >> { %1385 = vst [vmem:[%s2867_s7 + $0x28] sm:$0xff] %v1384_v14  ;;  %s4496_s13 = smov %s1417_s28 }
 0x32e   : >> { %1387 = vst [vmem:[%s2867_s7 + $0x30] sm:$0xff] %v1386_v15 }
 0x32f   : >> { %1389 = vst [vmem:[%s2867_s7 + $0x38] sm:$0xff] %v1388_v16 }
 0x330   : >> { %1391 = vst [vmem:[%s2867_s7 + $0x40] sm:$0xff] %v1390_v17 }
 0x331   : >> { %1393 = vst [vmem:[%s2867_s7 + $0x48] sm:$0xff] %v1392_v18 }
 0x332   : >> { %1395 = vst [vmem:[%s2867_s7 + $0x50] sm:$0xff] %v1394_v19 }
 0x333   : >> { %1397 = vst [vmem:[%s2867_s7 + $0x58] sm:$0xff] %v1396_v20 }
 0x334   : >> { %1399 = vst [vmem:[%s2867_s7 + $0x60] sm:$0xff] %v1398_v21 }
 0x335   : >> { %1401 = vst [vmem:[%s2867_s7 + $0x68] sm:$0xff] %v1400_v22 }
 0x336   : >> { %1403 = vst [vmem:[%s2867_s7 + $0x70] sm:$0xff] %v1402_v23  ;;  %1344 = sbr.rel (!%p1341_p1) target bundleno = 807 (0x327), region = 426 }
 0x337   : >> { %1405 = vst [vmem:[%s2867_s7 + $0x78] sm:$0xff] %v1404_v24 }
 0x338   : >> { %1407 = vst [vmem:[%s2867_s7 + $0x80] sm:$0xff] %v1406_v25 }
 0x339   : >> { %1409 = vst [vmem:[%s2867_s7 + $0x88] sm:$0xff] %v1408_v26 }
 0x33a   : >> { %1411 = vst [vmem:[%s2867_s7 + $0x90] sm:$0xff] %v1410_v27  ;;  %s4495_s7 = smov %s1418_s27 }
 0x33b PF: > { %s4300_s6 = sand.u32 15, %s1337_s17   ;;  %s2047_s15 = sshll.u32 %s4221_s14, 7 }
 0x33c   : > { %s4304_s12 = scalar_lea.vmem %s4121_s11, %s2047_s15 [#allocation5]   ;;  %s1425_s5 = scalar_lea.vmem %s4208_s29, %s2047_s15  }
 0x33d   : > { %p2019_p2 = scmp.le.s32.totalorder %s4300_s6, 0 }
 0x33e   : > { %s2881_s9 = smov (!%p2019_p2), %s1425_s5   ;;  %s2885_s30 = smov (!%p2019_p2), %s4304_s12  }
 0x33f   : > { %1856 = sbr.rel (%p2019_p2) target bundleno = 844 (0x34c), region = 431  ;;  %s2889_s23 = smov (!%p2019_p2), 0  }
 0x340   : > { %s2893_s21 = smov (!%p2019_p2), 0  }
 0x344 LB: >> { %v1435_v28 = vld [vmem:[%s2887_s30] sm:$0xff]  ;;  %v1437_v29 = vld [vmem:[%s2887_s30 + $0x10] sm:$0xff]  ;;  %s1439_s24 = sadd.s32 1, %s2891_s23  ;;  %s1429_s21 = sadd.s32 1, %s2895_s21   ;;  %s2895_s21 = sphi %s2893_s21, %s1429_s21   ;;  %s2891_s23 = sphi %s2889_s23, %s2890_s23   ;;  %s2887_s30 = sphi %s2885_s30, %s1444_s30   ;;  %s2883_s9 = sphi %s2881_s9, %s1445_s9  }
 0x345   : >> { %1436 = vst [vmem:[%s2883_s9] sm:$0xff] %v1435_v28  ;;  %p1440_p4 = scmp.ge.s32.totalorder %s1439_s24, %s4300_s6  ;;  %p1428_p5 = scmp.ge.s32.totalorder %s1429_s21, %s4300_s6 }
 0x346   : >> { %1438 = vst [vmem:[%s2883_s9 + $0x18] sm:$0xff] %v1437_v29 }
 0x347   : >> { %s4535_s24 = smov (%p1440_p4, %s1439_s24), 0  ;;  %1431 = sbr.rel (!%p1428_p5) target bundleno = 836 (0x344), region = 437 }
 0x348   : >> { %s2020_s17 = sshll.u32 %s4535_s24, 3  ;;  %s2890_s23 = smov %s4535_s24  }
 0x349   : >> { %s1444_s30 = scalar_lea.vmem %s4304_s12, %s2020_s17 [#allocation5]   ;;  %s1445_s9 = scalar_lea.vmem %s1425_s5, %s2020_s17  }
 0x34c PF: > { %1448 = sbr.rel (%p1333_p6) target bundleno = 897 (0x381), region = 217  ;;  %s1450_s14 = ssub.s32 (!%p1333_p6), %s4210_s10, %s4214_s25 }
 0x34d   : > { %s1454_s7 = sshrl.u32 (!%p1333_p6), %s4210_s10, 3  ;;  %s4318_s13 = scalar_lea.vmem (!%p1333_p6), %s4121_s11, %s1450_s14 [#allocation5] }
 0x34e   : > { %s4321_s2 = scalar_lea.vmem (!%p1333_p6), %s4208_s29, %s1450_s14  ;;  %s4325_s20 = sshrl.u32 (!%p1333_p6), %s1454_s7, 4 }
 0x34f   : > { %p2022_p7 = scmp.le.s32.totalorder (!%p1333_p6), %s4325_s20, 0 }
 0x351   : > { %1870 = sbr.rel (%p2022_p7) target bundleno = 874 (0x36a), region = 442  ;;  %s4498_s8 = smov (!%p2022_p7), %s4208_s29 }
 0x352   : > { %s4499_s22 = smov (!%p2022_p7), %s4121_s11  ;;  %s4334_s28 = smov (!%p2022_p7), 0  }
 0x353   : > { %s4336_s27 = smov (!%p2022_p7), 0  }
 0x356 LB: >> { %v1465_v30 = vld [vmem:[%s2903_s22] sm:$0xff]  ;;  %v1467_v31 = vld [vmem:[%s2903_s22 + $0x8] sm:$0xff]  ;;  %v1469_v32 = vld [vmem:[%s2903_s22 + $0x10] sm:$0xff]  ;;  %s1529_s6 = sadd.s32 1, %s2907_s28  ;;  %s1459_s27 = sadd.s32 1, %s2911_s27   ;;  %s2911_s27 = sphi %s4336_s27, %s1459_s27   ;;  %s2907_s28 = sphi %s4334_s28, %s4502_s28   ;;  %s2903_s22 = sphi %s4499_s22, %s4501_s22   ;;  %s2899_s8 = sphi %s4498_s8, %s4500_s8  }
 0x357   : >> { %1466 = vst [vmem:[%s2899_s8] sm:$0xff] %v1465_v30  ;;  %v1499_v33 = vld [vmem:[%s2903_s22 + $0x18] sm:$0xff]  ;;  %v1501_v34 = vld [vmem:[%s2903_s22 + $0x20] sm:$0xff]  ;;  %p1530_p8 = scmp.ge.s32.totalorder %s1529_s6, %s4325_s20  ;;  %v1503_v35 = vld [vmem:[%s2903_s22 + $0x28] sm:$0xff]  ;;  %p1458_p9 = scmp.ge.s32.totalorder %s1459_s27, %s4325_s20 }
 0x358   : >> { %1468 = vst [vmem:[%s2899_s8 + $0x8] sm:$0xff] %v1467_v31  ;;  %v1505_v36 = vld [vmem:[%s2903_s22 + $0x30] sm:$0xff]  ;;  %v1507_v37 = vld [vmem:[%s2903_s22 + $0x38] sm:$0xff]  ;;  %v1509_v38 = vld [vmem:[%s2903_s22 + $0x40] sm:$0xff] }
 0x359   : >> { %1470 = vst [vmem:[%s2899_s8 + $0x10] sm:$0xff] %v1469_v32  ;;  %s4537_s6 = smov (%p1530_p8, %s1529_s6), 0  ;;  %v1511_v39 = vld [vmem:[%s2903_s22 + $0x48] sm:$0xff]  ;;  %v1513_v40 = vld [vmem:[%s2903_s22 + $0x50] sm:$0xff]  ;;  %v1515_v41 = vld [vmem:[%s2903_s22 + $0x58] sm:$0xff] }
 0x35a   : >> { %1498 = vst [vmem:[%s2899_s8 + $0x18] sm:$0xff] %v1469_v32  ;;  %s2023_s15 = sshll.u32 %s4537_s6, 7  ;;  %v1517_v42 = vld [vmem:[%s2903_s22 + $0x60] sm:$0xff]  ;;  %v1519_v43 = vld [vmem:[%s2903_s22 + $0x68] sm:$0xff]  ;;  %v1521_v44 = vld [vmem:[%s2903_s22 + $0x70] sm:$0xff]  ;;  %s4502_s28 = smov %s4537_s6 }
 0x35b   : >> { %1500 = vst [vmem:[%s2899_s8 + $0x20] sm:$0xff] %v1499_v33  ;;  %s1534_s12 = scalar_lea.vmem %s4121_s11, %s2023_s15 [#allocation5]   ;;  %s1535_s5 = scalar_lea.vmem %s4208_s29, %s2023_s15   ;;  %v1523_v45 = vld [vmem:[%s2903_s22 + $0x78] sm:$0xff]  ;;  %v1525_v46 = vld [vmem:[%s2903_s22 + $0x80] sm:$0xff]  ;;  %v1527_v47 = vld [vmem:[%s2903_s22 + $0x88] sm:$0xff] }
 0x35c   : >> { %1502 = vst [vmem:[%s2899_s8 + $0x28] sm:$0xff] %v1501_v34  ;;  %s4501_s22 = smov %s1534_s12 }
 0x35d   : >> { %1504 = vst [vmem:[%s2899_s8 + $0x30] sm:$0xff] %v1503_v35 }
 0x35e   : >> { %1506 = vst [vmem:[%s2899_s8 + $0x38] sm:$0xff] %v1505_v36 }
 0x35f   : >> { %1508 = vst [vmem:[%s2899_s8 + $0x40] sm:$0xff] %v1507_v37 }
 0x360   : >> { %1510 = vst [vmem:[%s2899_s8 + $0x48] sm:$0xff] %v1509_v38 }
 0x361   : >> { %1512 = vst [vmem:[%s2899_s8 + $0x50] sm:$0xff] %v1511_v39 }
 0x362   : >> { %1514 = vst [vmem:[%s2899_s8 + $0x58] sm:$0xff] %v1513_v40 }
 0x363   : >> { %1516 = vst [vmem:[%s2899_s8 + $0x60] sm:$0xff] %v1515_v41 }
 0x364   : >> { %1518 = vst [vmem:[%s2899_s8 + $0x68] sm:$0xff] %v1517_v42 }
 0x365   : >> { %1520 = vst [vmem:[%s2899_s8 + $0x70] sm:$0xff] %v1519_v43  ;;  %1461 = sbr.rel (!%p1458_p9) target bundleno = 854 (0x356), region = 448 }
 0x366   : >> { %1522 = vst [vmem:[%s2899_s8 + $0x78] sm:$0xff] %v1521_v44 }
 0x367   : >> { %1524 = vst [vmem:[%s2899_s8 + $0x80] sm:$0xff] %v1523_v45 }
 0x368   : >> { %1526 = vst [vmem:[%s2899_s8 + $0x88] sm:$0xff] %v1525_v46 }
 0x369   : >> { %1528 = vst [vmem:[%s2899_s8 + $0x90] sm:$0xff] %v1527_v47  ;;  %s4500_s8 = smov %s1535_s5 }
 0x36a PF: > { %s4404_s9 = sand.u32 15, %s1454_s7   ;;  %s2049_s30 = sshll.u32 %s4325_s20, 7 }
 0x36b   : > { %s4408_s23 = scalar_lea.vmem %s4121_s11, %s2049_s30 [#allocation5]   ;;  %s1542_s21 = scalar_lea.vmem %s4208_s29, %s2049_s30  }
 0x36c   : > { %p2028_p10 = scmp.le.s32.totalorder %s4404_s9, 0 }
 0x36d   : > { %s2913_s24 = smov (!%p2028_p10), %s1542_s21   ;;  %s2917_s17 = smov (!%p2028_p10), %s4408_s23  }
 0x36e   : > { %1884 = sbr.rel (%p2028_p10) target bundleno = 891 (0x37b), region = 453  ;;  %s2921_s14 = smov (!%p2028_p10), 0  }
 0x36f   : > { %s2925_s27 = smov (!%p2028_p10), 0  }
 0x373 LB: >> { %v1552_v48 = vld [vmem:[%s2919_s17] sm:$0xff]  ;;  %v1554_v49 = vld [vmem:[%s2919_s17 + $0x10] sm:$0xff]  ;;  %s1556_s7 = sadd.s32 1, %s2923_s14  ;;  %s1546_s27 = sadd.s32 1, %s2927_s27   ;;  %s2927_s27 = sphi %s2925_s27, %s1546_s27   ;;  %s2923_s14 = sphi %s2921_s14, %s2922_s14   ;;  %s2919_s17 = sphi %s2917_s17, %s1561_s17   ;;  %s2915_s24 = sphi %s2913_s24, %s1562_s24  }
 0x374   : >> { %1553 = vst [vmem:[%s2915_s24] sm:$0xff] %v1552_v48  ;;  %p1557_p11 = scmp.ge.s32.totalorder %s1556_s7, %s4404_s9  ;;  %p1545_p12 = scmp.ge.s32.totalorder %s1546_s27, %s4404_s9 }
 0x375   : >> { %1555 = vst [vmem:[%s2915_s24 + $0x18] sm:$0xff] %v1554_v49 }
 0x376   : >> { %s4539_s7 = smov (%p1557_p11, %s1556_s7), 0  ;;  %1548 = sbr.rel (!%p1545_p12) target bundleno = 883 (0x373), region = 459 }
 0x377   : >> { %s2029_s20 = sshll.u32 %s4539_s7, 3  ;;  %s2922_s14 = smov %s4539_s7  }
 0x378   : >> { %s1561_s17 = scalar_lea.vmem %s4408_s23, %s2029_s20 [#allocation5]   ;;  %s1562_s24 = scalar_lea.vmem %s1542_s21, %s2029_s20  }
 0x37b PF: > { %s2934_s8 = smov 1  }
 0x37c   : > { %s1563_s22 = sshll.u32 %s2934_s8, %s4214_s25 }
 0x37d   : > { %s2031_s28 = sadd.s32 4294967295, %s1563_s22 }
 0x37e   : > { %v1573_v50 = vld [vmem:[%s4318_s13] sm:%s2031_s28]  ;;  %v1575_v51 = vld [vmem:[%s4318_s13 + $0x10] sm:%s2031_s28] }
 0x37f   : > { %1574 = vst [vmem:[%s4321_s2] sm:%s2031_s28] %v1573_v50 }
 0x380   : > { %1576 = vst [vmem:[%s4321_s2 + $0x18] sm:%s2031_s28] %v1575_v51 }
 0x381 PF: > { %p2032_p6 = scmp.ge.u32.totalorder %s4210_s10, 8 }
 0x382   : > { %s2935_s6 = smov (!%p2032_p6), 1  }
 0x383   : > { %1317 = sbr.rel (%p2032_p6) target bundleno = 907 (0x38b), region = 188  ;;  %s1318_s15 = sshll.u32 (!%p2032_p6), %s2935_s6, %s4210_s10 }
 0x384   : > { %s2033_s12 = sadd.s32 (!%p2032_p6), 4294967295, %s1318_s15 }
 0x388   : > { %v1328_v52 = vld [vmem:[%s4121_s11] sm:%s2033_s12]  ;;  %v1330_v53 = vld [vmem:[%s4121_s11 + $0x10] sm:%s2033_s12] }
 0x389   : > { %1329 = vst [vmem:[%s4208_s29] sm:%s2033_s12] %v1328_v52 }
 0x38a   : > { %1331 = vst [vmem:[%s4208_s29 + $0x18] sm:%s2033_s12] %v1330_v53 }
 0x38b PF: > { %s14_s19 = sadd.s32 1, %s2735_s19   ;;  %s4503_s25 = sld [smem:[#allocation6_spill]] }
 0x38c   : > { %p11_p13 = scmp.ge.s32.totalorder %s14_s19, 4   ;;  %s4504_s15 = smov %s2723_s16 }
 0x38d   : > { %s4505_s16 = smov %s3005_s26  ;;  %s4506_s17 = smov %s2731_s18 }
 0x38e   :  { %13 = sbr.rel (!%p11_p13) target bundleno = 5 (0x5), region = 470 }
 0x391   : > { %s4507_s18 = smov %s4503_s25 }

// kernel: transformer_block_forward.6
= control target key start
LH: loop header
LB: loop body
LE: loop exit
PB: predicated region body
PF: predicated region fallthrough
CT: control target
= control target key end

     0   :  { %vm18_vm0 = vcmask 261120   ;;  %v517_v24 = vmov 0.0   ;;  %vm268_vm1 = vcmask 64512   ;;  %s682_s1 = inlined_call_operand.vmem [shape: f32[8,8,32], index: 1, kind: input, shape index: {}]   ;;  %s683_s0 = inlined_call_operand.vmem [shape: f32[8,8,32], index: 0, kind: input, shape index: {}]   ;;  %s684_s2 = inlined_call_operand.vmem [shape: f32[8,8,32], index: 2, kind: input, shape index: {}]   ;;  %s685_s3 = inlined_call_operand.vmem [shape: f32[8,8,32], index: 3, kind: output, shape index: {}]  }
   0x1   :  { %v37_v0 = vld [vmem:[%s682_s1 + $0x10] sm:$0xff]  ;;  %v38_v1 = vld [vmem:[%s682_s1 + $0x18] sm:$0xff]  ;;  %v35_v6 = vld [vmem:[%s682_s1] sm:$0xff]  ;;  %19 = vst.msk [vmem:[#allocation2] sm:$0xff] %vm18_vm0, %v517_v24 }
   0x2   :  { %v29_v2 = vld [vmem:[%s683_s0 + $0x10] sm:$0xff]  ;;  %496 = vmatpush.xpose.msk.msra.mxu2 %vm18_vm0, %v37_v0  ;;  %498 = vmatpush.xpose.msk.msra.mxu3 %vm18_vm0, %v38_v1  ;;  %v30_v3 = vld [vmem:[%s683_s0 + $0x18] sm:$0xff]  ;;  %v36_v7 = vld [vmem:[%s682_s1 + $0x8] sm:$0xff]  ;;  %20 = vst.msk [vmem:[#allocation2 + $0x8] sm:$0xff] %vm18_vm0, %v517_v24 }
   0x3   :  { %v41_v4 = vld [vmem:[%s682_s1 + $0x30] sm:$0xff]  ;;  %v42_v5 = vld [vmem:[%s682_s1 + $0x38] sm:$0xff]  ;;  %492 = vmatpush.xpose.msk.msra.mxu0 %vm18_vm0, %v35_v6  ;;  %v27_v8 = vld [vmem:[%s683_s0] sm:$0xff]  ;;  %494 = vmatpush.xpose.msk.msra.mxu1 %vm18_vm0, %v36_v7  ;;  %21 = vst.msk [vmem:[#allocation2 + $0x10] sm:$0xff] %vm18_vm0, %v517_v24 }
   0x4   :  { %v39_v9 = vld [vmem:[%s682_s1 + $0x20] sm:$0xff]  ;;  %v40_v10 = vld [vmem:[%s682_s1 + $0x28] sm:$0xff]  ;;  %v45_v12 = vld [vmem:[%s684_s2 + $0x10] sm:$0xff]  ;;  %22 = vst.msk [vmem:[#allocation2 + $0x18] sm:$0xff] %vm18_vm0, %v517_v24 }
   0x5   :  { %497 = vmatmul.msk.f32.vlgmr.msra.gmra.mxu2 %vm18_vm0, %v29_v2  ;;  %499 = vmatmul.msk.f32.vlgmr.msra.gmra.mxu3 %vm18_vm0, %v30_v3  ;;  %v28_v11 = vld [vmem:[%s683_s0 + $0x8] sm:$0xff]  ;;  %v46_v13 = vld [vmem:[%s684_s2 + $0x18] sm:$0xff]  ;;  %v43_v14 = vld [vmem:[%s684_s2] sm:$0xff]  ;;  %23 = vst.msk [vmem:[#allocation2 + $0x20] sm:$0xff] %vm18_vm0, %v517_v24 }
   0x6   :  { %504 = vmatpush.xpose.msk.msrb.mxu2 %vm18_vm0, %v41_v4  ;;  %506 = vmatpush.xpose.msk.msrb.mxu3 %vm18_vm0, %v42_v5  ;;  %v44_v15 = vld [vmem:[%s684_s2 + $0x8] sm:$0xff]  ;;  %v33_v16 = vld [vmem:[%s683_s0 + $0x30] sm:$0xff]  ;;  %v34_v17 = vld [vmem:[%s683_s0 + $0x38] sm:$0xff]  ;;  %24 = vst.msk [vmem:[#allocation2 + $0x28] sm:$0xff] %vm18_vm0, %v517_v24 }
   0x7   :  { %500 = vmatpush.xpose.msk.msrb.mxu0 %vm18_vm0, %v39_v9  ;;  %502 = vmatpush.xpose.msk.msrb.mxu1 %vm18_vm0, %v40_v10  ;;  %v31_v18 = vld [vmem:[%s683_s0 + $0x20] sm:$0xff]  ;;  %v32_v19 = vld [vmem:[%s683_s0 + $0x28] sm:$0xff]  ;;  %v49_v20 = vld [vmem:[%s684_s2 + $0x30] sm:$0xff]  ;;  %25 = vst.msk [vmem:[#allocation2 + $0x30] sm:$0xff] %vm18_vm0, %v517_v24 }
   0x8   :  { %493 = vmatmul.msk.f32.vlgmr.msra.gmra.mxu0 %vm18_vm0, %v27_v8  ;;  %495 = vmatmul.msk.f32.vlgmr.msra.gmra.mxu1 %vm18_vm0, %v28_v11  ;;  %v50_v21 = vld [vmem:[%s684_s2 + $0x38] sm:$0xff]  ;;  %v47_v22 = vld [vmem:[%s684_s2 + $0x20] sm:$0xff]  ;;  %v48_v23 = vld [vmem:[%s684_s2 + $0x28] sm:$0xff]  ;;  %26 = vst.msk [vmem:[#allocation2 + $0x38] sm:$0xff] %vm18_vm0, %v517_v24 }
   0x9   :  { %v260_v33 = vld [vmem:[#allocation2] sm:$0xff]  ;;  %v261_v35 = vld [vmem:[#allocation2 + $0x8] sm:$0xff] }
   0xa   :  { %333 = vmatpush.msra.mxu2 %v45_v12  ;;  %356 = vmatpush.msra.mxu3 %v46_v13  ;;  %v262_v40 = vld [vmem:[#allocation2 + $0x10] sm:$0xff] }
   0xb   :  { %287 = vmatpush.msra.mxu0 %v43_v14  ;;  %310 = vmatpush.msra.mxu1 %v44_v15  ;;  %v263_v41 = vld [vmem:[#allocation2 + $0x18] sm:$0xff] }
   0xc   :  { %v264_v39 = vld [vmem:[#allocation2 + $0x20] sm:$0xff] }
   0xd   :  { %505 = vmatmul.msk.f32.vlgmr.msrb.gmra.mxu2 %vm18_vm0, %v33_v16  ;;  %507 = vmatmul.msk.f32.vlgmr.msrb.gmra.mxu3 %vm18_vm0, %v34_v17  ;;  %v265_v44 = vld [vmem:[#allocation2 + $0x28] sm:$0xff] }
   0xe   :  { %425 = vmatpush.msrb.mxu2 %v49_v20  ;;  %448 = vmatpush.msrb.mxu3 %v50_v21  ;;  %v266_v53 = vld [vmem:[#allocation2 + $0x30] sm:$0xff] }
   0xf   :  { %v267_v55 = vld [vmem:[#allocation2 + $0x38] sm:$0xff] }
  0x10   :  { %501 = vmatmul.msk.f32.vlgmr.msrb.gmra.mxu0 %vm18_vm0, %v31_v18  ;;  %503 = vmatmul.msk.f32.vlgmr.msrb.gmra.mxu1 %vm18_vm0, %v32_v19 }
  0x11   :  { %379 = vmatpush.msrb.mxu0 %v47_v22  ;;  %402 = vmatpush.msrb.mxu1 %v48_v23 }
  0x85   :  { %v75_v25 = vpop.f32.mrf.mxu0  ;;  %v101_v26 = vpop.f32.mrf.mxu1 }
  0x86   :  { %508 = vmatmul.msk.f32.vlgmr.msra.gmra.mxu0 %vm268_vm1, %v75_v25  ;;  %509 = vmatmul.msk.f32.vlgmr.msra.gmra.mxu1 %vm268_vm1, %v101_v26 }
  0x88   :  { %v127_v27 = vpop.f32.mrf.mxu2  ;;  %v153_v28 = vpop.f32.mrf.mxu3 }
  0x89   :  { %510 = vmatmul.msk.f32.vlgmr.msra.gmra.mxu2 %vm268_vm1, %v127_v27  ;;  %511 = vmatmul.msk.f32.vlgmr.msra.gmra.mxu3 %vm268_vm1, %v153_v28 }
  0x8d   :  { %v179_v29 = vpop.f32.mrf.mxu0  ;;  %v205_v30 = vpop.f32.mrf.mxu1 }
  0x8e   :  { %512 = vmatmul.msk.f32.vlgmr.msrb.gmra.mxu0 %vm268_vm1, %v179_v29  ;;  %513 = vmatmul.msk.f32.vlgmr.msrb.gmra.mxu1 %vm268_vm1, %v205_v30 }
  0x90   :  { %v231_v31 = vpop.f32.mrf.mxu2  ;;  %v257_v32 = vpop.f32.mrf.mxu3 }
  0x91   :  { %514 = vmatmul.msk.f32.vlgmr.msrb.gmra.mxu2 %vm268_vm1, %v231_v31  ;;  %515 = vmatmul.msk.f32.vlgmr.msrb.gmra.mxu3 %vm268_vm1, %v257_v32 }
 0x103   :  { %v289_v34 = vpop.f32.mrf.mxu0  ;;  %v312_v37 = vpop.f32.mrf.mxu1 }
 0x104   :  { %v453_v36 = vadd.f32 %v289_v34, %v260_v33  ;;  %v454_v38 = vadd.f32 %v312_v37, %v261_v35 }
 0x106   :  { %461 = vst.msk [vmem:[#allocation2] sm:$0xff] %vm18_vm0, %v453_v36 }
 0x107   :  { %462 = vst.msk [vmem:[#allocation2 + $0x8] sm:$0xff] %vm18_vm0, %v454_v38 }
 0x10b   :  { %v381_v42 = vpop.f32.mrf.mxu0  ;;  %v404_v50 = vpop.f32.mrf.mxu1 }
 0x10c   :  { %v457_v43 = vadd.f32 %v381_v42, %v264_v39  ;;  %v335_v46 = vpop.f32.mrf.mxu2  ;;  %v358_v47 = vpop.f32.mrf.mxu3  ;;  %v458_v52 = vadd.f32 %v404_v50, %v265_v44 }
 0x10d   :  { %v472_v45 = vld [vmem:[#allocation2] sm:$0xff]  ;;  %v455_v48 = vadd.f32 %v335_v46, %v262_v40  ;;  %v456_v49 = vadd.f32 %v358_v47, %v263_v41 }
 0x10e   :  { %480 = vst.msk [vmem:[%s685_s3] sm:$0xff] %vm18_vm0, %v472_v45  ;;  %v473_v51 = vld [vmem:[#allocation2 + $0x8] sm:$0xff] }
 0x10f   :  { %465 = vst.msk [vmem:[#allocation2 + $0x20] sm:$0xff] %vm18_vm0, %v457_v43 }
 0x110   :  { %481 = vst.msk [vmem:[%s685_s3 + $0x8] sm:$0xff] %vm18_vm0, %v473_v51 }
 0x111   :  { %463 = vst.msk [vmem:[#allocation2 + $0x10] sm:$0xff] %vm18_vm0, %v455_v48 }
 0x112   :  { %464 = vst.msk [vmem:[#allocation2 + $0x18] sm:$0xff] %vm18_vm0, %v456_v49 }
 0x113   :  { %466 = vst.msk [vmem:[#allocation2 + $0x28] sm:$0xff] %vm18_vm0, %v458_v52 }
 0x114   :  { %v427_v54 = vpop.f32.mrf.mxu2  ;;  %v450_v56 = vpop.f32.mrf.mxu3 }
 0x115   :  { %v459_v58 = vadd.f32 %v427_v54, %v266_v53  ;;  %v460_v60 = vadd.f32 %v450_v56, %v267_v55 }
 0x116   :  { %v476_v57 = vld [vmem:[#allocation2 + $0x20] sm:$0xff] }
 0x117   :  { %484 = vst.msk [vmem:[%s685_s3 + $0x20] sm:$0xff] %vm18_vm0, %v476_v57 }
 0x118   :  { %v474_v59 = vld [vmem:[#allocation2 + $0x10] sm:$0xff]  ;;  %467 = vst.msk [vmem:[#allocation2 + $0x30] sm:$0xff] %vm18_vm0, %v459_v58 }
 0x119   :  { %482 = vst.msk [vmem:[%s685_s3 + $0x10] sm:$0xff] %vm18_vm0, %v474_v59  ;;  %v475_v61 = vld [vmem:[#allocation2 + $0x18] sm:$0xff] }
 0x11a   :  { %483 = vst.msk [vmem:[%s685_s3 + $0x18] sm:$0xff] %vm18_vm0, %v475_v61  ;;  %v477_v62 = vld [vmem:[#allocation2 + $0x28] sm:$0xff] }
 0x11b   :  { %485 = vst.msk [vmem:[%s685_s3 + $0x28] sm:$0xff] %vm18_vm0, %v477_v62 }
 0x11c   :  { %468 = vst.msk [vmem:[#allocation2 + $0x38] sm:$0xff] %vm18_vm0, %v460_v60 }
 0x11f   :  { %v478_v63 = vld [vmem:[#allocation2 + $0x30] sm:$0xff] }
 0x120   :  { %486 = vst.msk [vmem:[%s685_s3 + $0x30] sm:$0xff] %vm18_vm0, %v478_v63 }
 0x123   :  { %v479_v0 = vld [vmem:[#allocation2 + $0x38] sm:$0xff] }
 0x124   :  { %487 = vst.msk [vmem:[%s685_s3 + $0x38] sm:$0xff] %vm18_vm0, %v479_v0 }

// kernel: transformer_block_forward.9
= control target key start
LH: loop header
LB: loop body
LE: loop exit
PB: predicated region body
PF: predicated region fallthrough
CT: control target
= control target key end

     0   :  { %s417_s0 = inlined_call_operand.vmem [shape: f32[16,384], index: 0, kind: input, shape index: {}]   ;;  %s418_s1 = inlined_call_operand.vmem [shape: f32[384,128], index: 1, kind: input, shape index: {}]   ;;  %s419_s2 = inlined_call_operand.vmem [shape: f32[1,128], index: 2, kind: input, shape index: {}]   ;;  %s420_s3 = inlined_call_operand.vmem [shape: f32[16,128], index: 3, kind: input, shape index: {}]   ;;  %s421_s4 = inlined_call_operand.hbm [shape: f32[16,128], index: 4, kind: output, shape index: {}]  }
   0x1   :  { %v71_v0 = vld [vmem:[%s418_s1 + $0x178] sm:$0xff]  ;;  %v70_v2 = vld [vmem:[%s418_s1 + $0x170] sm:$0xff]  ;;  %v69_v5 = vld [vmem:[%s418_s1 + $0x168] sm:$0xff] }
   0x2   :  { %v39_v1 = vld [vmem:[%s418_s1 + $0x78] sm:$0xff]  ;;  %122 = vmatpush.msra.mxu2 %v71_v0  ;;  %v38_v3 = vld [vmem:[%s418_s1 + $0x70] sm:$0xff]  ;;  %v37_v6 = vld [vmem:[%s418_s1 + $0x68] sm:$0xff] }
   0x3   :  { %76 = vmatpush.msra.mxu0 %v39_v1  ;;  %v55_v4 = vld [vmem:[%s418_s1 + $0xf8] sm:$0xff]  ;;  %169 = vmatpush.msra.mxu3 %v39_v1  ;;  %v54_v7 = vld [vmem:[%s418_s1 + $0xf0] sm:$0xff]  ;;  %v53_v8 = vld [vmem:[%s418_s1 + $0xe8] sm:$0xff] }
   0x4   :  { %99 = vmatpush.msra.mxu1 %v55_v4  ;;  %123 = vmatpush.msra.mxu2 %v70_v2  ;;  %v68_v9 = vld [vmem:[%s418_s1 + $0x160] sm:$0xff]  ;;  %v67_v12 = vld [vmem:[%s418_s1 + $0x158] sm:$0xff]  ;;  %v66_v15 = vld [vmem:[%s418_s1 + $0x150] sm:$0xff] }
   0x5   :  { %77 = vmatpush.msra.mxu0 %v38_v3  ;;  %170 = vmatpush.msra.mxu3 %v38_v3  ;;  %v36_v10 = vld [vmem:[%s418_s1 + $0x60] sm:$0xff]  ;;  %v35_v13 = vld [vmem:[%s418_s1 + $0x58] sm:$0xff]  ;;  %v34_v16 = vld [vmem:[%s418_s1 + $0x50] sm:$0xff] }
   0x6   :  { %100 = vmatpush.msra.mxu1 %v54_v7  ;;  %124 = vmatpush.msra.mxu2 %v69_v5  ;;  %v52_v11 = vld [vmem:[%s418_s1 + $0xe0] sm:$0xff]  ;;  %v51_v14 = vld [vmem:[%s418_s1 + $0xd8] sm:$0xff]  ;;  %v50_v17 = vld [vmem:[%s418_s1 + $0xd0] sm:$0xff] }
   0x7   :  { %78 = vmatpush.msra.mxu0 %v37_v6  ;;  %171 = vmatpush.msra.mxu3 %v37_v6  ;;  %v65_v18 = vld [vmem:[%s418_s1 + $0x148] sm:$0xff]  ;;  %v64_v21 = vld [vmem:[%s418_s1 + $0x140] sm:$0xff]  ;;  %v63_v24 = vld [vmem:[%s418_s1 + $0x138] sm:$0xff] }
   0x8   :  { %101 = vmatpush.msra.mxu1 %v53_v8  ;;  %125 = vmatpush.msra.mxu2 %v68_v9  ;;  %v33_v19 = vld [vmem:[%s418_s1 + $0x48] sm:$0xff]  ;;  %v32_v22 = vld [vmem:[%s418_s1 + $0x40] sm:$0xff]  ;;  %v31_v25 = vld [vmem:[%s418_s1 + $0x38] sm:$0xff] }
   0x9   :  { %79 = vmatpush.msra.mxu0 %v36_v10  ;;  %172 = vmatpush.msra.mxu3 %v36_v10  ;;  %v49_v20 = vld [vmem:[%s418_s1 + $0xc8] sm:$0xff]  ;;  %v48_v23 = vld [vmem:[%s418_s1 + $0xc0] sm:$0xff]  ;;  %v47_v26 = vld [vmem:[%s418_s1 + $0xb8] sm:$0xff] }
   0xa   :  { %102 = vmatpush.msra.mxu1 %v52_v11  ;;  %126 = vmatpush.msra.mxu2 %v67_v12  ;;  %v62_v27 = vld [vmem:[%s418_s1 + $0x130] sm:$0xff]  ;;  %v61_v29 = vld [vmem:[%s418_s1 + $0x128] sm:$0xff] }
   0xb   :  { %80 = vmatpush.msra.mxu0 %v35_v13  ;;  %173 = vmatpush.msra.mxu3 %v35_v13  ;;  %v30_v28 = vld [vmem:[%s418_s1 + $0x30] sm:$0xff]  ;;  %v29_v31 = vld [vmem:[%s418_s1 + $0x28] sm:$0xff] }
   0xc   :  { %103 = vmatpush.msra.mxu1 %v51_v14  ;;  %127 = vmatpush.msra.mxu2 %v66_v15  ;;  %v46_v30 = vld [vmem:[%s418_s1 + $0xb0] sm:$0xff] }
   0xd   :  { %81 = vmatpush.msra.mxu0 %v34_v16  ;;  %174 = vmatpush.msra.mxu3 %v34_v16 }
   0xe   :  { %104 = vmatpush.msra.mxu1 %v50_v17  ;;  %128 = vmatpush.msra.mxu2 %v65_v18 }
   0xf   :  { %82 = vmatpush.msra.mxu0 %v33_v19  ;;  %175 = vmatpush.msra.mxu3 %v33_v19 }
  0x10   :  { %105 = vmatpush.msra.mxu1 %v49_v20  ;;  %129 = vmatpush.msra.mxu2 %v64_v21 }
  0x11   :  { %83 = vmatpush.msra.mxu0 %v32_v22  ;;  %176 = vmatpush.msra.mxu3 %v32_v22 }
  0x12   :  { %106 = vmatpush.msra.mxu1 %v48_v23  ;;  %130 = vmatpush.msra.mxu2 %v63_v24 }
  0x13   :  { %84 = vmatpush.msra.mxu0 %v31_v25  ;;  %177 = vmatpush.msra.mxu3 %v31_v25 }
  0x14   :  { %107 = vmatpush.msra.mxu1 %v47_v26 }
  0x15   :  { %9 = vsyncpa [#allocation3], 0  ;;  %131 = vmatpush.msra.mxu2 %v62_v27  ;;  %85 = vmatpush.msra.mxu0 %v30_v28  ;;  %v45_v32 = vld [vmem:[%s418_s1 + $0xa8] sm:$0xff]  ;;  %v60_v33 = vld [vmem:[%s418_s1 + $0x120] sm:$0xff]  ;;  %s157_s24 = sshll.u32 %s421_s4, 4  ;;  %s216_s27 = smov 128   ;;  %s158_s24 = int_to_ptr.hbm [resolvable:$true] %s157_s24 }
  0x16   :  { %178 = vmatpush.msra.mxu3 %v30_v28  ;;  %108 = vmatpush.msra.mxu1 %v46_v30  ;;  %v28_v34 = vld [vmem:[%s418_s1 + $0x20] sm:$0xff]  ;;  %v59_v36 = vld [vmem:[%s418_s1 + $0x118] sm:$0xff]  ;;  %v58_v39 = vld [vmem:[%s418_s1 + $0x110] sm:$0xff]  ;;  %s217_s28 = smov 8  }
  0x17   :  { %132 = vmatpush.msra.mxu2 %v61_v29  ;;  %86 = vmatpush.msra.mxu0 %v29_v31  ;;  %v44_v35 = vld [vmem:[%s418_s1 + $0xa0] sm:$0xff]  ;;  %v27_v37 = vld [vmem:[%s418_s1 + $0x18] sm:$0xff]  ;;  %v26_v40 = vld [vmem:[%s418_s1 + $0x10] sm:$0xff] }
  0x18   :  { %179 = vmatpush.msra.mxu3 %v29_v31  ;;  %109 = vmatpush.msra.mxu1 %v45_v32  ;;  %v43_v38 = vld [vmem:[%s418_s1 + $0x98] sm:$0xff]  ;;  %v42_v41 = vld [vmem:[%s418_s1 + $0x90] sm:$0xff]  ;;  %v57_v42 = vld [vmem:[%s418_s1 + $0x108] sm:$0xff] }
  0x19   :  { %133 = vmatpush.msra.mxu2 %v60_v33  ;;  %87 = vmatpush.msra.mxu0 %v28_v34  ;;  %v25_v43 = vld [vmem:[%s418_s1 + $0x8] sm:$0xff]  ;;  %v56_v45 = vld [vmem:[%s418_s1 + $0x100] sm:$0xff]  ;;  %v20_v47 = vld [vmem:[%s417_s0 + $0x10] sm:$0xff] }
  0x1a   :  { %180 = vmatpush.msra.mxu3 %v28_v34  ;;  %110 = vmatpush.msra.mxu1 %v44_v35  ;;  %v41_v44 = vld [vmem:[%s418_s1 + $0x88] sm:$0xff]  ;;  %v24_v46 = vld [vmem:[%s418_s1] sm:$0xff]  ;;  %v21_v50 = vld [vmem:[%s417_s0 + $0x18] sm:$0xff] }
  0x1b   :  { %134 = vmatpush.msra.mxu2 %v59_v36  ;;  %88 = vmatpush.msra.mxu0 %v27_v37  ;;  %v18_v48 = vld [vmem:[%s417_s0] sm:$0xff]  ;;  %v19_v51 = vld [vmem:[%s417_s0 + $0x8] sm:$0xff] }
  0x1c   :  { %181 = vmatpush.msra.mxu3 %v27_v37  ;;  %111 = vmatpush.msra.mxu1 %v43_v38  ;;  %v40_v49 = vld [vmem:[%s418_s1 + $0x80] sm:$0xff]  ;;  %v23_v52 = vld [vmem:[%s417_s0 + $0x28] sm:$0xff] }
  0x1d   :  { %135 = vmatpush.msra.mxu2 %v58_v39  ;;  %89 = vmatpush.msra.mxu0 %v26_v40  ;;  %v22_v53 = vld [vmem:[%s417_s0 + $0x20] sm:$0xff]  ;;  %s215_s0 = smov [#allocation2]   ;;  %v146_v4 = vld [vmem:[%s420_s3 + $0x8] sm:$0xff] }
  0x1e   :  { %182 = vmatpush.msra.mxu3 %v26_v40  ;;  %112 = vmatpush.msra.mxu1 %v42_v41  ;;  %v188_v54 = vld [vmem:[%s419_s2] ss:$0 sm:$0xff]  ;;  %s155_s22 = sshll.u32 %s215_s0, 4  ;;  %s156_s22 = int_to_ptr.vmem [resolvable:$true] %s155_s22 }
  0x1f   :  { %136 = vmatpush.msra.mxu2 %v57_v42  ;;  %90 = vmatpush.msra.mxu0 %v25_v43  ;;  %v145_v60 = vld [vmem:[%s420_s3] sm:$0xff] }
  0x20   :  { %183 = vmatpush.msra.mxu3 %v25_v43  ;;  %113 = vmatpush.msra.mxu1 %v41_v44 }
  0x21   :  { %137 = vmatpush.msra.mxu2 %v56_v45  ;;  %91 = vmatpush.msra.mxu0 %v24_v46 }
  0x22   :  { %138 = vmatmul.f32.vlgmr.msra.gmra.mxu2 %v20_v47  ;;  %92 = vmatmul.f32.vlgmr.msra.gmra.mxu0 %v18_v48 }
  0x23   :  { %184 = vmatpush.msra.mxu3 %v24_v46  ;;  %114 = vmatpush.msra.mxu1 %v40_v49 }
  0x24   :  { %95 = vmatmul.f32.vlgmr.msra.gmra.mxu3 %v21_v50  ;;  %115 = vmatmul.f32.vlgmr.msra.gmra.mxu1 %v19_v51 }
  0x2a   :  { %141 = vmatmul.f32.gmra.mxu2 %v23_v52 }
  0x2c   :  { %118 = vmatmul.f32.gmra.mxu1 %v22_v53 }
  0x9f   :  { %v93_v55 = vpop.f32.mrf.mxu0 }
  0xa0   :  { %v94_v56 = vadd.f32 %v188_v54, %v93_v55 }
  0xa1   :  { %v116_v57 = vpop.f32.mrf.mxu1 }
  0xa2   :  { %v117_v58 = vadd.f32 %v116_v57, %v94_v56 }
  0xa5   :  { %v139_v59 = vpop.f32.mrf.mxu2 }
  0xa6   :  { %v140_v61 = vadd.f32 %v139_v59, %v117_v58 }
  0xa7   :  { %v96_v62 = vpop.f32.mrf.mxu3 }
  0xa8   :  { %v147_v63 = vadd.f32 %v145_v60, %v140_v61  ;;  %v97_v0 = vadd.f32 %v188_v54, %v96_v62 }
  0xa9   :  { %v119_v1 = vpop.f32.mrf.mxu1 }
  0xaa   :  { %149 = vst [vmem:[#allocation2] sm:$0xff] %v147_v63  ;;  %v120_v2 = vadd.f32 %v119_v1, %v97_v0 }
  0xad   :  { %v142_v3 = vpop.f32.mrf.mxu2 }
  0xae   :  { %v143_v5 = vadd.f32 %v142_v3, %v120_v2 }
  0xb0   :  { %v148_v6 = vadd.f32 %v146_v4, %v143_v5 }
  0xb2   :  { %150 = vst [vmem:[#allocation2 + $0x8] sm:$0xff] %v148_v6 }
  0xb3   :  { %163 = dma.vmem_to_hbm [thread:$0]  %s156_s22, 256, %s158_s24, [#allocation3], %s216_s27, %s216_s27, %s217_s28  }
  0xb4   :  { %213 = dma.done.wait [#allocation3], 256  }
  0xb5   :  { %214 = vsyncadd [#allocation3], 4294967040 }
  0xb6   :  { %168 = vsyncpa [#allocation3], 1 }

</bundles_post_ra>
